<compile_context>
chip_gen: v6e
topology: v6e:2x2x1
jax: 0.10.0
libtpu: 0.0.40
codegen_flags: <defaults>
</compile_context>

<pallas_src>
import functools

import jax
import jax.numpy as jnp
from jax.experimental import pallas as pl
from jax.experimental.pallas import tpu as pltpu


# ----------------------------------------------------------------------------
# Fused whole-ensemble kernel (grid axis = batch image)
# ----------------------------------------------------------------------------

def _fused_kernel(x_ref, masks_ref, pool_ref,
                  ws_ref, bs_ref, we_ref, be_ref, wd_ref, bd_ref,
                  wp_ref, bp_ref, wc_ref, bc_ref,
                  o_ref, dw_scr, *, H, W, off, num_models, num_classes):
    f32 = jnp.float32
    bf16 = jnp.bfloat16
    n = H * W                                 # rows handled this step (1 image)
    c_tot = dw_scr.shape[1]                   # M * c_exp

    # Zero only the halo rows (interior is fully overwritten below).  Done
    # every step so it stays correct when the parallel grid axis is sharded
    # across v7x's 2 TensorCores (each core has its own scratch instance).
    dw_scr[:off, :] = jnp.zeros((off, c_tot), f32)
    dw_scr[off + n:, :] = jnp.zeros((off, c_tot), f32)

    # ---- stem: 1x1 conv + ReLU6 (MXU, bf16 x bf16 -> f32) ------------------
    stem = jnp.dot(x_ref[...], ws_ref[...], preferred_element_type=f32) + bs_ref[...]
    stem = jnp.clip(stem, 0.0, 6.0)                          # (n, M*Cs)

    # ---- inverted residual: 1x1 expand (block-diag) + ReLU6 ----------------
    exp = jnp.dot(stem.astype(bf16), we_ref[...],
                  preferred_element_type=f32) + be_ref[...]
    exp = jnp.clip(exp, 0.0, 6.0)                            # (n, M*Ce)

    # ---- 3x3 depthwise ('same') + ReLU6, entirely in VMEM ------------------
    dw_scr[off:off + n, :] = exp                             # aligned interior store
    wd = wd_ref[...]                                         # (9, M*Ce)

    acc = jnp.zeros((n, c_tot), f32)
    for j_idx, dj in enumerate((-1, 0, 1)):
        part = None
        for i_idx, di in enumerate((-1, 0, 1)):
            k = 3 * i_idx + j_idx                            # kernel tap index
            s = off + di * W + dj                            # static slice start
            contrib = dw_scr[s:s + n, :] * wd[k:k + 1, :]
            part = contrib if part is None else part + contrib
        # Column-boundary mask applied ONCE per dj (row boundaries read the
        # zeroed halo, so they need no mask at all).
        if dj == -1:
            part = part * masks_ref[0]
        elif dj == 1:
            part = part * masks_ref[1]
        acc = acc + part
    dwo = jnp.clip(acc + bd_ref[...], 0.0, 6.0)              # (n, M*Ce)

    # ---- 1x1 linear project (block-diag) + residual add --------------------
    proj = jnp.dot(dwo.astype(bf16), wp_ref[...],
                   preferred_element_type=f32) + bp_ref[...]
    feat = proj + stem                                       # (n, M*Cs)

    # ---- global average pool on the MXU (bf16 operands, f32 accumulate) ----
    pooled = jnp.dot(pool_ref[...], feat.astype(bf16),
                     preferred_element_type=f32)             # (1, M*Cs)

    # ---- classifier (block-diag) + per-model stable softmax + ensemble sum -
    logits = jnp.dot(pooled.astype(bf16), wc_ref[...],
                     preferred_element_type=f32) + bc_ref[...]   # (1, M*K)
    out = jnp.zeros((1, num_classes), f32)
    for m in range(num_models):
        lg = logits[:, m * num_classes:(m + 1) * num_classes]
        lg = lg - jnp.max(lg, axis=1, keepdims=True)
        e = jnp.exp(lg)
        out = out + e / jnp.sum(e, axis=1, keepdims=True)    # exact division
    o_ref[...] = out


# ----------------------------------------------------------------------------
# Wrapper: one pallas_call for the whole ensemble
# ----------------------------------------------------------------------------

def base_ensemble_forward(x_nchw, p, *, num_models, num_classes):
    """Equivalent of BaseEnsemble.forward: sum_m softmax(model_m(x), dim=1)."""
    x_nhwc = jnp.transpose(x_nchw, (0, 2, 3, 1)).astype(jnp.float32)  # NCHW->NHWC glue
    B, H, W, c_in = x_nhwc.shape
    hw = H * W
    n_total = B * hw

    c_in_pad = p["w_stem"].shape[0]         # input channels padded to 8
    c_stem_tot = p["w_stem"].shape[1]       # M * c_stem
    c_exp_tot = p["w_exp"].shape[1]         # M * c_exp
    k_tot = p["w_cls"].shape[1]             # M * num_classes
    assert k_tot == num_models * num_classes

    # bf16 input with zero-padded channels (matching zero rows in w_stem).
    x2d = x_nhwc.reshape(n_total, c_in)
    x2d = jnp.pad(x2d, ((0, 0), (0, c_in_pad - c_in))).astype(jnp.bfloat16)

    # Halo offset: >= W+1 (max tap shift) and multiple of 8 for aligned stores.
    off = ((W + 1 + 7) // 8) * 8
    assert off >= W + 1 and off % 8 == 0 and W >= 2 and H >= 2

    # Precomputed column-boundary masks (dj=-1 / dj=+1), shared by all steps.
    wi = jnp.arange(hw, dtype=jnp.int32) % W
    mask_l = (wi >= 1).astype(jnp.float32)
    mask_r = (wi <= W - 2).astype(jnp.float32)
    masks = jnp.broadcast_to(jnp.stack([mask_l, mask_r], 0)[:, :, None],
                             (2, hw, c_exp_tot))

    # Global-average-pool row vector (1/(H*W)=1/256 is exact in bf16 here).
    pool = jnp.full((1, hw), 1.0 / hw, jnp.bfloat16)

    kernel = functools.partial(_fused_kernel, H=H, W=W, off=off,
                               num_models=num_models, num_classes=num_classes)
    full = lambda shape: pl.BlockSpec(shape, lambda b, s=len(shape): (0,) * s)

    probs = pl.pallas_call(
        kernel,
        out_shape=jax.ShapeDtypeStruct((B, 1, num_classes), jnp.float32),
        grid=(B,),                                            # one image per step
        in_specs=[
            pl.BlockSpec((hw, c_in_pad), lambda b: (b, 0)),   # x: image b (bf16)
            full((2, hw, c_exp_tot)),                         # column masks (shared)
            full((1, hw)),                                    # pool row (bf16, shared)
            full((c_in_pad, c_stem_tot)),                     # w_stem (bf16, cat)
            full((1, c_stem_tot)),                            # b_stem
            full((c_stem_tot, c_exp_tot)),                    # w_exp  (bf16, block-diag)
            full((1, c_exp_tot)),                             # b_exp
            full((9, c_exp_tot)),                             # w_dw   (f32, cat)
            full((1, c_exp_tot)),                             # b_dw
            full((c_exp_tot, c_stem_tot)),                    # w_proj (bf16, block-diag)
            full((1, c_stem_tot)),                            # b_proj
            full((c_stem_tot, k_tot)),                        # w_cls  (bf16, block-diag)
            full((1, k_tot)),                                 # b_cls
        ],
        out_specs=pl.BlockSpec((None, 1, num_classes), lambda b: (b, 0, 0)),
        scratch_shapes=[pltpu.VMEM((hw + 2 * off, c_exp_tot), jnp.float32)],
        compiler_params=pltpu.CompilerParams(
            dimension_semantics=("parallel",)),               # v7x: images across 2 TCs
    )(x2d, masks, pool,
      p["w_stem"], p["b_stem"], p["w_exp"], p["b_exp"],
      p["w_dw"], p["b_dw"], p["w_proj"], p["b_proj"],
      p["w_cls"], p["b_cls"])

    return probs.reshape(B, num_classes)


# ----------------------------------------------------------------------------
# Synthetic parameter init (stand-in for the pretrained .pth weights)
# ----------------------------------------------------------------------------

def init_model_params(key, c_in, c_stem, c_exp, num_classes):
    ks = jax.random.split(key, 10)
    s = 0.1
    return {
        "w_stem": s * jax.random.normal(ks[0], (c_in, c_stem), jnp.float32),
        "b_stem": s * jax.random.normal(ks[1], (c_stem,), jnp.float32),
        "w_exp": s * jax.random.normal(ks[2], (c_stem, c_exp), jnp.float32),
        "b_exp": s * jax.random.normal(ks[3], (c_exp,), jnp.float32),
        "w_dw": s * jax.random.normal(ks[4], (9, c_exp), jnp.float32),
        "b_dw": s * jax.random.normal(ks[5], (c_exp,), jnp.float32),
        "w_proj": s * jax.random.normal(ks[6], (c_exp, c_stem), jnp.float32),
        "b_proj": s * jax.random.normal(ks[7], (c_stem,), jnp.float32),
        "w_cls": s * jax.random.normal(ks[8], (c_stem, num_classes), jnp.float32),
        "b_cls": s * jax.random.normal(ks[9], (num_classes,), jnp.float32),
    }


def _block_diag(mats):
    rows = sum(m.shape[0] for m in mats)
    cols = sum(m.shape[1] for m in mats)
    out = jnp.zeros((rows, cols), mats[0].dtype)
    r = c = 0
    for m in mats:
        out = out.at[r:r + m.shape[0], c:c + m.shape[1]].set(m)
        r += m.shape[0]
        c += m.shape[1]
    return out


def stack_and_prepare(params_list, c_in_pad=8):
    """Merge the M models into channel-concatenated / block-diagonal weights
    so the whole ensemble runs as 3x-wider MXU-friendly matmuls."""
    f32, bf16 = jnp.float32, jnp.bfloat16

    def cat(name):
        return jnp.concatenate([p[name] for p in params_list], axis=-1)

    def bdiag(name):
        return _block_diag([p[name] for p in params_list])

    w_stem = jnp.concatenate([p["w_stem"] for p in params_list], axis=1)
    c_in = w_stem.shape[0]
    w_stem = jnp.pad(w_stem, ((0, c_in_pad - c_in), (0, 0)))   # pad input channels

    return {
        "w_stem": w_stem.astype(bf16),                         # (8, M*Cs)
        "b_stem": cat("b_stem")[None, :].astype(f32),          # (1, M*Cs)
        "w_exp": bdiag("w_exp").astype(bf16),                  # (M*Cs, M*Ce)
        "b_exp": cat("b_exp")[None, :].astype(f32),
        "w_dw": cat("w_dw").astype(f32),                       # (9, M*Ce)
        "b_dw": cat("b_dw")[None, :].astype(f32),
        "w_proj": bdiag("w_proj").astype(bf16),                # (M*Ce, M*Cs)
        "b_proj": cat("b_proj")[None, :].astype(f32),
        "w_cls": bdiag("w_cls").astype(bf16),                  # (M*Cs, M*K)
        "b_cls": cat("b_cls")[None, :].astype(f32),
    }


# ----------------------------------------------------------------------------
# Pure-JAX reference (same dtype choices) for correctness checking
# ----------------------------------------------------------------------------

def _reference_forward(x_nchw, params_list, num_classes):
    f32, bf16 = jnp.float32, jnp.bfloat16
    x = jnp.transpose(x_nchw, (0, 2, 3, 1)).astype(f32)
    B, H, W, c_in = x.shape
    n = B * H * W
    x2 = x.reshape(n, c_in).astype(bf16)
    inv_hw = float(jnp.bfloat16(1.0 / (H * W)))      # matches kernel's bf16 pool weight
    out = jnp.zeros((B, num_classes), f32)
    for p in params_list:
        stem = jnp.clip(jnp.dot(x2, p["w_stem"].astype(bf16),
                                preferred_element_type=f32) + p["b_stem"], 0.0, 6.0)
        exp = jnp.clip(jnp.dot(stem.astype(bf16), p["w_exp"].astype(bf16),
                               preferred_element_type=f32) + p["b_exp"], 0.0, 6.0)
        e4 = exp.reshape(B, H, W, -1)
        ep = jnp.pad(e4, ((0, 0), (1, 1), (1, 1), (0, 0)))
        acc = jnp.zeros_like(e4)
        k = 0
        for di in range(3):
            for dj in range(3):
                acc = acc + ep[:, di:di + H, dj:dj + W, :] * p["w_dw"][k]
                k += 1
        dw = jnp.clip(acc + p["b_dw"], 0.0, 6.0).reshape(n, -1)
        proj = jnp.dot(dw.astype(bf16), p["w_proj"].astype(bf16),
                       preferred_element_type=f32) + p["b_proj"]
        feat = proj + stem
        pooled = jnp.sum(feat.astype(bf16).astype(f32).reshape(B, H * W, -1),
                         axis=1) * inv_hw
        logits = jnp.dot(pooled.astype(bf16), p["w_cls"].astype(bf16),
                         preferred_element_type=f32) + p["b_cls"]
        out = out + jax.nn.softmax(logits, axis=1)
    return out


# ----------------------------------------------------------------------------
# Demo
# ----------------------------------------------------------------------------

if __name__ == "__main__":
    NUM_CLASSES = 10
    NUM_MODELS = 3          # len(model_paths)
    B, C_IN, H, W = 2, 3, 16, 16
    C_STEM, C_EXP = 32, 64

    key = jax.random.PRNGKey(0)
    kx, kp = jax.random.split(key)
    x = jax.random.normal(kx, (B, C_IN, H, W), jnp.float32)   # PyTorch-style NCHW

    model_keys = jax.random.split(kp, NUM_MODELS)
    params_list = [init_model_params(model_keys[m], C_IN, C_STEM, C_EXP, NUM_CLASSES)
                   for m in range(NUM_MODELS)]
    params = stack_and_prepare(params_list)

    fwd = jax.jit(functools.partial(base_ensemble_forward,
                                    num_models=NUM_MODELS, num_classes=NUM_CLASSES))
    out = jax.block_until_ready(fwd(x, params))

    assert out.shape == (B, NUM_CLASSES)
    # Sum of M softmaxes (exact division): each row sums to NUM_MODELS.
    assert jnp.allclose(jnp.sum(out, axis=1), float(NUM_MODELS), atol=1e-3)
    # Match the pure-JAX reference.
    ref = _reference_forward(x, params_list, NUM_CLASSES)
    assert jnp.allclose(out, ref, atol=2e-2), (out, ref)

    print("KERNEL_OK")
</pallas_src>

<mosaic_0001>
module attributes {stable_mosaic.version = 11 : i64} {
  func.func @_fused_kernel(%arg0: i32, %arg1: memref<256x8xbf16, #tpu.memory_space<vmem>>, %arg2: memref<2x256x192xf32, #tpu.memory_space<vmem>>, %arg3: memref<1x256xbf16, #tpu.memory_space<vmem>>, %arg4: memref<8x96xbf16, #tpu.memory_space<vmem>>, %arg5: memref<1x96xf32, #tpu.memory_space<vmem>>, %arg6: memref<96x192xbf16, #tpu.memory_space<vmem>>, %arg7: memref<1x192xf32, #tpu.memory_space<vmem>>, %arg8: memref<9x192xf32, #tpu.memory_space<vmem>>, %arg9: memref<1x192xf32, #tpu.memory_space<vmem>>, %arg10: memref<192x96xbf16, #tpu.memory_space<vmem>>, %arg11: memref<1x96xf32, #tpu.memory_space<vmem>>, %arg12: memref<96x30xbf16, #tpu.memory_space<vmem>>, %arg13: memref<1x30xf32, #tpu.memory_space<vmem>>, %arg14: memref<1x1x10xf32, #tpu.memory_space<vmem>>, %arg15: memref<304x192xf32, #tpu.memory_space<vmem>>) attributes {dimension_semantics = [#tpu.dimension_semantics<parallel>], iteration_bounds = array<i64: 2>, scalar_prefetch = 0 : i64, scratch_operands = 1 : i64, tpu.core_type = #tpu.core_type<tc>, window_params = [{transform_indices = @transform_0, window_bounds = array<i64: 256, 8>}, {pipeline_mode = #tpu.pipeline_mode<synchronous>, transform_indices = @transform_1, window_bounds = array<i64: 2, 256, 192>}, {pipeline_mode = #tpu.pipeline_mode<synchronous>, transform_indices = @transform_2, window_bounds = array<i64: 1, 256>}, {pipeline_mode = #tpu.pipeline_mode<synchronous>, transform_indices = @transform_3, window_bounds = array<i64: 8, 96>}, {pipeline_mode = #tpu.pipeline_mode<synchronous>, transform_indices = @transform_4, window_bounds = array<i64: 1, 96>}, {pipeline_mode = #tpu.pipeline_mode<synchronous>, transform_indices = @transform_5, window_bounds = array<i64: 96, 192>}, {pipeline_mode = #tpu.pipeline_mode<synchronous>, transform_indices = @transform_6, window_bounds = array<i64: 1, 192>}, {pipeline_mode = #tpu.pipeline_mode<synchronous>, transform_indices = @transform_7, window_bounds = array<i64: 9, 192>}, {pipeline_mode = #tpu.pipeline_mode<synchronous>, transform_indices = @transform_8, window_bounds = array<i64: 1, 192>}, {pipeline_mode = #tpu.pipeline_mode<synchronous>, transform_indices = @transform_9, window_bounds = array<i64: 192, 96>}, {pipeline_mode = #tpu.pipeline_mode<synchronous>, transform_indices = @transform_10, window_bounds = array<i64: 1, 96>}, {pipeline_mode = #tpu.pipeline_mode<synchronous>, transform_indices = @transform_11, window_bounds = array<i64: 96, 30>}, {pipeline_mode = #tpu.pipeline_mode<synchronous>, transform_indices = @transform_12, window_bounds = array<i64: 1, 30>}, {transform_indices = @transform_13, window_bounds = array<i64: 1, 1, 10>}]} {
    %cst = arith.constant 0.000000e+00 : f32
    %0 = vector.broadcast %cst : f32 to vector<24x192xf32>
    %c0 = arith.constant 0 : index
    %c0_0 = arith.constant 0 : index
    %1 = vector.load %arg15[%c0, %c0_0] : memref<304x192xf32, #tpu.memory_space<vmem>>, vector<24x192xf32>
    tpu.vector_store %arg15[%c0, %c0_0], %0 {strides = array<i32>} : memref<304x192xf32, #tpu.memory_space<vmem>>, vector<24x192xf32>,
    %cst_1 = arith.constant 0.000000e+00 : f32
    %2 = vector.broadcast %cst_1 : f32 to vector<24x192xf32>
    %c280 = arith.constant 280 : index
    %c0_2 = arith.constant 0 : index
    %3 = vector.load %arg15[%c280, %c0_2] : memref<304x192xf32, #tpu.memory_space<vmem>>, vector<24x192xf32>
    tpu.vector_store %arg15[%c280, %c0_2], %2 {strides = array<i32>} : memref<304x192xf32, #tpu.memory_space<vmem>>, vector<24x192xf32>,
    %c0_3 = arith.constant 0 : index
    %c0_4 = arith.constant 0 : index
    %4 = vector.load %arg1[%c0_3, %c0_4] : memref<256x8xbf16, #tpu.memory_space<vmem>>, vector<256x8xbf16>
    %c0_5 = arith.constant 0 : index
    %c0_6 = arith.constant 0 : index
    %5 = vector.load %arg4[%c0_5, %c0_6] : memref<8x96xbf16, #tpu.memory_space<vmem>>, vector<8x96xbf16>
    %cst_7 = arith.constant dense<0.000000e+00> : vector<256x96xf32>
    %6 = tpu.matmul %4, %5, %cst_7 {dimension_numbers = #tpu.dot_dimension_numbers<[1], [0], [0], [1], [0, 0, 1, 1], [], []>} : vector<256x8xbf16>, vector<8x96xbf16>, vector<256x96xf32> -> vector<256x96xf32>
    %c0_8 = arith.constant 0 : index
    %c0_9 = arith.constant 0 : index
    %7 = vector.load %arg5[%c0_8, %c0_9] : memref<1x96xf32, #tpu.memory_space<vmem>>, vector<1x96xf32>
    %8 = vector.broadcast %7 : vector<1x96xf32> to vector<256x96xf32>
    %9 = arith.addf %6, %8 : vector<256x96xf32>
    %cst_10 = arith.constant 0.000000e+00 : f32
    %cst_11 = arith.constant 6.000000e+00 : f32
    %10 = vector.broadcast %cst_10 : f32 to vector<256x96xf32>
    %11 = arith.maximumf %10, %9 : vector<256x96xf32>
    %12 = vector.broadcast %cst_11 : f32 to vector<256x96xf32>
    %13 = arith.minimumf %12, %11 : vector<256x96xf32>
    %14 = arith.truncf %13 : vector<256x96xf32> to vector<256x96xbf16>
    %c0_12 = arith.constant 0 : index
    %c0_13 = arith.constant 0 : index
    %15 = vector.load %arg6[%c0_12, %c0_13] : memref<96x192xbf16, #tpu.memory_space<vmem>>, vector<96x192xbf16>
    %cst_14 = arith.constant dense<0.000000e+00> : vector<256x192xf32>
    %16 = tpu.matmul %14, %15, %cst_14 {dimension_numbers = #tpu.dot_dimension_numbers<[1], [0], [0], [1], [0, 0, 1, 1], [], []>} : vector<256x96xbf16>, vector<96x192xbf16>, vector<256x192xf32> -> vector<256x192xf32>
    %c0_15 = arith.constant 0 : index
    %c0_16 = arith.constant 0 : index
    %17 = vector.load %arg7[%c0_15, %c0_16] : memref<1x192xf32, #tpu.memory_space<vmem>>, vector<1x192xf32>
    %18 = vector.broadcast %17 : vector<1x192xf32> to vector<256x192xf32>
    %19 = arith.addf %16, %18 : vector<256x192xf32>
    %cst_17 = arith.constant 0.000000e+00 : f32
    %cst_18 = arith.constant 6.000000e+00 : f32
    %20 = vector.broadcast %cst_17 : f32 to vector<256x192xf32>
    %21 = arith.maximumf %20, %19 : vector<256x192xf32>
    %22 = vector.broadcast %cst_18 : f32 to vector<256x192xf32>
    %23 = arith.minimumf %22, %21 : vector<256x192xf32>
    %c24 = arith.constant 24 : index
    %c0_19 = arith.constant 0 : index
    %24 = vector.load %arg15[%c24, %c0_19] : memref<304x192xf32, #tpu.memory_space<vmem>>, vector<256x192xf32>
    tpu.vector_store %arg15[%c24, %c0_19], %23 {strides = array<i32>} : memref<304x192xf32, #tpu.memory_space<vmem>>, vector<256x192xf32>,
    %c0_20 = arith.constant 0 : index
    %c0_21 = arith.constant 0 : index
    %25 = vector.load %arg8[%c0_20, %c0_21] : memref<9x192xf32, #tpu.memory_space<vmem>>, vector<9x192xf32>
    %cst_22 = arith.constant 0.000000e+00 : f32
    %26 = vector.broadcast %cst_22 : f32 to vector<256x192xf32>
    %c7 = arith.constant 7 : index
    %c0_23 = arith.constant 0 : index
    %27 = vector.load %arg15[%c7, %c0_23] : memref<304x192xf32, #tpu.memory_space<vmem>>, vector<256x192xf32>
    %28 = vector.extract_strided_slice %25 {offsets = [0, 0], sizes = [1, 192], strides = [1, 1]} : vector<9x192xf32> to vector<1x192xf32>
    %29 = vector.broadcast %28 : vector<1x192xf32> to vector<256x192xf32>
    %30 = arith.mulf %27, %29 : vector<256x192xf32>
    %c23 = arith.constant 23 : index
    %c0_24 = arith.constant 0 : index
    %31 = vector.load %arg15[%c23, %c0_24] : memref<304x192xf32, #tpu.memory_space<vmem>>, vector<256x192xf32>
    %32 = vector.extract_strided_slice %25 {offsets = [3, 0], sizes = [1, 192], strides = [1, 1]} : vector<9x192xf32> to vector<1x192xf32>
    %33 = vector.broadcast %32 : vector<1x192xf32> to vector<256x192xf32>
    %34 = arith.mulf %31, %33 : vector<256x192xf32>
    %35 = arith.addf %30, %34 : vector<256x192xf32>
    %c39 = arith.constant 39 : index
    %c0_25 = arith.constant 0 : index
    %36 = vector.load %arg15[%c39, %c0_25] : memref<304x192xf32, #tpu.memory_space<vmem>>, vector<256x192xf32>
    %37 = vector.extract_strided_slice %25 {offsets = [6, 0], sizes = [1, 192], strides = [1, 1]} : vector<9x192xf32> to vector<1x192xf32>
    %38 = vector.broadcast %37 : vector<1x192xf32> to vector<256x192xf32>
    %39 = arith.mulf %36, %38 : vector<256x192xf32>
    %40 = arith.addf %35, %39 : vector<256x192xf32>
    %c0_26 = arith.constant 0 : index
    %c0_27 = arith.constant 0 : index
    %c0_28 = arith.constant 0 : index
    %41 = vector.load %arg2[%c0_26, %c0_27, %c0_28] : memref<2x256x192xf32, #tpu.memory_space<vmem>>, vector<1x256x192xf32>
    %42 = vector.shape_cast %41 : vector<1x256x192xf32> to vector<256x192xf32>
    %43 = arith.mulf %40, %42 : vector<256x192xf32>
    %44 = arith.addf %26, %43 : vector<256x192xf32>
    %c8 = arith.constant 8 : index
    %c0_29 = arith.constant 0 : index
    %45 = vector.load %arg15[%c8, %c0_29] : memref<304x192xf32, #tpu.memory_space<vmem>>, vector<256x192xf32>
    %46 = vector.extract_strided_slice %25 {offsets = [1, 0], sizes = [1, 192], strides = [1, 1]} : vector<9x192xf32> to vector<1x192xf32>
    %47 = vector.broadcast %46 : vector<1x192xf32> to vector<256x192xf32>
    %48 = arith.mulf %45, %47 : vector<256x192xf32>
    %c24_30 = arith.constant 24 : index
    %c0_31 = arith.constant 0 : index
    %49 = vector.load %arg15[%c24_30, %c0_31] : memref<304x192xf32, #tpu.memory_space<vmem>>, vector<256x192xf32>
    %50 = vector.extract_strided_slice %25 {offsets = [4, 0], sizes = [1, 192], strides = [1, 1]} : vector<9x192xf32> to vector<1x192xf32>
    %51 = vector.broadcast %50 : vector<1x192xf32> to vector<256x192xf32>
    %52 = arith.mulf %49, %51 : vector<256x192xf32>
    %53 = arith.addf %48, %52 : vector<256x192xf32>
    %c40 = arith.constant 40 : index
    %c0_32 = arith.constant 0 : index
    %54 = vector.load %arg15[%c40, %c0_32] : memref<304x192xf32, #tpu.memory_space<vmem>>, vector<256x192xf32>
    %55 = vector.extract_strided_slice %25 {offsets = [7, 0], sizes = [1, 192], strides = [1, 1]} : vector<9x192xf32> to vector<1x192xf32>
    %56 = vector.broadcast %55 : vector<1x192xf32> to vector<256x192xf32>
    %57 = arith.mulf %54, %56 : vector<256x192xf32>
    %58 = arith.addf %53, %57 : vector<256x192xf32>
    %59 = arith.addf %44, %58 : vector<256x192xf32>
    %c9 = arith.constant 9 : index
    %c0_33 = arith.constant 0 : index
    %60 = vector.load %arg15[%c9, %c0_33] : memref<304x192xf32, #tpu.memory_space<vmem>>, vector<256x192xf32>
    %61 = vector.extract_strided_slice %25 {offsets = [2, 0], sizes = [1, 192], strides = [1, 1]} : vector<9x192xf32> to vector<1x192xf32>
    %62 = vector.broadcast %61 : vector<1x192xf32> to vector<256x192xf32>
    %63 = arith.mulf %60, %62 : vector<256x192xf32>
    %c25 = arith.constant 25 : index
    %c0_34 = arith.constant 0 : index
    %64 = vector.load %arg15[%c25, %c0_34] : memref<304x192xf32, #tpu.memory_space<vmem>>, vector<256x192xf32>
    %65 = vector.extract_strided_slice %25 {offsets = [5, 0], sizes = [1, 192], strides = [1, 1]} : vector<9x192xf32> to vector<1x192xf32>
    %66 = vector.broadcast %65 : vector<1x192xf32> to vector<256x192xf32>
    %67 = arith.mulf %64, %66 : vector<256x192xf32>
    %68 = arith.addf %63, %67 : vector<256x192xf32>
    %c41 = arith.constant 41 : index
    %c0_35 = arith.constant 0 : index
    %69 = vector.load %arg15[%c41, %c0_35] : memref<304x192xf32, #tpu.memory_space<vmem>>, vector<256x192xf32>
    %70 = vector.extract_strided_slice %25 {offsets = [8, 0], sizes = [1, 192], strides = [1, 1]} : vector<9x192xf32> to vector<1x192xf32>
    %71 = vector.broadcast %70 : vector<1x192xf32> to vector<256x192xf32>
    %72 = arith.mulf %69, %71 : vector<256x192xf32>
    %73 = arith.addf %68, %72 : vector<256x192xf32>
    %c1 = arith.constant 1 : index
    %c0_36 = arith.constant 0 : index
    %c0_37 = arith.constant 0 : index
    %74 = vector.load %arg2[%c1, %c0_36, %c0_37] : memref<2x256x192xf32, #tpu.memory_space<vmem>>, vector<1x256x192xf32>
    %75 = vector.shape_cast %74 : vector<1x256x192xf32> to vector<256x192xf32>
    %76 = arith.mulf %73, %75 : vector<256x192xf32>
    %77 = arith.addf %59, %76 : vector<256x192xf32>
    %c0_38 = arith.constant 0 : index
    %c0_39 = arith.constant 0 : index
    %78 = vector.load %arg9[%c0_38, %c0_39] : memref<1x192xf32, #tpu.memory_space<vmem>>, vector<1x192xf32>
    %79 = vector.broadcast %78 : vector<1x192xf32> to vector<256x192xf32>
    %80 = arith.addf %77, %79 : vector<256x192xf32>
    %cst_40 = arith.constant 0.000000e+00 : f32
    %cst_41 = arith.constant 6.000000e+00 : f32
    %81 = vector.broadcast %cst_40 : f32 to vector<256x192xf32>
    %82 = arith.maximumf %81, %80 : vector<256x192xf32>
    %83 = vector.broadcast %cst_41 : f32 to vector<256x192xf32>
    %84 = arith.minimumf %83, %82 : vector<256x192xf32>
    %85 = arith.truncf %84 : vector<256x192xf32> to vector<256x192xbf16>
    %c0_42 = arith.constant 0 : index
    %c0_43 = arith.constant 0 : index
    %86 = vector.load %arg10[%c0_42, %c0_43] : memref<192x96xbf16, #tpu.memory_space<vmem>>, vector<192x96xbf16>
    %cst_44 = arith.constant dense<0.000000e+00> : vector<256x96xf32>
    %87 = tpu.matmul %85, %86, %cst_44 {dimension_numbers = #tpu.dot_dimension_numbers<[1], [0], [0], [1], [0, 0, 1, 1], [], []>} : vector<256x192xbf16>, vector<192x96xbf16>, vector<256x96xf32> -> vector<256x96xf32>
    %c0_45 = arith.constant 0 : index
    %c0_46 = arith.constant 0 : index
    %88 = vector.load %arg11[%c0_45, %c0_46] : memref<1x96xf32, #tpu.memory_space<vmem>>, vector<1x96xf32>
    %89 = vector.broadcast %88 : vector<1x96xf32> to vector<256x96xf32>
    %90 = arith.addf %87, %89 : vector<256x96xf32>
    %91 = arith.addf %90, %13 : vector<256x96xf32>
    %c0_47 = arith.constant 0 : index
    %c0_48 = arith.constant 0 : index
    %92 = vector.load %arg3[%c0_47, %c0_48] : memref<1x256xbf16, #tpu.memory_space<vmem>>, vector<1x256xbf16>
    %93 = arith.truncf %91 : vector<256x96xf32> to vector<256x96xbf16>
    %cst_49 = arith.constant dense<0.000000e+00> : vector<1x96xf32>
    %94 = tpu.matmul %92, %93, %cst_49 {dimension_numbers = #tpu.dot_dimension_numbers<[1], [0], [0], [1], [0, 0, 1, 1], [], []>} : vector<1x256xbf16>, vector<256x96xbf16>, vector<1x96xf32> -> vector<1x96xf32>
    %95 = arith.truncf %94 : vector<1x96xf32> to vector<1x96xbf16>
    %c0_50 = arith.constant 0 : index
    %c0_51 = arith.constant 0 : index
    %96 = vector.load %arg12[%c0_50, %c0_51] : memref<96x30xbf16, #tpu.memory_space<vmem>>, vector<96x30xbf16>
    %cst_52 = arith.constant dense<0.000000e+00> : vector<1x30xf32>
    %97 = tpu.matmul %95, %96, %cst_52 {dimension_numbers = #tpu.dot_dimension_numbers<[1], [0], [0], [1], [0, 0, 1, 1], [], []>} : vector<1x96xbf16>, vector<96x30xbf16>, vector<1x30xf32> -> vector<1x30xf32>
    %c0_53 = arith.constant 0 : index
    %c0_54 = arith.constant 0 : index
    %98 = vector.load %arg13[%c0_53, %c0_54] : memref<1x30xf32, #tpu.memory_space<vmem>>, vector<1x30xf32>
    %99 = arith.addf %97, %98 : vector<1x30xf32>
    %cst_55 = arith.constant 0.000000e+00 : f32
    %100 = vector.broadcast %cst_55 : f32 to vector<1x10xf32>
    %101 = vector.extract_strided_slice %99 {offsets = [0, 0], sizes = [1, 10], strides = [1, 1]} : vector<1x30xf32> to vector<1x10xf32>
    %cst_56 = arith.constant dense<0xFF800000> : vector<1xf32>
    %102 = vector.multi_reduction <maximumf>, %101, %cst_56 [1] : vector<1x10xf32> to vector<1xf32>
    %103 = vector.shape_cast %102 : vector<1xf32> to vector<1x1xf32>
    %104 = vector.broadcast %103 : vector<1x1xf32> to vector<1x10xf32>
    %105 = arith.subf %101, %104 : vector<1x10xf32>
    %106 = math.exp %105 : vector<1x10xf32>
    %cst_57 = arith.constant dense<0.000000e+00> : vector<1xf32>
    %107 = vector.multi_reduction <add>, %106, %cst_57 [1] : vector<1x10xf32> to vector<1xf32>
    %108 = vector.shape_cast %107 : vector<1xf32> to vector<1x1xf32>
    %109 = vector.broadcast %108 : vector<1x1xf32> to vector<1x10xf32>
    %110 = arith.divf %106, %109 : vector<1x10xf32>
    %111 = arith.addf %100, %110 : vector<1x10xf32>
    %112 = vector.extract_strided_slice %99 {offsets = [0, 10], sizes = [1, 10], strides = [1, 1]} : vector<1x30xf32> to vector<1x10xf32>
    %cst_58 = arith.constant dense<0xFF800000> : vector<1xf32>
    %113 = vector.multi_reduction <maximumf>, %112, %cst_58 [1] : vector<1x10xf32> to vector<1xf32>
    %114 = vector.shape_cast %113 : vector<1xf32> to vector<1x1xf32>
    %115 = vector.broadcast %114 : vector<1x1xf32> to vector<1x10xf32>
    %116 = arith.subf %112, %115 : vector<1x10xf32>
    %117 = math.exp %116 : vector<1x10xf32>
    %cst_59 = arith.constant dense<0.000000e+00> : vector<1xf32>
    %118 = vector.multi_reduction <add>, %117, %cst_59 [1] : vector<1x10xf32> to vector<1xf32>
    %119 = vector.shape_cast %118 : vector<1xf32> to vector<1x1xf32>
    %120 = vector.broadcast %119 : vector<1x1xf32> to vector<1x10xf32>
    %121 = arith.divf %117, %120 : vector<1x10xf32>
    %122 = arith.addf %111, %121 : vector<1x10xf32>
    %123 = vector.extract_strided_slice %99 {offsets = [0, 20], sizes = [1, 10], strides = [1, 1]} : vector<1x30xf32> to vector<1x10xf32>
    %cst_60 = arith.constant dense<0xFF800000> : vector<1xf32>
    %124 = vector.multi_reduction <maximumf>, %123, %cst_60 [1] : vector<1x10xf32> to vector<1xf32>
    %125 = vector.shape_cast %124 : vector<1xf32> to vector<1x1xf32>
    %126 = vector.broadcast %125 : vector<1x1xf32> to vector<1x10xf32>
    %127 = arith.subf %123, %126 : vector<1x10xf32>
    %128 = math.exp %127 : vector<1x10xf32>
    %cst_61 = arith.constant dense<0.000000e+00> : vector<1xf32>
    %129 = vector.multi_reduction <add>, %128, %cst_61 [1] : vector<1x10xf32> to vector<1xf32>
    %130 = vector.shape_cast %129 : vector<1xf32> to vector<1x1xf32>
    %131 = vector.broadcast %130 : vector<1x1xf32> to vector<1x10xf32>
    %132 = arith.divf %128, %131 : vector<1x10xf32>
    %133 = arith.addf %122, %132 : vector<1x10xf32>
    %c0_62 = arith.constant 0 : index
    %c0_63 = arith.constant 0 : index
    %c0_64 = arith.constant 0 : index
    %134 = vector.load %arg14[%c0_62, %c0_63, %c0_64] : memref<1x1x10xf32, #tpu.memory_space<vmem>>, vector<1x1x10xf32>
    %135 = vector.shape_cast %134 : vector<1x1x10xf32> to vector<1x10xf32>
    %136 = vector.shape_cast %133 : vector<1x10xf32> to vector<1x1x10xf32>
    tpu.vector_store %arg14[%c0_62, %c0_63, %c0_64], %136 {strides = array<i32>} : memref<1x1x10xf32, #tpu.memory_space<vmem>>, vector<1x1x10xf32>,
    return
  }
  func.func @transform_0(%arg0: i32) -> (i32, i32) {
    %c0_i32 = arith.constant 0 : i32
    %c0_i32_0 = arith.constant 0 : i32
    return %arg0, %c0_i32 : i32, i32
  }
  func.func @transform_1(%arg0: i32) -> (i32, i32, i32) {
    %c0_i32 = arith.constant 0 : i32
    %c0_i32_0 = arith.constant 0 : i32
    %c0_i32_1 = arith.constant 0 : i32
    %c0_i32_2 = arith.constant 0 : i32
    return %c0_i32, %c0_i32_0, %c0_i32_1 : i32, i32, i32
  }
  func.func @transform_2(%arg0: i32) -> (i32, i32) {
    %c0_i32 = arith.constant 0 : i32
    %c0_i32_0 = arith.constant 0 : i32
    %c0_i32_1 = arith.constant 0 : i32
    return %c0_i32, %c0_i32_0 : i32, i32
  }
  func.func @transform_3(%arg0: i32) -> (i32, i32) {
    %c0_i32 = arith.constant 0 : i32
    %c0_i32_0 = arith.constant 0 : i32
    %c0_i32_1 = arith.constant 0 : i32
    return %c0_i32, %c0_i32_0 : i32, i32
  }
  func.func @transform_4(%arg0: i32) -> (i32, i32) {
    %c0_i32 = arith.constant 0 : i32
    %c0_i32_0 = arith.constant 0 : i32
    %c0_i32_1 = arith.constant 0 : i32
    return %c0_i32, %c0_i32_0 : i32, i32
  }
  func.func @transform_5(%arg0: i32) -> (i32, i32) {
    %c0_i32 = arith.constant 0 : i32
    %c0_i32_0 = arith.constant 0 : i32
    %c0_i32_1 = arith.constant 0 : i32
    return %c0_i32, %c0_i32_0 : i32, i32
  }
  func.func @transform_6(%arg0: i32) -> (i32, i32) {
    %c0_i32 = arith.constant 0 : i32
    %c0_i32_0 = arith.constant 0 : i32
    %c0_i32_1 = arith.constant 0 : i32
    return %c0_i32, %c0_i32_0 : i32, i32
  }
  func.func @transform_7(%arg0: i32) -> (i32, i32) {
    %c0_i32 = arith.constant 0 : i32
    %c0_i32_0 = arith.constant 0 : i32
    %c0_i32_1 = arith.constant 0 : i32
    return %c0_i32, %c0_i32_0 : i32, i32
  }
  func.func @transform_8(%arg0: i32) -> (i32, i32) {
    %c0_i32 = arith.constant 0 : i32
    %c0_i32_0 = arith.constant 0 : i32
    %c0_i32_1 = arith.constant 0 : i32
    return %c0_i32, %c0_i32_0 : i32, i32
  }
  func.func @transform_9(%arg0: i32) -> (i32, i32) {
    %c0_i32 = arith.constant 0 : i32
    %c0_i32_0 = arith.constant 0 : i32
    %c0_i32_1 = arith.constant 0 : i32
    return %c0_i32, %c0_i32_0 : i32, i32
  }
  func.func @transform_10(%arg0: i32) -> (i32, i32) {
    %c0_i32 = arith.constant 0 : i32
    %c0_i32_0 = arith.constant 0 : i32
    %c0_i32_1 = arith.constant 0 : i32
    return %c0_i32, %c0_i32_0 : i32, i32
  }
  func.func @transform_11(%arg0: i32) -> (i32, i32) {
    %c0_i32 = arith.constant 0 : i32
    %c0_i32_0 = arith.constant 0 : i32
    %c0_i32_1 = arith.constant 0 : i32
    return %c0_i32, %c0_i32_0 : i32, i32
  }
  func.func @transform_12(%arg0: i32) -> (i32, i32) {
    %c0_i32 = arith.constant 0 : i32
    %c0_i32_0 = arith.constant 0 : i32
    %c0_i32_1 = arith.constant 0 : i32
    return %c0_i32, %c0_i32_0 : i32, i32
  }
  func.func @transform_13(%arg0: i32) -> (i32, i32, i32) {
    %c0_i32 = arith.constant 0 : i32
    %c0_i32_0 = arith.constant 0 : i32
    %c0_i32_1 = arith.constant 0 : i32
    return %arg0, %c0_i32, %c0_i32_0 : i32, i32, i32
  }
}

</mosaic_0001>

<bundles_post_ra>
// kernel: base_ensemble_forward.1
= control target key start
LH: loop header
LB: loop body
LE: loop exit
PB: predicated region body
PF: predicated region fallthrough
CT: control target
= control target key end

     0   :  { %s9762_s0 = inlined_call_operand.vmem [shape: bf16[512,8], index: 0, kind: input, shape index: {}]   ;;  %s9763_s1 = inlined_call_operand.vmem [shape: f32[2,256,192], index: 1, kind: input, shape index: {}]   ;;  %s9764_s2 = inlined_call_operand.vmem [shape: bf16[1,256], index: 2, kind: input, shape index: {}]   ;;  %s9765_s3 = inlined_call_operand.vmem [shape: bf16[8,96], index: 3, kind: input, shape index: {}]   ;;  %s9766_s4 = inlined_call_operand.vmem [shape: f32[1,96], index: 4, kind: input, shape index: {}]   ;;  %s9767_s5 = inlined_call_operand.vmem [shape: bf16[96,192], index: 5, kind: input, shape index: {}]   ;;  %s9768_s6 = inlined_call_operand.vmem [shape: f32[1,192], index: 6, kind: input, shape index: {}]   ;;  %s9769_s7 = inlined_call_operand.vmem [shape: f32[9,192], index: 7, kind: input, shape index: {}]   ;;  %s9770_s8 = inlined_call_operand.vmem [shape: f32[1,192], index: 8, kind: input, shape index: {}]   ;;  %s9771_s9 = inlined_call_operand.vmem [shape: bf16[192,96], index: 9, kind: input, shape index: {}]   ;;  %s9772_s10 = inlined_call_operand.vmem [shape: f32[1,96], index: 10, kind: input, shape index: {}]   ;;  %s9773_s11 = inlined_call_operand.vmem [shape: bf16[96,30], index: 11, kind: input, shape index: {}]   ;;  %s9774_s12 = inlined_call_operand.vmem [shape: f32[1,30], index: 12, kind: input, shape index: {}]   ;;  %s9775_s13 = inlined_call_operand.hbm [shape: f32[2,1,10], index: 13, kind: output, shape index: {}]  }
   0x1   :  { %10011 = sst [smem:[#allocation89_spill]] %s9762_s0 }
   0x2   :  { %10012 = sst [smem:[#allocation90_spill]] %s9763_s1 }
   0x3   :  { %10013 = sst [smem:[#allocation91_spill]] %s9764_s2 }
   0x4   :  { %10014 = sst [smem:[#allocation92_spill]] %s9765_s3 }
   0x5   :  { %18 = vsyncpa [#allocation4], 0 }
   0x6   :  { %20 = vsyncpa [#allocation4 + $0x1], 0  ;;  %s5795_s25 = smov 0   ;;  %s5797_s26 = smov 0  }
   0x7   :  { %s5799_s27 = smov 0   ;;  %s5801_s28 = smov 0  }
   0x8 LB: > { %s5816_s29 = sadd.s32 4294967295, %s5716_s28   ;;  %s5238_s30 = sadd.s32 4294967294, %s5716_s28   ;;  %s5716_s28 = sphi %s5801_s28, %s10406_s28   ;;  %s5712_s27 = sphi %s5799_s27, %s10405_s27   ;;  %s5708_s26 = sphi %s5797_s26, %s10404_s26   ;;  %s5704_s25 = sphi %s5795_s25, %s10403_s25  }
   0x9   : > { %s5820_s14 = sadd.s32 1, %s5716_s28   ;;  %s311_s15 = sadd.s32 1, %s5712_s27 }
   0xa   : > { %s308_s16 = ssub.s32 %s5716_s28, %s5820_s14  ;;  %p321_p0 = scmp.ne.s32.totalorder %s5712_s27, %s5708_s26 }
   0xb   : > { %p309_p1 = scmp.eq.s32.totalorder %s308_s16, 0  ;;  %p322_p2 = scmp.eq.s32.totalorder %s5816_s29, 1 }
   0xc   : > { %p327_p3 = scmp.ne.s32.totalorder %s5708_s26, %s5704_s25  ;;  %p328_p4 = scmp.eq.s32.totalorder %s5238_s30, 1 }
   0xd   : > { %s5831_s17 = scalar_select %p309_p1, %s5712_s27, %s311_s15  }
   0xe   : > { %p5833_p5 = por %p322_p2, %p321_p0  ;;  %p5837_p6 = por %p328_p4, %p327_p3 }
   0xf   : > { %p5241_p7 = scmp.ge.s32.totalorder %s5716_s28, 1  ;;  %p391_p8 = scmp.lt.s32.totalorder %s5716_s28, 3 }
  0x11   : > { %p392_p9 = pnand %p5241_p7, %p391_p8 }
  0x13   : > { %395 = sbr.rel (%p392_p9) target bundleno = 2251 (0x8cb), region = 72 }
  0x18   : > { %s10017_s3 = sld [smem:[#allocation92_spill]]  ;;  %vm623_vm0 = vcmask 1043456   ;;  %s5242_s22 = sshll.u32 %s5816_s29, 5  ;;  %v5574_v2 = vld [vmem:[%s9767_s5 + $0x54] ss:$8 sps:$4 sm:$0xff]   ;;  %vm574_vm1 = vcmask 64512  }
  0x19   : > { %p435_p10 = scmp.lt.s32.totalorder %s5242_s22, 63  ;;  %s10018_s0 = sld [smem:[#allocation89_spill]]  ;;  %v5572_v8 = vld [vmem:[%s9767_s5 + $0x50] ss:$8 sps:$4 sm:$0xff]   ;;  %v5577_v9 = vld [vmem:[%s9767_s5 + $0x44] ss:$8 sps:$4 sm:$0xff]  }
  0x1a   : > { %v5575_v14 = vld [vmem:[%s9767_s5 + $0x40] ss:$8 sps:$4 sm:$0xff]   ;;  %v5580_v16 = vld [vmem:[%s9767_s5 + $0x34] ss:$8 sps:$4 sm:$0xff]   ;;  %v5578_v18 = vld [vmem:[%s9767_s5 + $0x30] ss:$8 sps:$4 sm:$0xff]  }
  0x1b   : > { %s10408_s22 = smov (!%p435_p10, %s5242_s22), 63  ;;  %v5583_v24 = vld [vmem:[%s9767_s5 + $0x24] ss:$8 sps:$4 sm:$0xff]   ;;  %v5581_v25 = vld [vmem:[%s9767_s5 + $0x20] ss:$8 sps:$4 sm:$0xff]   ;;  %v5718_v30 = vmov 0  }
  0x1c   : > { %s5243_s30 = sshll.u32 %s10408_s22, 2  ;;  %v5586_v26 = vld [vmem:[%s9767_s5 + $0x14] ss:$8 sps:$4 sm:$0xff]   ;;  %v5584_v27 = vld [vmem:[%s9767_s5 + $0x10] ss:$8 sps:$4 sm:$0xff]   ;;  %vm952_vm2 = vcmask 785408  }
  0x1d   : > { %v5589_v28 = vld [vmem:[%s9767_s5 + $0x4] ss:$8 sps:$4 sm:$0xff]   ;;  %v5587_v29 = vld [vmem:[%s9767_s5] ss:$8 sps:$4 sm:$0xff]   ;;  %vm442_vm3 = vcmask 523264   ;;  %s10056_s1 = sld [smem:[#allocation90_spill]] }
  0x1e   : > { %v486_v0 = vld [vmem:[%s10017_s3] sm:$0xf]  ;;  %vm1954_vm4 = vcmask 1046528   ;;  %vm3442_vm5 = vcmask 1040384   ;;  %vm3767_vm6 = vcmask 1045504   ;;  %s10365_s2 = sld [smem:[#allocation91_spill]] }
  0x1f   : > { %5509 = vmatprep.subr.msk.bf16.mxu0 %vm623_vm0, %v486_v0  ;;  %v625_v1 = vsel %vm623_vm0, %v486_v0, 0  ;;  %5510 = vmatprep.subr.msk.bf16.mxu1 %vm623_vm0, %v486_v0  ;;  %s5853_s20 = scalar_lea.vmem %s10018_s0, %s5243_s30  ;;  %v5925_v32 = vld [vmem:[%s9766_s4] ss:$0 sm:$0xff]  ;;  %vm4305_vm7 = vsmask.f32 4352  ;;  %vm5721_vm8 = vmmov 0  }
  0x20   : > { %5458 = vmatpush3.bf16.msra.mxu0 %v625_v1  ;;  %5508 = vmatpush3.bf16.msra.mxu1 %v625_v1  ;;  %v5556_v3 = vld [vmem:[%s5853_s20] sm:$0xff]   ;;  %v5557_v4 = vld [vmem:[%s5853_s20 + $0x8] sm:$0xff]   ;;  %v5558_v5 = vld [vmem:[%s5853_s20 + $0x10] sm:$0xff]   ;;  %vm5127_vm9 = vcmask 155728   ;;  %vm5148_vm10 = vcmask 237728   ;;  %vm5114_vm11 = vcmask 73728  }
  0x21   : > { %1005 = vmatprep.subr.bf16.mxu1 %v5574_v2  ;;  %5459 = vmatprep.mubr.msk.bf16.mxu0 %vm574_vm1, %v5556_v3  ;;  %v5559_v6 = vld [vmem:[%s5853_s20 + $0x18] sm:$0xff]   ;;  %v5560_v7 = vld [vmem:[%s5853_s20 + $0x20] sm:$0xff]   ;;  %v5561_v11 = vld [vmem:[%s5853_s20 + $0x28] sm:$0xff]   ;;  %s5722_s23 = smov 118   ;;  %s432_s24 = sand.u32 1, %s5708_s26  }
  0x22   : > { %v5568_v10 = vld [vmem:[%s5853_s20 + $0x60] sm:$0xff]   ;;  %v5569_v12 = vld [vmem:[%s5853_s20 + $0x68] sm:$0xff]   ;;  %v5570_v13 = vld [vmem:[%s5853_s20 + $0x70] sm:$0xff]   ;;  %4746 = vmatprep.subr.bf16.mxu0 %v5718_v30  ;;  %s5408_s30 = sshll.u32 %s5816_s29, 4  ;;  %s433_s0 = scalar_lea.vmem [#allocation3], %s432_s24 }
  0x23   : > { %5460 = vmatmul.mubr.msk.bf16.vlgmr.msra.gmra.mxu0 %vm574_vm1, %v5557_v4  ;;  %5483 = vmatprep.mubr.msk.bf16.mxu1 %vm574_vm1, %v5568_v10  ;;  %v5562_v15 = vld [vmem:[%s5853_s20 + $0x30] sm:$0xff]   ;;  %v5571_v17 = vld [vmem:[%s5853_s20 + $0x78] sm:$0xff]   ;;  %v5564_v20 = vld [vmem:[%s5853_s20 + $0x40] sm:$0xff]   ;;  %s5183_s15 = sshll.u32 %s433_s0, 4  ;;  %s5181_s21 = scalar_lea.hbm %s9775_s13, %s5408_s30  ;;  %s5184_s15 = int_to_ptr.vmem [resolvable:$true] %s5183_s15 }
  0x24   : > { %5463 = vmatprep.mubr.msk.bf16.mxu0 %vm574_vm1, %v5558_v5  ;;  %5484 = vmatmul.mubr.msk.bf16.vlgmr.msra.gmra.mxu1 %vm574_vm1, %v5569_v12  ;;  %v5563_v19 = vld [vmem:[%s5853_s20 + $0x38] sm:$0xff]   ;;  %v5565_v21 = vld [vmem:[%s5853_s20 + $0x48] sm:$0xff]   ;;  %v5566_v22 = vld [vmem:[%s5853_s20 + $0x50] sm:$0xff]   ;;  %s5171_s22 = scalar_lea.sflag [#allocation4], %s432_s24 }
  0x25   : > { %5487 = vmatprep.mubr.msk.bf16.mxu1 %vm574_vm1, %v5570_v13  ;;  %1006 = vmatpush1.bf16.msra.mxu1 %v5572_v8  ;;  %v5567_v23 = vld [vmem:[%s5853_s20 + $0x58] sm:$0xff]   ;;  %s5723_s20 = smov 108  }
  0x26   : > { %1007 = vmatprep.subr.bf16.mxu1 %v5577_v9 }
  0x29   : > { %1008 = vmatpush1.bf16.msra.mxu1 %v5575_v14 }
  0x2a   : > { %1009 = vmatprep.subr.bf16.mxu1 %v5580_v16 }
  0x2b   : > { %5464 = vmatmul.mubr.msk.bf16.gmra.mxu0 %vm574_vm1, %v5559_v6 }
  0x2c   : > { %5467 = vmatprep.mubr.msk.bf16.mxu0 %vm574_vm1, %v5560_v7  ;;  %5488 = vmatmul.mubr.msk.bf16.gmra.mxu1 %vm574_vm1, %v5571_v17 }
  0x2d   : > { %1010 = vmatpush1.bf16.msra.mxu1 %v5578_v18  ;;  %1033 = vmatprep.mubr.bf16.mxu1 %v5718_v30 }
  0x2e   : > { %1011 = vmatprep.subr.bf16.mxu1 %v5583_v24 }
  0x31   : > { %1012 = vmatpush1.bf16.msra.mxu1 %v5581_v25 }
  0x32   : > { %1013 = vmatprep.subr.bf16.mxu1 %v5586_v26 }
  0x33   : > { %5468 = vmatmul.mubr.msk.bf16.gmra.mxu0 %vm574_vm1, %v5561_v11 }
  0x34   : > { %5471 = vmatprep.mubr.msk.bf16.mxu0 %vm574_vm1, %v5562_v15 }
  0x35   : > { %1014 = vmatpush1.bf16.msra.mxu1 %v5584_v27 }
  0x36   : > { %1015 = vmatprep.subr.bf16.mxu1 %v5589_v28 }
  0x39   : > { %1016 = vmatpush1.bf16.msra.mxu1 %v5587_v29 }
  0x3b   : > { %5472 = vmatmul.mubr.msk.bf16.gmra.mxu0 %vm574_vm1, %v5563_v19 }
  0x3c   : > { %5475 = vmatprep.mubr.msk.bf16.mxu0 %vm574_vm1, %v5564_v20 }
  0x43   : > { %5476 = vmatmul.mubr.msk.bf16.gmra.mxu0 %vm574_vm1, %v5565_v21 }
  0x44   : > { %5479 = vmatprep.mubr.msk.bf16.mxu0 %vm574_vm1, %v5566_v22 }
  0x4b   : > { %5480 = vmatmul.mubr.msk.bf16.gmra.mxu0 %vm574_vm1, %v5567_v23 }
  0xe3   : > { %v5461_v31 = vpop.f32.mrf.mxu0 }
  0xe4   : > { %v670_v43 = vadd.f32 %v5461_v31, %v5925_v32 }
  0xe5   : > { %v661_v33 = vpop.f32.mrf.mxu0 }
  0xe6   : > { %v662_v34 = vadd.f32 %v5925_v32, %v661_v33  ;;  %v790_v50 = vmax.f32 %v670_v43, 0.0 }
  0xe7   : > { %v5462_v35 = vpop.f32.mrf.mxu0 }
  0xe8   : > { %v788_v37 = vmax.f32 %v662_v34, 0.0  ;;  %v673_v40 = vadd.f32 %v5462_v35, %v5925_v32  ;;  %v5943_v55 = vmin.f32 %v790_v50, 6.0 }
  0xe9   : > { %v664_v36 = vpop.f32.mrf.mxu0 }
  0xea   : > { %v665_v38 = vadd.f32 %v5925_v32, %v664_v36  ;;  %v5931_v44 = vmin.f32 %v788_v37, 6.0  ;;  %v791_v47 = vmax.f32 %v673_v40, 0.0  ;;  %10022 = vst [vmem:[#allocation9_spill] sm:$0xff] %v5943_v55 }
  0xeb   : > { %v5465_v39 = vpop.f32.mrf.mxu0 }
  0xec   : > { %v789_v41 = vmax.f32 %v665_v38, 0.0  ;;  %10019 = vst [vmem:[#allocation6_spill] sm:$0xff] %v5931_v44  ;;  %v5939_v51 = vmin.f32 %v791_v47, 6.0  ;;  %v686_v60 = vadd.f32 %v5465_v39, %v5925_v32 }
  0xed   : > { %v677_v42 = vpop.f32.mrf.mxu0 }
  0xee   : > { %v5933_v45 = vmin.f32 %v789_v41, 6.0  ;;  %10021 = vst [vmem:[#allocation8_spill] sm:$0xff] %v5939_v51  ;;  %v678_v52 = vadd.f32 %v5925_v32, %v677_v42  ;;  %v853_v56 = vpack.c.bf16 %v5939_v51, %v5943_v55  ;;  %v794_v1 = vmax.f32 %v686_v60, 0.0  ;;  %v5310_v51 = vld [vmem:[%s10056_s1 + $0x218] sm:$0xff] }
  0xef   : > { %v5466_v46 = vpop.f32.mrf.mxu0 }
  0xf0   : > { %10020 = vst [vmem:[#allocation7_spill] sm:$0xff] %v5933_v45  ;;  %v852_v48 = vpack.c.bf16 %v5933_v45, %v5931_v44  ;;  %v792_v57 = vmax.f32 %v678_v52, 0.0  ;;  %v689_v62 = vadd.f32 %v5466_v46, %v5925_v32  ;;  %v5959_v5 = vmin.f32 %v794_v1, 6.0 }
  0xf1   : > { %v680_v49 = vpop.f32.mrf.mxu0 }
  0xf2   : > { %5289 = vmatmul.mubr.msk.bf16.vlgmr.msra.gmra.mxu1 %vm952_vm2, %v852_v48  ;;  %v681_v53 = vadd.f32 %v5925_v32, %v680_v49  ;;  %v5950_v61 = vmin.f32 %v792_v57, 6.0  ;;  %v795_v2 = vmax.f32 %v689_v62, 0.0  ;;  %10025 = vst [vmem:[#allocation12_spill] sm:$0xff] %v5959_v5 }
  0xf3   : > { %1043 = vmatprep.mubr.bf16.mxu1 %v5718_v30  ;;  %v5469_v54 = vpop.f32.mrf.mxu0 }
  0xf4   : > { %v793_v58 = vmax.f32 %v681_v53, 0.0  ;;  %10023 = vst [vmem:[#allocation10_spill] sm:$0xff] %v5950_v61  ;;  %v5961_v6 = vmin.f32 %v795_v2, 6.0  ;;  %v702_v14 = vadd.f32 %v5469_v54, %v5925_v32 }
  0xf5   : > { %v693_v59 = vpop.f32.mrf.mxu0 }
  0xf6   : > { %v5953_v63 = vmin.f32 %v793_v58, 6.0  ;;  %10026 = vst [vmem:[#allocation13_spill] sm:$0xff] %v5961_v6  ;;  %v694_v7 = vadd.f32 %v5925_v32, %v693_v59  ;;  %v855_v10 = vpack.c.bf16 %v5961_v6, %v5959_v5  ;;  %v798_v19 = vmax.f32 %v702_v14, 0.0 }
  0xf7   : > { %v5470_v0 = vpop.f32.mrf.mxu0  ;;  %v5719_v14 = vmov 0.0  }
  0xf8   : > { %10024 = vst [vmem:[#allocation11_spill] sm:$0xff] %v5953_v63  ;;  %v854_v3 = vpack.c.bf16 %v5953_v63, %v5950_v61  ;;  %v796_v11 = vmax.f32 %v694_v7, 0.0  ;;  %v705_v16 = vadd.f32 %v5470_v0, %v5925_v32  ;;  %v5979_v23 = vmin.f32 %v798_v19, 6.0  ;;  %441 = vst [vmem:[#allocation2] sm:$0xff] %v5719_v14 }
  0xf9   : > { %v696_v4 = vpop.f32.mrf.mxu0  ;;  %444 = vst [vmem:[#allocation2 + $0x10] sm:$0xff] %v5719_v14  ;;  %446 = vst [vmem:[#allocation2 + $0x20] sm:$0xff] %v5719_v14 }
  0xfa   : > { %5290 = vmatmul.mubr.msk.bf16.gmra.mxu1 %vm952_vm2, %v853_v56  ;;  %v697_v8 = vadd.f32 %v5925_v32, %v696_v4  ;;  %v5970_v15 = vmin.f32 %v796_v11, 6.0  ;;  %v799_v20 = vmax.f32 %v705_v16, 0.0  ;;  %10029 = vst [vmem:[#allocation16_spill] sm:$0xff] %v5979_v23  ;;  %448 = vst [vmem:[#allocation2 + $0x230] sm:$0xff] %v5719_v14 }
  0xfb   : > { %1053 = vmatprep.mubr.bf16.mxu1 %v5718_v30  ;;  %v5473_v9 = vpop.f32.mrf.mxu0  ;;  %450 = vst [vmem:[#allocation2 + $0x240] sm:$0xff] %v5719_v14  ;;  %452 = vst [vmem:[#allocation2 + $0x250] sm:$0xff] %v5719_v14 }
  0xfc   : > { %v797_v12 = vmax.f32 %v697_v8, 0.0  ;;  %10027 = vst [vmem:[#allocation14_spill] sm:$0xff] %v5970_v15  ;;  %v5981_v24 = vmin.f32 %v799_v20, 6.0  ;;  %v718_v34 = vadd.f32 %v5473_v9, %v5925_v32  ;;  %v5485_v9 = vpop.f32.mrf.mxu1  ;;  %443 = vst.msk [vmem:[#allocation2 + $0x8] sm:$0xff] %vm442_vm3, %v5719_v14 }
  0xfd   : > { %v709_v13 = vpop.f32.mrf.mxu0  ;;  %445 = vst.msk [vmem:[#allocation2 + $0x18] sm:$0xff] %vm442_vm3, %v5719_v14  ;;  %447 = vst.msk [vmem:[#allocation2 + $0x28] sm:$0xff] %vm442_vm3, %v5719_v14 }
  0xfe   : > { %v5973_v17 = vmin.f32 %v797_v12, 6.0  ;;  %10030 = vst [vmem:[#allocation17_spill] sm:$0xff] %v5981_v24  ;;  %v710_v25 = vadd.f32 %v5925_v32, %v709_v13  ;;  %v857_v28 = vpack.c.bf16 %v5981_v24, %v5979_v23  ;;  %v802_v39 = vmax.f32 %v718_v34, 0.0  ;;  %v757_v13 = vpop.f32.mrf.mxu1  ;;  %449 = vst.msk [vmem:[#allocation2 + $0x238] sm:$0xff] %vm442_vm3, %v5719_v14 }
  0xff   : > { %v5474_v18 = vpop.f32.mrf.mxu0  ;;  %451 = vst.msk [vmem:[#allocation2 + $0x248] sm:$0xff] %vm442_vm3, %v5719_v14  ;;  %453 = vst.msk [vmem:[#allocation2 + $0x258] sm:$0xff] %vm442_vm3, %v5719_v14  ;;  %v3447_v24 = vrot.slane %v5310_v51, 7  ;;  %v1830_v51 = vld [vmem:[%s10056_s1 + $0x20] sm:$0xff] }
 0x100   : > { %10028 = vst [vmem:[#allocation15_spill] sm:$0xff] %v5973_v17  ;;  %v856_v21 = vpack.c.bf16 %v5973_v17, %v5970_v15  ;;  %v800_v29 = vmax.f32 %v710_v25, 0.0  ;;  %v721_v36 = vadd.f32 %v5474_v18, %v5925_v32  ;;  %v5999_v43 = vmin.f32 %v802_v39, 6.0  ;;  %v1530_v44 = vld [vmem:[#allocation2 + $0x20] sm:$0x80] }
 0x101   : > { %v712_v22 = vpop.f32.mrf.mxu0  ;;  %v6258_v15 = vld [vmem:[%s10056_s1] sm:$0xff] }
 0x102   : > { %5291 = vmatmul.mubr.msk.bf16.gmra.mxu1 %vm952_vm2, %v854_v3  ;;  %v713_v26 = vadd.f32 %v5925_v32, %v712_v22  ;;  %v5990_v35 = vmin.f32 %v800_v29, 6.0  ;;  %v803_v40 = vmax.f32 %v721_v36, 0.0  ;;  %10033 = vst [vmem:[#allocation20_spill] sm:$0xff] %v5999_v43  ;;  %10061 = vst [vmem:[#allocation47_spill] sm:$0xff] %v6258_v15 }
 0x103   : > { %1063 = vmatprep.mubr.bf16.mxu1 %v5718_v30  ;;  %v5477_v27 = vpop.f32.mrf.mxu0 }
 0x104   : > { %v801_v31 = vmax.f32 %v713_v26, 0.0  ;;  %10031 = vst [vmem:[#allocation18_spill] sm:$0xff] %v5990_v35  ;;  %v6001_v46 = vmin.f32 %v803_v40, 6.0  ;;  %v734_v56 = vadd.f32 %v5477_v27, %v5925_v32 }
 0x105   : > { %v725_v33 = vpop.f32.mrf.mxu0 }
 0x106   : > { %v5993_v37 = vmin.f32 %v801_v31, 6.0  ;;  %10034 = vst [vmem:[#allocation21_spill] sm:$0xff] %v6001_v46  ;;  %v726_v47 = vadd.f32 %v5925_v32, %v725_v33  ;;  %v859_v50 = vpack.c.bf16 %v6001_v46, %v5999_v43  ;;  %v806_v62 = vmax.f32 %v734_v56, 0.0 }
 0x107   : > { %v5478_v38 = vpop.f32.mrf.mxu0  ;;  %v758_v33 = vadd.f32 %v5925_v32, %v757_v13  ;;  %v5596_v13 = vld [vmem:[%s9771_s9 + $0x8] sm:$0xff]  }
 0x108   : > { %10032 = vst [vmem:[#allocation19_spill] sm:$0xff] %v5993_v37  ;;  %v858_v41 = vpack.c.bf16 %v5993_v37, %v5990_v35  ;;  %v804_v52 = vmax.f32 %v726_v47, 0.0  ;;  %v737_v58 = vadd.f32 %v5478_v38, %v5925_v32  ;;  %v6019_v3 = vmin.f32 %v806_v62, 6.0  ;;  %v5591_v38 = vld [vmem:[%s9771_s9 + $0x30] sm:$0xff]   ;;  %v5592_v47 = vld [vmem:[%s9771_s9 + $0x28] sm:$0xff]  }
 0x109   : > { %v728_v42 = vpop.f32.mrf.mxu0  ;;  %v812_v40 = vmax.f32 %v758_v33, 0.0 }
 0x10a   : > { %5292 = vmatmul.mubr.msk.bf16.gmra.mxu1 %vm952_vm2, %v855_v10  ;;  %v729_v48 = vadd.f32 %v5925_v32, %v728_v42  ;;  %v6010_v57 = vmin.f32 %v804_v52, 6.0  ;;  %v807_v0 = vmax.f32 %v737_v58, 0.0  ;;  %10037 = vst [vmem:[#allocation24_spill] sm:$0xff] %v6019_v3 }
 0x10b   : > { %1073 = vmatprep.mubr.bf16.mxu1 %v5718_v30  ;;  %v5481_v49 = vpop.f32.mrf.mxu0 }
 0x10c   : > { %v805_v53 = vmax.f32 %v729_v48, 0.0  ;;  %10035 = vst [vmem:[#allocation22_spill] sm:$0xff] %v6010_v57  ;;  %v6021_v4 = vmin.f32 %v807_v0, 6.0  ;;  %v750_v16 = vadd.f32 %v5481_v49, %v5925_v32  ;;  %v766_v48 = vadd.f32 %v5485_v9, %v5925_v32  ;;  %v5594_v0 = vld [vmem:[%s9771_s9 + $0x18] sm:$0xff]   ;;  %v5595_v9 = vld [vmem:[%s9771_s9 + $0x10] sm:$0xff]  }
 0x10d   : > { %v741_v54 = vpop.f32.mrf.mxu0  ;;  %v6067_v49 = vmin.f32 %v812_v40, 6.0  ;;  %v882_v40 = vlaneseq }
 0x10e   : > { %v6013_v59 = vmin.f32 %v805_v53, 6.0  ;;  %10038 = vst [vmem:[#allocation25_spill] sm:$0xff] %v6021_v4  ;;  %v742_v7 = vadd.f32 %v5925_v32, %v741_v54  ;;  %v861_v10 = vpack.c.bf16 %v6021_v4, %v6019_v3  ;;  %v810_v22 = vmax.f32 %v750_v16, 0.0  ;;  %v5593_v54 = vld [vmem:[%s9771_s9 + $0x20] sm:$0xff]   ;;  %v6377_v4 = vld [vmem:[%s10056_s1 + $0x258] sm:$0xff] }
 0x10f   : > { %v5482_v60 = vpop.f32.mrf.mxu0  ;;  %10043 = vst [vmem:[#allocation30_spill] sm:$0xff] %v6067_v49  ;;  %v814_v56 = vmax.f32 %v766_v48, 0.0  ;;  %v880_v48 = vld [vmem:[%s9768_s6] sm:$0x3] }
 0x110   : > { %10036 = vst [vmem:[#allocation23_spill] sm:$0xff] %v6013_v59  ;;  %v860_v1 = vpack.c.bf16 %v6013_v59, %v6010_v57  ;;  %v808_v11 = vmax.f32 %v742_v7, 0.0  ;;  %v753_v19 = vadd.f32 %v5482_v60, %v5925_v32  ;;  %v6048_v29 = vmin.f32 %v810_v22, 6.0  ;;  %v5597_v22 = vld [vmem:[%s9771_s9] sm:$0xff]  }
 0x111   : > { %v744_v2 = vpop.f32.mrf.mxu0 }
 0x112   : > { %5293 = vmatmul.mubr.msk.bf16.gmra.mxu1 %vm952_vm2, %v856_v21  ;;  %v745_v8 = vadd.f32 %v5925_v32, %v744_v2  ;;  %v6036_v18 = vmin.f32 %v808_v11, 6.0  ;;  %v5486_v21 = vpop.f32.mrf.mxu1  ;;  %v811_v25 = vmax.f32 %v753_v19, 0.0  ;;  %10041 = vst [vmem:[#allocation28_spill] sm:$0xff] %v6048_v29 }
 0x113   : > { %1083 = vmatprep.mubr.bf16.mxu1 %v5718_v30 }
 0x114   : > { %v809_v12 = vmax.f32 %v745_v8, 0.0  ;;  %10039 = vst [vmem:[#allocation26_spill] sm:$0xff] %v6036_v18  ;;  %v760_v27 = vpop.f32.mrf.mxu1  ;;  %v6050_v31 = vmin.f32 %v811_v25, 6.0 }
 0x115   : > { %v761_v34 = vadd.f32 %v5925_v32, %v760_v27 }
 0x116   : > { %v6039_v20 = vmin.f32 %v809_v12, 6.0  ;;  %10042 = vst [vmem:[#allocation29_spill] sm:$0xff] %v6050_v31  ;;  %v5489_v36 = vpop.f32.mrf.mxu1  ;;  %v863_v39 = vpack.c.bf16 %v6050_v31, %v6048_v29  ;;  %v1835_v29 = vld [vmem:[%s10056_s1 + $0x48] sm:$0xff] }
 0x117   : > { %v782_v14 = vadd.f32 %v5489_v36, %v5925_v32  ;;  %v1971_v43 = vrot.slane %v1835_v29, 1 }
 0x118   : > { %10040 = vst [vmem:[#allocation27_spill] sm:$0xff] %v6039_v20  ;;  %v862_v26 = vpack.c.bf16 %v6039_v20, %v6036_v18  ;;  %v773_v42 = vpop.f32.mrf.mxu1 }
 0x119   : > { %v774_v7 = vadd.f32 %v5925_v32, %v773_v42  ;;  %v818_v25 = vmax.f32 %v782_v14, 0.0  ;;  %v1387_v42 = vld [vmem:[%s9769_s7 + $0x8] sm:$0xff] }
 0x11a   : > { %5294 = vmatmul.mubr.msk.bf16.gmra.mxu1 %vm952_vm2, %v857_v28  ;;  %v5590_v28 = vld [vmem:[%s9771_s9 + $0x38] sm:$0xff]   ;;  %v5490_v53 = vpop.f32.mrf.mxu1 }
 0x11b   : > { %1093 = vmatprep.mubr.bf16.mxu1 %v5718_v30  ;;  %4747 = vmatpush1.bf16.msra.mxu0 %v5590_v28  ;;  %v816_v11 = vmax.f32 %v774_v7, 0.0  ;;  %v785_v19 = vadd.f32 %v5490_v53, %v5925_v32  ;;  %v6120_v28 = vmin.f32 %v818_v25, 6.0  ;;  %v1391_v53 = vld [vmem:[#allocation2 + $0x8] sm:$0x80]  ;;  %v2948_v25 = vld [vmem:[#allocation2 + $0x18] sm:$0xfe] }
 0x11c   : > { %4748 = vmatprep.subr.bf16.mxu0 %v5718_v30  ;;  %v776_v62 = vpop.f32.mrf.mxu1 }
 0x11d   : > { %v777_v8 = vadd.f32 %v5925_v32, %v776_v62  ;;  %v6103_v16 = vmin.f32 %v816_v11, 6.0  ;;  %10049 = vst [vmem:[#allocation36_spill] sm:$0xff] %v6120_v28  ;;  %v1393_v62 = vld [vmem:[#allocation2 + $0x18] sm:$0xff] }
 0x11f   : > { %4749 = vmatpush1.bf16.msra.mxu0 %v5591_v38  ;;  %v817_v12 = vmax.f32 %v777_v8, 0.0  ;;  %10047 = vst [vmem:[#allocation34_spill] sm:$0xff] %v6103_v16  ;;  %v5600_v38 = vld [vmem:[%s9771_s9 + $0x48] sm:$0xff]  }
 0x120   : > { %4750 = vmatprep.subr.bf16.mxu0 %v5718_v30 }
 0x122   : > { %5295 = vmatmul.mubr.msk.bf16.gmra.mxu1 %vm952_vm2, %v858_v41  ;;  %v813_v41 = vmax.f32 %v761_v34, 0.0  ;;  %v5599_v34 = vld [vmem:[%s9771_s9 + $0x50] sm:$0xff]  }
 0x123   : > { %1103 = vmatprep.mubr.bf16.mxu1 %v5718_v30  ;;  %4751 = vmatpush1.bf16.msra.mxu0 %v5592_v47 }
 0x124   : > { %v6070_v52 = vmin.f32 %v813_v41, 6.0  ;;  %4752 = vmatprep.subr.bf16.mxu0 %v5718_v30  ;;  %v6139_v41 = vshrl.u32 %v882_v40, 7 }
 0x126   : > { %10044 = vst [vmem:[#allocation31_spill] sm:$0xff] %v6070_v52  ;;  %v864_v60 = vpack.c.bf16 %v6070_v52, %v6067_v49  ;;  %10051 = vst [vmem:[#allocation38_spill] sm:$0xff] %v6139_v41  ;;  %v6145_v47 = vsub.s32 0, %v6139_v41  ;;  %v9782_v11 = vsub.s32 5, %v6139_v41  ;;  %v2947_v52 = vld [vmem:[#allocation2 + $0x10] sm:$0xfe] }
 0x127   : > { %4753 = vmatpush1.bf16.msra.mxu0 %v5593_v54  ;;  %v10073_v49 = vsub.s32 2, %v6139_v41  ;;  %v10079_v20 = vsub.s32 5, %v6139_v41 }
 0x128   : > { %4754 = vmatprep.subr.bf16.mxu0 %v5718_v30  ;;  %v6155_v54 = vrot.slane %v1387_v42, %v6145_v47  ;;  %v6169_v8 = vrot.slane %v880_v48, %v6145_v47 }
 0x12a   : > { %5296 = vmatmul.mubr.msk.bf16.gmra.mxu1 %vm952_vm2, %v859_v50  ;;  %v769_v50 = vadd.f32 %v5486_v21, %v5925_v32  ;;  %v6106_v21 = vmin.f32 %v817_v12, 6.0  ;;  %v5598_v32 = vld [vmem:[%s9771_s9 + $0x58] sm:$0xff]   ;;  %10052 = vst [vmem:[#allocation39_spill] sm:$0xff] %v6155_v54  ;;  %v1395_v12 = vld [vmem:[#allocation2 + $0x28] sm:$0xff] }
 0x12b   : > { %1113 = vmatprep.mubr.bf16.mxu1 %v5718_v30  ;;  %4755 = vmatpush1.bf16.msra.mxu0 %v5594_v0  ;;  %v6219_v45 = vmul.f32 %v6155_v54, %v1395_v12 }
 0x12c   : > { %v815_v58 = vmax.f32 %v769_v50, 0.0  ;;  %4756 = vmatprep.subr.bf16.mxu0 %v5718_v30  ;;  %10048 = vst [vmem:[#allocation35_spill] sm:$0xff] %v6106_v21  ;;  %v866_v27 = vpack.c.bf16 %v6106_v21, %v6103_v16  ;;  %v1540_v50 = vsub.s32 3, %v6139_v41 }
 0x12e   : > { %v6086_v2 = vmin.f32 %v815_v58, 6.0  ;;  %v9776_v58 = vsub.s32 2, %v6139_v41  ;;  %v6163_v0 = vrot.slane %v1387_v42, %v1540_v50 }
 0x12f   : > { %4757 = vmatpush1.bf16.msra.mxu0 %v5595_v9  ;;  %v2353_v9 = vsub.s32 4, %v6139_v41 }
 0x130   : > { %10046 = vst [vmem:[#allocation33_spill] sm:$0xff] %v6086_v2  ;;  %4758 = vmatprep.subr.bf16.mxu0 %v5718_v30  ;;  %10053 = vst [vmem:[#allocation40_spill] sm:$0xff] %v6163_v0 }
 0x132   : > { %5297 = vmatmul.mubr.msk.bf16.gmra.mxu1 %vm952_vm2, %v860_v1  ;;  %v6084_v1 = vmin.f32 %v814_v56, 6.0  ;;  %v1531_v56 = vld [vmem:[#allocation2 + $0x28] sm:$0x80] }
 0x133   : > { %1123 = vmatprep.mubr.bf16.mxu1 %v5718_v30  ;;  %4759 = vmatpush1.bf16.msra.mxu0 %v5596_v13  ;;  %v1465_v13 = vmul.f32 %v6155_v54, %v1391_v53  ;;  %v1547_v14 = vmul.f32 %v6163_v0, %v1531_v56  ;;  %v6216_v56 = vrot.slane %v1387_v42, %v9782_v11 }
 0x134   : > { %10045 = vst [vmem:[#allocation32_spill] sm:$0xff] %v6084_v1  ;;  %4760 = vmatprep.subr.bf16.mxu0 %v5718_v30 }
 0x135   : > { %10059 = vst [vmem:[#allocation45_spill] sm:$0xff] %v6216_v56  ;;  %v6230_v61 = vadd.f32 %v1547_v14, %v1465_v13  ;;  %v6251_v14 = vld [vmem:[%s10056_s1 + $0x208] sm:$0xff]  ;;  %v10062_v13 = vsub.s32 7, %v6139_v41 }
 0x137   : > { %4761 = vmatpush1.bf16.msra.mxu0 %v5597_v22  ;;  %v1829_v22 = vld [vmem:[%s10056_s1 + $0x18] sm:$0xff]  ;;  %v6265_v17 = vrot.slane %v1387_v42, %v10062_v13 }
 0x138   : > { %4770 = vmatprep.subr.bf16.mxu0 %v5718_v30 }
 0x13a   : > { %5298 = vmatmul.mubr.msk.bf16.gmra.mxu1 %vm952_vm2, %v861_v10  ;;  %v865_v10 = vpack.c.bf16 %v6086_v2, %v6084_v1 }
 0x13b   : > { %1133 = vmatprep.mubr.bf16.mxu1 %v5718_v30  ;;  %4771 = vmatpush2.bf16.msra.mxu0 %v5598_v32  ;;  %v6191_v32 = vmul.f32 %v6155_v54, %v1393_v62 }
 0x13c   : > { %4772 = vmatprep.subr.bf16.mxu0 %v5718_v30 }
 0x13f   : > { %4773 = vmatpush2.bf16.msra.mxu0 %v5599_v34  ;;  %v6196_v34 = vld [vmem:[%s10056_s1 + $0x8] sm:$0xff] }
 0x140   : > { %4774 = vmatprep.subr.bf16.mxu0 %v5718_v30 }
 0x142   : > { %5299 = vmatmul.mubr.msk.bf16.gmra.mxu1 %vm952_vm2, %v862_v26  ;;  %v819_v26 = vmax.f32 %v785_v19, 0.0  ;;  %v1688_v19 = vsub.s32 6, %v6139_v41 }
 0x143   : > { %1143 = vmatprep.mubr.bf16.mxu1 %v5718_v30  ;;  %4775 = vmatpush2.bf16.msra.mxu0 %v5600_v38  ;;  %v6201_v38 = vrot.slane %v1387_v42, %v2353_v9 }
 0x144   : > { %v6122_v33 = vmin.f32 %v819_v26, 6.0  ;;  %4776 = vmatprep.subr.bf16.mxu0 %v5718_v30  ;;  %v6204_v40 = vrot.slane %v1387_v42, %v1688_v19 }
 0x146   : > { %10050 = vst [vmem:[#allocation37_spill] sm:$0xff] %v6122_v33  ;;  %v867_v36 = vpack.c.bf16 %v6122_v33, %v6120_v28  ;;  %v1832_v33 = vld [vmem:[%s10056_s1 + $0x30] sm:$0xff] }
 0x14a   : > { %5300 = vmatmul.mubr.msk.bf16.gmra.mxu1 %vm952_vm2, %v863_v39  ;;  %v5601_v39 = vld [vmem:[%s9771_s9 + $0x40] sm:$0xff]  }
 0x14b   : > { %1153 = vmatprep.mubr.bf16.mxu1 %v5718_v30  ;;  %4777 = vmatpush2.bf16.msra.mxu0 %v5601_v39  ;;  %v1959_v39 = vrot.slane %v1829_v22, 1  ;;  %v5312_v22 = vld [vmem:[%s10056_s1 + $0x228] sm:$0xff] }
 0x14c   : > { %v3451_v35 = vrot.slane %v5312_v22, 7  ;;  %v6310_v22 = vld [vmem:[%s10056_s1 + $0x200] sm:$0xff] }
 0x14d   : > { %10068 = vst [vmem:[#allocation51_spill] sm:$0xff] %v6310_v22 }
 0x14e   : > { %v6333_v28 = vsel %vm3442_vm5, %v3447_v24, %v3451_v35 }
 0x152   : > { %5301 = vmatmul.mubr.msk.bf16.gmra.mxu1 %vm952_vm2, %v864_v60  ;;  %v6161_v60 = vld [vmem:[%s9769_s7] sm:$0xff] }
 0x153   : > { %1163 = vmatprep.mubr.bf16.mxu1 %v5718_v30  ;;  %v6185_v26 = vrot.slane %v6161_v60, %v6145_v47  ;;  %v6346_v31 = vrot.slane %v6161_v60, %v10073_v49  ;;  %v1965_v49 = vrot.slane %v1832_v33, 1  ;;  %v6372_v3 = vrot.slane %v6161_v60, %v10079_v20  ;;  %v6385_v33 = vld [vmem:[%s10056_s1 + $0x50] sm:$0xff] }
 0x154   : > { %10081 = vst [vmem:[#allocation59_spill] sm:$0xff] %v6385_v33 }
 0x155   : > { %10057 = vst [vmem:[#allocation43_spill] sm:$0xff] %v6185_v26  ;;  %v6244_v5 = vmul.f32 0.0, %v6185_v26  ;;  %10074 = vst [vmem:[#allocation55_spill] sm:$0xff] %v6346_v31  ;;  %v6395_v46 = vmul.f32 0.0, %v6346_v31  ;;  %v6410_v29 = vmul.f32 %v6346_v31, %v2947_v52 }
 0x156   : > { %10080 = vst [vmem:[#allocation58_spill] sm:$0xff] %v6372_v3 }
 0x157   : > { %10084 = vst [vmem:[#allocation62_spill] sm:$0xff] %v6410_v29 }
 0x15a   : > { %5302 = vmatmul.mubr.msk.bf16.gmra.mxu1 %vm952_vm2, %v865_v10  ;;  %v6174_v10 = vrot.slane %v1387_v42, %v9776_v58  ;;  %v1390_v58 = vld [vmem:[#allocation2] sm:$0x80] }
 0x15b   : > { %1173 = vmatprep.mubr.bf16.mxu1 %v5718_v30 }
 0x15c   : > { %10055 = vst [vmem:[#allocation42_spill] sm:$0xff] %v6174_v10  ;;  %v6222_v55 = vmul.f32 %v6174_v10, %v2948_v25  ;;  %v6241_v25 = vld [vmem:[%s10056_s1 + $0x238] sm:$0xff]  ;;  %v6268_v23 = vmul.f32 %v6174_v10, %v1395_v12 }
 0x162   : > { %5303 = vmatmul.mubr.msk.bf16.gmra.mxu1 %vm952_vm2, %v866_v27 }
 0x163   : > { %1183 = vmatprep.mubr.bf16.mxu1 %v5718_v30  ;;  %v6151_v30 = vsub.s32 1, %v6139_v41 }
 0x165   : > { %v6166_v7 = vrot.slane %v1387_v42, %v6151_v30  ;;  %v6188_v27 = vrot.slane %v880_v48, %v6151_v30  ;;  %v6209_v48 = vld [vmem:[%s10056_s1 + $0x38] sm:$0xff]  ;;  %v4030_v42 = vld [vmem:[%s9770_s8] sm:$0x3] }
 0x166   : > { %v10065_v2 = vrot.slane %v6209_v48, 1  ;;  %v6341_v21 = vrot.slane %v4030_v42, %v6151_v30  ;;  %v10089_v52 = vrot.slane %v6209_v48, 1  ;;  %v10096_v48 = vrot.slane %v6385_v33, 1 }
 0x167   : > { %10054 = vst [vmem:[#allocation41_spill] sm:$0xff] %v6166_v7  ;;  %10058 = vst [vmem:[#allocation44_spill] sm:$0xff] %v6188_v27  ;;  %v6212_v53 = vmul.f32 %v6166_v7, %v1393_v62  ;;  %v6228_v62 = vrot.slane %v6161_v60, %v1540_v50  ;;  %v6233_v63 = vmul.f32 %v6166_v7, %v1395_v12  ;;  %v1828_v50 = vld [vmem:[%s10056_s1 + $0x10] sm:$0xff] }
 0x168   : > { %v6284_v12 = vrot.slane %v6161_v60, %v1688_v19  ;;  %v1957_v37 = vrot.slane %v1828_v50, 1  ;;  %10072 = vst [vmem:[#allocation54_spill] sm:$0xff] %v6341_v21  ;;  %v10085_v21 = vrot.slane %v6310_v22, 7 }
 0x169   : > { %10060 = vst [vmem:[#allocation46_spill] sm:$0xff] %v6228_v62  ;;  %v1546_v6 = vmul.f32 %v6228_v62, %v1530_v44  ;;  %v6272_v44 = vrot.slane %v6161_v60, %v6151_v30  ;;  %v10075_v30 = vrot.slane %v6258_v15, 1 }
 0x16a   : > { %5304 = vmatmul.mubr.msk.bf16.gmra.mxu1 %vm952_vm2, %v867_v36  ;;  %v1831_v36 = vld [vmem:[%s10056_s1 + $0x28] sm:$0xff] }
 0x16b   : > { %v1963_v11 = vrot.slane %v1831_v36, 1  ;;  %v1464_v36 = vmul.f32 %v6185_v26, %v1390_v58  ;;  %10063 = vst [vmem:[#allocation48_spill] sm:$0xff] %v6272_v44  ;;  %v10064_v58 = vrot.slane %v6196_v34, 1  ;;  %v6321_v50 = vmul.f32 0.0, %v6272_v44 }
 0x16d   : > { %v6277_v1 = vsel %vm1954_vm4, %v10064_v58, %v1959_v39  ;;  %v6290_v13 = vsel %vm1954_vm4, %v1959_v39, %v1963_v11  ;;  %v9796_v58 = vrot.slane %v6251_v14, 7  ;;  %v6297_v16 = vsel %vm1954_vm4, %v1963_v11, %v10065_v2 }
 0x16e   : > { %v6299_v19 = vadd.f32 %v1546_v6, %v1464_v36  ;;  %v6305_v39 = vrot.slane %v6161_v60, %v2353_v9  ;;  %v6318_v6 = vrot.slane %v4030_v42, %v6145_v47  ;;  %v1961_v11 = vrot.slane %v1830_v51, 1  ;;  %v5309_v9 = vld [vmem:[%s10056_s1 + $0x210] sm:$0xff]  ;;  %v5311_v36 = vld [vmem:[%s10056_s1 + $0x220] sm:$0xff] }
 0x16f   : > { %v6315_v2 = vsel %vm3442_vm5, %v9796_v58, %v3447_v24  ;;  %v5313_v58 = vld [vmem:[%s10056_s1 + $0x230] sm:$0xff]  ;;  %v10070_v47 = vrot.slane %v6241_v25, 7  ;;  %v6354_v24 = vld [vmem:[%s10056_s1 + $0x58] sm:$0xff]  ;;  %v6362_v42 = vsel %vm1954_vm4, %v10075_v30, %v1957_v37  ;;  %v1834_v30 = vld [vmem:[%s10056_s1 + $0x40] sm:$0xff]  ;;  %v3449_v57 = vrot.slane %v5311_v36, 7 }
 0x170   : > { %10066 = vst [vmem:[#allocation49_spill] sm:$0xff] %v6299_v19  ;;  %10067 = vst [vmem:[#allocation50_spill] sm:$0xff] %v6305_v39  ;;  %v3453_v20 = vrot.slane %v5313_v58, 7  ;;  %v6392_v59 = vsel %vm1954_vm4, %v1957_v37, %v1961_v11  ;;  %v3463_v36 = vrot.slane %v6377_v4, 7 }
 0x171   : > { %10069 = vst [vmem:[#allocation52_spill] sm:$0xff] %v6318_v6  ;;  %v6338_v51 = vsel %vm3442_vm5, %v3451_v35, %v10070_v47  ;;  %v5316_v35 = vld [vmem:[%s10056_s1 + $0x248] sm:$0xff]  ;;  %10076 = vst [vmem:[#allocation56_spill] sm:$0xff] %v6362_v42  ;;  %v10077_v47 = vsub.s32 7, %v6139_v41  ;;  %v3445_v41 = vrot.slane %v5309_v9, 7  ;;  %v1975_v6 = vrot.slane %v6354_v24, 1 }
 0x172   : > { %10071 = vst [vmem:[#allocation53_spill] sm:$0xff] %v6338_v51  ;;  %10082 = vst [vmem:[#allocation60_spill] sm:$0xff] %v6392_v59  ;;  %v3459_v58 = vrot.slane %v5316_v35, 7  ;;  %v1969_v42 = vrot.slane %v1834_v30, 1  ;;  %v6407_v59 = vsel %vm1954_vm4, %v1961_v11, %v1965_v49  ;;  %v6421_v35 = vsel %vm3442_vm5, %v3449_v57, %v3453_v20 }
 0x173   : > { %v6367_v18 = vrot.slane %v6161_v60, %v10077_v47  ;;  %v5315_v60 = vld [vmem:[%s10056_s1 + $0x240] sm:$0xff]  ;;  %v6401_v47 = vld [vmem:[%s10056_s1 + $0x250] sm:$0xff]  ;;  %v6415_v51 = vsel %vm3442_vm5, %v10085_v21, %v3445_v41  ;;  %v6418_v4 = vsel %vm3442_vm5, %v3445_v41, %v3449_v57  ;;  %10088 = vst [vmem:[#allocation65_spill] sm:$0xff] %v6421_v35  ;;  %v6431_v15 = vsel %vm1954_vm4, %v1971_v43, %v1975_v6 }
 0x174   : > { %10083 = vst [vmem:[#allocation61_spill] sm:$0xff] %v6401_v47  ;;  %v3457_v24 = vrot.slane %v5315_v60, 7  ;;  %10086 = vst [vmem:[#allocation63_spill] sm:$0xff] %v6415_v51  ;;  %v6428_v60 = vsel %vm1954_vm4, %v10089_v52, %v1971_v43  ;;  %v10092_v41 = vrot.slane %v6241_v25, 7  ;;  %v6439_v57 = vsel %vm3442_vm5, %v3459_v58, %v3463_v36 }
 0x175   : > { %10078 = vst [vmem:[#allocation57_spill] sm:$0xff] %v6367_v18  ;;  %10087 = vst [vmem:[#allocation64_spill] sm:$0xff] %v6418_v4 }
 0x176   : > { %10090 = vst [vmem:[#allocation66_spill] sm:$0xff] %v6428_v60  ;;  %10091 = vst [vmem:[#allocation67_spill] sm:$0xff] %v6431_v15  ;;  %v6436_v4 = vsel %vm3442_vm5, %v10092_v41, %v3459_v58  ;;  %v6451_v25 = vsel %vm3442_vm5, %v3453_v20, %v3457_v24  ;;  %v1839_v58 = vld [vmem:[%s10056_s1 + $0x68] sm:$0xff] }
 0x177   : > { %10093 = vst [vmem:[#allocation68_spill] sm:$0xff] %v6436_v4  ;;  %10094 = vst [vmem:[#allocation69_spill] sm:$0xff] %v6439_v57 }
 0x178   : > { %10098 = vst [vmem:[#allocation72_spill] sm:$0xff] %v6451_v25 }
 0x1b2   : > { %v1035_v9 = vpop.f32.mrf.mxu1 }
 0x1b3   : > { %v1036_v37 = vadd.f32 %v1035_v9, %v6169_v8 }
 0x1b4   : > { %v1037_v19 = vpop.f32.mrf.mxu1 }
 0x1b5   : > { %v1194_v11 = vmax.f32 %v1036_v37, 0.0  ;;  %v1038_v9 = vadd.f32 %v1037_v19, %v6188_v27  ;;  %v6442_v37 = vsel %vm1954_vm4, %v1965_v49, %v1969_v42  ;;  %v6447_v19 = vsel %vm1954_vm4, %v1969_v42, %v10096_v48  ;;  %v6459_v49 = vld [vmem:[%s10056_s1 + $0x78] sm:$0xff]  ;;  %v6464_v42 = vld [vmem:[%s10056_s1 + $0x268] sm:$0xff] }
 0x1b6   : > { %v1039_v21 = vpop.f32.mrf.mxu1  ;;  %10095 = vst [vmem:[#allocation70_spill] sm:$0xff] %v6442_v37  ;;  %10097 = vst [vmem:[#allocation71_spill] sm:$0xff] %v6447_v19  ;;  %v10105_v15 = vrot.slane %v6459_v49, 1 }
 0x1b7   : > { %v1258_v52 = vmin.f32 %v1194_v11, 6.0  ;;  %v1195_v43 = vmax.f32 %v1038_v9, 0.0  ;;  %v1040_v30 = vadd.f32 %v1039_v21, %v6169_v8  ;;  %10099 = vst [vmem:[#allocation73_spill] sm:$0xff] %v6459_v49  ;;  %10100 = vst [vmem:[#allocation74_spill] sm:$0xff] %v6464_v42  ;;  %v10101_v9 = vrot.slane %v6401_v47, 7 }
 0x1b8   : > { %v1041_v11 = vpop.f32.mrf.mxu1  ;;  %v1979_v21 = vrot.slane %v1839_v58, 1 }
 0x1b9   : > { %v6469_v20 = vsel %vm3442_vm5, %v3457_v24, %v10101_v9  ;;  %1322 = vst [vmem:[#allocation2 + $0x30] sm:$0xff] %v1258_v52  ;;  %v1259_v33 = vmin.f32 %v1195_v43, 6.0  ;;  %v1196_v25 = vmax.f32 %v1040_v30, 0.0  ;;  %v1042_v19 = vadd.f32 %v1041_v11, %v6188_v27 }
 0x1ba   : > { %10102 = vst [vmem:[#allocation75_spill] sm:$0xff] %v6469_v20  ;;  %v6475_v37 = vmul.f32 %v6185_v26, %v1258_v52  ;;  %v1045_v57 = vpop.f32.mrf.mxu1  ;;  %v1548_v4 = vmul.f32 %v6228_v62, %v1258_v52  ;;  %v6479_v47 = vmul.f32 %v6272_v44, %v1258_v52  ;;  %v2359_v24 = vmul.f32 %v6305_v39, %v1258_v52 }
 0x1bb   : > { %v6483_v58 = vmul.f32 %v6346_v31, %v1258_v52  ;;  %1323 = vst.msk [vmem:[#allocation2 + $0x38] sm:$0xff] %vm442_vm3, %v1259_v33  ;;  %v1260_v43 = vmin.f32 %v1196_v25, 6.0  ;;  %v1197_v30 = vmax.f32 %v1042_v19, 0.0  ;;  %v1046_v11 = vadd.f32 %v1045_v57, %v6169_v8 }
 0x1bc   : > { %v6488_v9 = vsel %vm1954_vm4, %v1975_v6, %v1979_v21  ;;  %v1047_v48 = vpop.f32.mrf.mxu1  ;;  %v6491_v41 = vadd.f32 %v1548_v4, %v6244_v5  ;;  %v6494_v20 = vadd.f32 %v2359_v24, %v6321_v50  ;;  %v6499_v52 = vsel %vm1954_vm4, %v1979_v21, %v10105_v15  ;;  %v6511_v24 = vld [vmem:[%s10056_s1 + $0x278] sm:$0xff] }
 0x1bd   : > { %10103 = vst [vmem:[#allocation76_spill] sm:$0xff] %v6483_v58  ;;  %10104 = vst [vmem:[#allocation77_spill] sm:$0xff] %v6488_v9  ;;  %v10107_v33 = vrot.slane %v6464_v42, 7  ;;  %v1261_v6 = vmin.f32 %v1197_v30, 6.0  ;;  %v1198_v57 = vmax.f32 %v1046_v11, 0.0  ;;  %v1048_v25 = vadd.f32 %v1047_v48, %v6188_v27 }
 0x1be   : > { %10106 = vst [vmem:[#allocation78_spill] sm:$0xff] %v6499_v52  ;;  %1324 = vst [vmem:[#allocation2 + $0x40] sm:$0xff] %v1260_v43  ;;  %v1550_v4 = vmul.f32 %v6228_v62, %v1260_v43  ;;  %v1049_v49 = vpop.f32.mrf.mxu1  ;;  %v6514_v15 = vmul.f32 %v6272_v44, %v1260_v43  ;;  %v2361_v21 = vmul.f32 %v6305_v39, %v1260_v43 }
 0x1bf   : > { %v6504_v19 = vsel %vm3442_vm5, %v3463_v36, %v10107_v33  ;;  %10109 = vst [vmem:[#allocation80_spill] sm:$0xff] %v6511_v24  ;;  %v6518_v36 = vmul.f32 %v6346_v31, %v1260_v43  ;;  %v3039_v30 = vmul.f32 %v6372_v3, %v1260_v43  ;;  %1325 = vst.msk [vmem:[#allocation2 + $0x48] sm:$0xff] %vm442_vm3, %v1261_v6  ;;  %v6522_v48 = vmin.f32 %v1198_v57, 6.0 }
 0x1c0   : > { %10108 = vst [vmem:[#allocation79_spill] sm:$0xff] %v6504_v19  ;;  %v1199_v11 = vmax.f32 %v1048_v25, 0.0  ;;  %v1050_v33 = vadd.f32 %v1049_v49, %v6169_v8  ;;  %v6526_v19 = vadd.f32 %v1550_v4, %v6244_v5  ;;  %v1051_v42 = vpop.f32.mrf.mxu1  ;;  %v6529_v52 = vadd.f32 %v2361_v21, %v6321_v50  ;;  %v3025_v9 = vld [vmem:[#allocation2 + $0x30] sm:$0xfe] }
 0x1c1   : > { %10110 = vst [vmem:[#allocation81_spill] sm:$0xff] %v6518_v36  ;;  %v6532_v31 = vadd.f32 %v3039_v30, %v6395_v46  ;;  %v6535_v44 = vmul.f32 %v6185_v26, %v1260_v43  ;;  %1326 = vst [vmem:[#allocation2 + $0x50] sm:$0xff] %v6522_v48  ;;  %v1052_v5 = vadd.f32 %v1051_v42, %v6188_v27 }
 0x1c2   : > { %v1263_v57 = vmin.f32 %v1199_v11, 6.0  ;;  %v1200_v49 = vmax.f32 %v1050_v33, 0.0  ;;  %v1552_v25 = vmul.f32 %v6228_v62, %v6522_v48  ;;  %v1055_v50 = vpop.f32.mrf.mxu1  ;;  %v1397_v4 = vld [vmem:[#allocation2 + $0x38] sm:$0xff]  ;;  %v6544_v46 = vmul.f32 %v6284_v12, %v6522_v48 }
 0x1c3   : > { %10111 = vst [vmem:[#allocation82_spill] sm:$0xff] %v6532_v31  ;;  %10112 = vst [vmem:[#allocation83_spill] sm:$0xff] %v6535_v44  ;;  %v3026_v21 = vld [vmem:[#allocation2 + $0x38] sm:$0xfe]  ;;  %v6548_v43 = vmul.f32 %v6305_v39, %v6522_v48  ;;  %v6552_v30 = vmul.f32 %v6367_v18, %v6522_v48  ;;  %v6555_v42 = vmul.f32 %v6372_v3, %v3025_v9  ;;  %v1201_v33 = vmax.f32 %v1052_v5, 0.0 }
 0x1c4   : > { %1327 = vst.msk [vmem:[#allocation2 + $0x58] sm:$0xff] %vm442_vm3, %v1263_v57  ;;  %v6558_v11 = vmin.f32 %v1200_v49, 6.0  ;;  %v1056_v6 = vadd.f32 %v1055_v50, %v6169_v8  ;;  %v1471_v24 = vmul.f32 %v6155_v54, %v1397_v4  ;;  %v1057_v44 = vpop.f32.mrf.mxu1  ;;  %v1549_v62 = vmul.f32 %v6163_v0, %v1397_v4 }
 0x1c5   : > { %10113 = vst [vmem:[#allocation84_spill] sm:$0xff] %v6555_v42  ;;  %v2292_v26 = vmul.f32 %v6166_v7, %v1397_v4  ;;  %v2360_v60 = vmul.f32 %v6201_v38, %v1397_v4  ;;  %v6566_v35 = vmul.f32 %v6174_v10, %v1397_v4  ;;  %v1678_v9 = vld [vmem:[#allocation2 + $0x40] sm:$0x80]  ;;  %v1265_v57 = vmin.f32 %v1201_v33, 6.0 }
 0x1c6   : > { %1328 = vst [vmem:[#allocation2 + $0x60] sm:$0xff] %v6558_v11  ;;  %v1202_v49 = vmax.f32 %v1056_v6, 0.0  ;;  %v1058_v5 = vadd.f32 %v1057_v44, %v6188_v27  ;;  %v3038_v50 = vmul.f32 %v6216_v56, %v3026_v21  ;;  %v6571_v51 = vld [vmem:[#allocation2 + $0x48] sm:$0xff]  ;;  %v1059_v54 = vpop.f32.mrf.mxu1  ;;  %v1615_v22 = vadd.f32 %v1549_v62, %v6191_v32 }
 0x1c7   : > { %10114 = vst [vmem:[#allocation85_spill] sm:$0xff] %v6571_v51  ;;  %v1679_v31 = vld [vmem:[#allocation2 + $0x48] sm:$0x80]  ;;  %v2424_v36 = vadd.f32 %v2360_v60, %v6212_v53  ;;  %v6576_v4 = vadd.f32 %v1552_v25, %v6475_v37  ;;  %v6579_v58 = vmul.f32 %v6284_v12, %v1678_v9  ;;  %1329 = vst.msk [vmem:[#allocation2 + $0x68] sm:$0xff] %vm442_vm3, %v1265_v57 }
 0x1c8   : > { %v6582_v6 = vmin.f32 %v1202_v49, 6.0  ;;  %v1203_v44 = vmax.f32 %v1058_v5, 0.0  ;;  %v1060_v21 = vadd.f32 %v1059_v54, %v6169_v8  ;;  %v1551_v33 = vmul.f32 %v6163_v0, %v6571_v51  ;;  %v1061_v32 = vpop.f32.mrf.mxu1 }
 0x1c9   : > { %v1695_v62 = vmul.f32 %v6204_v40, %v1679_v31  ;;  %v2294_v53 = vmul.f32 %v6166_v7, %v6571_v51  ;;  %v2362_v60 = vmul.f32 %v6201_v38, %v6571_v51  ;;  %v6594_v37 = vmul.f32 %v6174_v10, %v6571_v51 }
 0x1ca   : > { %1330 = vst [vmem:[#allocation2 + $0x70] sm:$0xff] %v6582_v6  ;;  %v1267_v25 = vmin.f32 %v1203_v44, 6.0  ;;  %v1204_v54 = vmax.f32 %v1060_v21, 0.0  ;;  %v1062_v9 = vadd.f32 %v1061_v32, %v6188_v27  ;;  %v1617_v57 = vadd.f32 %v1551_v33, %v6219_v45  ;;  %v1065_v31 = vpop.f32.mrf.mxu1 }
 0x1cb   : > { %v6599_v49 = vld [vmem:[#allocation2 + $0x58] sm:$0xff]  ;;  %v1761_v5 = vadd.f32 %v1695_v62, %v6230_v61  ;;  %v2426_v7 = vadd.f32 %v2362_v60, %v6233_v63  ;;  %v3040_v42 = vmul.f32 %v6216_v56, %v6571_v51  ;;  %v6606_v10 = vadd.f32 %v3038_v50, %v6222_v55 }
 0x1cc   : > { %1331 = vst.msk [vmem:[#allocation2 + $0x78] sm:$0xff] %vm442_vm3, %v1267_v25  ;;  %v6609_v44 = vmin.f32 %v1204_v54, 6.0  ;;  %v1205_v21 = vmax.f32 %v1062_v9, 0.0  ;;  %v1066_v45 = vadd.f32 %v1065_v31, %v6169_v8  ;;  %v1553_v33 = vmul.f32 %v6163_v0, %v6599_v49  ;;  %v1067_v32 = vpop.f32.mrf.mxu1 }
 0x1cd   : > { %v1697_v61 = vmul.f32 %v6204_v40, %v6599_v49  ;;  %v10115_v63 = vrot.slane %v6196_v34, 1  ;;  %v2364_v55 = vmul.f32 %v6201_v38, %v6599_v49  ;;  %v2498_v50 = vmul.f32 %v6265_v17, %v6599_v49 }
 0x1ce   : > { %1332 = vst [vmem:[#allocation2 + $0x80] sm:$0xff] %v6609_v44  ;;  %v1269_v60 = vmin.f32 %v1205_v21, 6.0  ;;  %v1206_v25 = vmax.f32 %v1066_v45, 0.0  ;;  %v1068_v54 = vadd.f32 %v1067_v32, %v6188_v27  ;;  %v1619_v9 = vadd.f32 %v1553_v33, %v1471_v24  ;;  %v6624_v31 = vld [vmem:[#allocation2 + $0x68] sm:$0xff]  ;;  %v1069_v0 = vpop.f32.mrf.mxu1 }
 0x1cf   : > { %v2148_v62 = vmul.f32 %v10115_v63, %v1761_v5  ;;  %v1763_v51 = vadd.f32 %v1697_v61, %v1615_v22  ;;  %v2428_v29 = vadd.f32 %v2364_v55, %v2292_v26  ;;  %v2562_v34 = vadd.f32 %v2498_v50, %v2424_v36 }
 0x1d0   : > { %v3042_v5 = vmul.f32 %v6216_v56, %v6599_v49  ;;  %1333 = vst.msk [vmem:[#allocation2 + $0x88] sm:$0xff] %vm442_vm3, %v1269_v60  ;;  %v6629_v63 = vmin.f32 %v1206_v25, 6.0  ;;  %v1207_v3 = vmax.f32 %v1068_v54, 0.0  ;;  %v1070_v21 = vadd.f32 %v1069_v0, %v6169_v8  ;;  %v1071_v24 = vpop.f32.mrf.mxu1 }
 0x1d1   : > { %v1699_v45 = vmul.f32 %v6204_v40, %v6624_v31  ;;  %v2150_v33 = vmul.f32 %v6277_v1, %v1763_v51  ;;  %v2366_v26 = vmul.f32 %v6201_v38, %v6624_v31  ;;  %v2500_v22 = vmul.f32 %v6265_v17, %v6624_v31 }
 0x1d2   : > { %10116 = vst [vmem:[#allocation86_spill] sm:$0xff] %v6629_v63  ;;  %v2690_v36 = vrot.slane %v2562_v34, 1  ;;  %1334 = vst [vmem:[#allocation2 + $0x90] sm:$0xff] %v6629_v63  ;;  %v1271_v32 = vmin.f32 %v1207_v3, 6.0  ;;  %v1208_v61 = vmax.f32 %v1070_v21, 0.0  ;;  %v1072_v55 = vadd.f32 %v1071_v24, %v6188_v27  ;;  %v1075_v60 = vpop.f32.mrf.mxu1 }
 0x1d3   : > { %v1765_v0 = vadd.f32 %v1699_v45, %v1617_v57  ;;  %v6641_v50 = vld [vmem:[#allocation2 + $0x78] sm:$0xff]  ;;  %v2430_v25 = vadd.f32 %v2366_v26, %v2294_v53  ;;  %v2564_v54 = vadd.f32 %v2500_v22, %v2426_v7  ;;  %v3044_v51 = vmul.f32 %v6216_v56, %v6624_v31 }
 0x1d4   : > { %v6643_v1 = vadd.f32 %v2690_v36, %v2148_v62  ;;  %1335 = vst.msk [vmem:[#allocation2 + $0x98] sm:$0xff] %vm442_vm3, %v1271_v32  ;;  %v6648_v34 = vmin.f32 %v1208_v61, 6.0  ;;  %v1209_v63 = vmax.f32 %v1072_v55, 0.0  ;;  %v1076_v3 = vadd.f32 %v1075_v60, %v6169_v8  ;;  %v1077_v21 = vpop.f32.mrf.mxu1  ;;  %v6662_v32 = vld [vmem:[%s9769_s7 + $0x18] ss:$0 sm:$0xff] }
 0x1d5   : > { %v1701_v57 = vmul.f32 %v6204_v40, %v6641_v50  ;;  %v2152_v45 = vmul.f32 %v6290_v13, %v1765_v0  ;;  %v2502_v7 = vmul.f32 %v6265_v17, %v6641_v50  ;;  %v2693_v53 = vrot.slane %v2564_v54, 1  ;;  %v3170_v55 = vld [vmem:[#allocation2 + $0x58] sm:$0xfe] }
 0x1d6   : > { %10117 = vst [vmem:[#allocation87_spill] sm:$0xff] %v6648_v34  ;;  %v3106_v62 = vadd.f32 %v3040_v42, %v6268_v23  ;;  %1336 = vst [vmem:[#allocation2 + $0xa0] sm:$0xff] %v6648_v34  ;;  %v1273_v24 = vmin.f32 %v1209_v63, 6.0  ;;  %v1210_v26 = vmax.f32 %v1076_v3, 0.0  ;;  %v1078_v22 = vadd.f32 %v1077_v21, %v6188_v27  ;;  %v1079_v0 = vpop.f32.mrf.mxu1 }
 0x1d7   : > { %v1767_v61 = vadd.f32 %v1701_v57, %v1619_v9  ;;  %v6664_v13 = vld [vmem:[#allocation2 + $0x88] sm:$0xff]  ;;  %v2566_v60 = vadd.f32 %v2502_v7, %v2428_v29  ;;  %v2694_v54 = vsel %vm1954_vm4, %v2690_v36, %v2693_v53  ;;  %v3108_v23 = vadd.f32 %v3042_v5, %v6566_v35 }
 0x1d8   : > { %v3110_v42 = vadd.f32 %v3044_v51, %v6594_v37  ;;  %1337 = vst.msk [vmem:[#allocation2 + $0xa8] sm:$0xff] %vm442_vm3, %v1273_v24  ;;  %v6670_v63 = vmin.f32 %v1210_v26, 6.0  ;;  %v1211_v3 = vmax.f32 %v1078_v22, 0.0  ;;  %v1080_v21 = vadd.f32 %v1079_v0, %v6169_v8  ;;  %v1081_v57 = vpop.f32.mrf.mxu1 }
 0x1d9   : > { %v2154_v9 = vmul.f32 %v6297_v16, %v1767_v61  ;;  %v2504_v34 = vmul.f32 %v6265_v17, %v6664_v13  ;;  %v2697_v29 = vrot.slane %v2566_v60, 1  ;;  %v2884_v7 = vadd.f32 %v2694_v54, %v2150_v33 }
 0x1da   : > { %10118 = vst [vmem:[#allocation88_spill] sm:$0xff] %v6670_v63  ;;  %v3182_v36 = vmul.f32 %v6662_v32, %v3170_v55  ;;  %1338 = vst [vmem:[#allocation2 + $0xb0] sm:$0xff] %v6670_v63  ;;  %v1275_v35 = vmin.f32 %v1211_v3, 6.0  ;;  %v1212_v37 = vmax.f32 %v1080_v21, 0.0  ;;  %v1082_v5 = vadd.f32 %v1081_v57, %v6188_v27  ;;  %v1085_v24 = vpop.f32.mrf.mxu1 }
 0x1db   : > { %v3184_v51 = vmul.f32 %v6662_v32, %v6624_v31  ;;  %v6681_v16 = vadd.f32 %v2504_v34, %v2430_v25  ;;  %v2698_v26 = vsel %vm1954_vm4, %v2693_v53, %v2697_v29  ;;  %v3186_v33 = vmul.f32 %v6662_v32, %v6641_v50 }
 0x1dc   : > { %v3188_v22 = vmul.f32 %v6662_v32, %v6664_v13  ;;  %1339 = vst.msk [vmem:[#allocation2 + $0xb8] sm:$0xff] %vm442_vm3, %v1275_v35  ;;  %v6689_v61 = vmin.f32 %v1212_v37, 6.0  ;;  %v1213_v55 = vmax.f32 %v1082_v5, 0.0  ;;  %v1086_v0 = vadd.f32 %v1085_v24, %v6169_v8  ;;  %v1087_v54 = vpop.f32.mrf.mxu1 }
 0x1dd   : > { %v2886_v60 = vadd.f32 %v2698_v26, %v2152_v45  ;;  %v2701_v25 = vrot.slane %v6681_v16, 1  ;;  %v3248_v34 = vadd.f32 %v3182_v36, %v6606_v10  ;;  %v3250_v53 = vadd.f32 %v3184_v51, %v3106_v62 }
 0x1de   : > { %v3252_v3 = vadd.f32 %v3186_v33, %v3108_v23  ;;  %1340 = vst [vmem:[#allocation2 + $0xc0] sm:$0xff] %v6689_v61  ;;  %v1277_v21 = vmin.f32 %v1213_v55, 6.0  ;;  %v1214_v57 = vmax.f32 %v1086_v0, 0.0  ;;  %v1088_v63 = vadd.f32 %v1087_v54, %v6188_v27  ;;  %v1089_v37 = vpop.f32.mrf.mxu1  ;;  %v10120_v33 = vld [vmem:[#allocation53_spill] sm:$0xff] }
 0x1df   : > { %v3254_v35 = vadd.f32 %v3188_v22, %v3110_v42  ;;  %v2702_v5 = vsel %vm1954_vm4, %v2697_v29, %v2701_v25  ;;  %v10119_v45 = vrot.slane %v6251_v14, 7  ;;  %v3638_v26 = vmul.f32 %v6315_v2, %v3250_v53 }
 0x1e0   : > { %v3640_v10 = vmul.f32 %v6333_v28, %v3252_v3  ;;  %1341 = vst.msk [vmem:[#allocation2 + $0xc8] sm:$0xff] %vm442_vm3, %v1277_v21  ;;  %v1278_v62 = vmin.f32 %v1214_v57, 6.0  ;;  %v1215_v23 = vmax.f32 %v1088_v63, 0.0  ;;  %v1090_v36 = vadd.f32 %v1089_v37, %v6169_v8  ;;  %v1091_v42 = vpop.f32.mrf.mxu1 }
 0x1e1   : > { %v3636_v24 = vmul.f32 %v10119_v45, %v3248_v34  ;;  %v2888_v51 = vadd.f32 %v2702_v5, %v2154_v9  ;;  %v6706_v22 = vmul.f32 %v10120_v33, %v3254_v35  ;;  %v3772_v29 = vrot.slane %v3638_v26, 2  ;;  %v10121_v26 = vld [vmem:[#allocation54_spill] sm:$0xff] }
 0x1e2   : > { %v3776_v0 = vrot.slane %v3640_v10, 2  ;;  %1342 = vst [vmem:[#allocation2 + $0xd0] sm:$0xff] %v1278_v62  ;;  %v1279_v14 = vmin.f32 %v1215_v23, 6.0  ;;  %v1216_v54 = vmax.f32 %v1090_v36, 0.0  ;;  %v1092_v2 = vadd.f32 %v1091_v42, %v6188_v27  ;;  %v1095_v34 = vpop.f32.mrf.mxu1 }
 0x1e3   : > { %v3769_v55 = vrot.slane %v3636_v24, 2  ;;  %v1698_v28 = vmul.f32 %v6284_v12, %v6558_v11  ;;  %v3780_v53 = vrot.slane %v6706_v22, 2  ;;  %v1096_v35 = vadd.f32 %v1095_v34, %v6169_v8 }
 0x1e4   : > { %v3777_v9 = vsel %vm3767_vm6, %v3772_v29, %v3776_v0  ;;  %1343 = vst.msk [vmem:[#allocation2 + $0xd8] sm:$0xff] %vm442_vm3, %v1279_v14  ;;  %v1280_v21 = vmin.f32 %v1216_v54, 6.0  ;;  %v1217_v57 = vmax.f32 %v1092_v2, 0.0  ;;  %v1097_v5 = vpop.f32.mrf.mxu1  ;;  %v1700_v62 = vmul.f32 %v6284_v12, %v6582_v6  ;;  %v10122_v14 = vld [vmem:[#allocation49_spill] sm:$0xff] }
 0x1e5   : > { %v3773_v63 = vsel %vm3767_vm6, %v3769_v55, %v3772_v29  ;;  %v3965_v3 = vadd.f32 %v3769_v55, %v6643_v1  ;;  %v3781_v45 = vsel %vm3767_vm6, %v3776_v0, %v3780_v53  ;;  %v3969_v24 = vadd.f32 %v3777_v9, %v2886_v60 }
 0x1e6   : > { %v3967_v37 = vadd.f32 %v3773_v63, %v2884_v7  ;;  %1344 = vst [vmem:[#allocation2 + $0xe0] sm:$0xff] %v1280_v21  ;;  %v1281_v1 = vmin.f32 %v1217_v57, 6.0  ;;  %v1218_v23 = vmax.f32 %v1096_v35, 0.0  ;;  %v1098_v36 = vadd.f32 %v1097_v5, %v6188_v27  ;;  %v1099_v33 = vpop.f32.mrf.mxu1 }
 0x1e7   : > { %v4043_v10 = vadd.f32 %v10121_v26, %v3965_v3  ;;  %v3971_v42 = vadd.f32 %v3781_v45, %v2888_v51  ;;  %v4047_v55 = vadd.f32 %v10121_v26, %v3969_v24  ;;  %v1760_v60 = vadd.f32 %v6579_v58, %v10122_v14  ;;  %v10125_v14 = vld [vmem:[#allocation56_spill] sm:$0xff] }
 0x1e8   : > { %v4045_v7 = vadd.f32 %v10121_v26, %v3967_v37  ;;  %1345 = vst.msk [vmem:[#allocation2 + $0xe8] sm:$0xff] %vm442_vm3, %v1281_v1  ;;  %v1282_v0 = vmin.f32 %v1218_v23, 6.0  ;;  %v1219_v54 = vmax.f32 %v1098_v36, 0.0  ;;  %v1100_v2 = vadd.f32 %v1099_v33, %v6169_v8  ;;  %v1101_v63 = vpop.f32.mrf.mxu1 }
 0x1e9   : > { %v4109_v29 = vmax.f32 %v4043_v10, 0.0  ;;  %v4049_v34 = vadd.f32 %v10121_v26, %v3971_v42  ;;  %v4113_v51 = vmax.f32 %v4047_v55, 0.0  ;;  %v1762_v21 = vadd.f32 %v6544_v46, %v6491_v41 }
 0x1ea   : > { %v4111_v9 = vmax.f32 %v4045_v7, 0.0  ;;  %1346 = vst [vmem:[#allocation2 + $0xf0] sm:$0xff] %v1282_v0  ;;  %v1283_v57 = vmin.f32 %v1219_v54, 6.0  ;;  %v1220_v35 = vmax.f32 %v1100_v2, 0.0  ;;  %v1102_v58 = vadd.f32 %v1101_v63, %v6188_v27  ;;  %v1105_v5 = vpop.f32.mrf.mxu1  ;;  %v10123_v7 = vld [vmem:[#allocation47_spill] sm:$0xff]  ;;  %v10126_v54 = vld [vmem:[#allocation60_spill] sm:$0xff] }
 0x1eb   : > { %v4175_v3 = vmin.f32 %v4109_v29, 6.0  ;;  %v4115_v37 = vmax.f32 %v4049_v34, 0.0  ;;  %v4179_v24 = vmin.f32 %v4113_v51, 6.0  ;;  %v1764_v10 = vadd.f32 %v1698_v28, %v6526_v19 }
 0x1ec   : > { %v4177_v45 = vmin.f32 %v4111_v9, 6.0  ;;  %v1766_v1 = vadd.f32 %v1700_v62, %v6576_v4  ;;  %1347 = vst.msk [vmem:[#allocation2 + $0xf8] sm:$0xff] %vm442_vm3, %v1283_v57  ;;  %v1284_v23 = vmin.f32 %v1220_v35, 6.0  ;;  %v1221_v36 = vmax.f32 %v1102_v58, 0.0  ;;  %v1107_v46 = vpop.f32.mrf.mxu1 }
 0x1ed   : > { %v1106_v42 = vadd.f32 %v1105_v5, %v6169_v8  ;;  %v4181_v41 = vmin.f32 %v4115_v37, 6.0  ;;  %v10124_v55 = vrot.slane %v10123_v7, 1  ;;  %v6743_v0 = vmul.f32 %v10125_v14, %v1762_v21 }
 0x1ee   : > { %v4241_v33 = vpack.c.bf16 %v4177_v45, %v4175_v3  ;;  %v6746_v19 = vmul.f32 %v10126_v54, %v1764_v10  ;;  %1348 = vst [vmem:[#allocation2 + $0x100] sm:$0xff] %v1284_v23  ;;  %v1285_v4 = vmin.f32 %v1221_v36, 6.0  ;;  %v1108_v62 = vadd.f32 %v1107_v46, %v6188_v27  ;;  %v1109_v34 = vpop.f32.mrf.mxu1 }
 0x1ef   : > { %v6740_v29 = vmul.f32 %v10124_v55, %v1760_v60  ;;  %v1222_v28 = vmax.f32 %v1106_v42, 0.0  ;;  %v4243_v2 = vpack.c.bf16 %v4181_v41, %v4179_v24  ;;  %v6750_v51 = vmul.f32 %v6407_v59, %v1766_v1 }
 0x1f0   : > { %v4324_v63 = vshrl.u32 %v4241_v33, 16  ;;  %v4327_v9 = vshll.u32 %v4241_v33, 16  ;;  %v2365_v60 = vmul.f32 %v6305_v39, %v6558_v11  ;;  %1349 = vst.msk [vmem:[#allocation2 + $0x108] sm:$0xff] %vm442_vm3, %v1285_v4  ;;  %v1223_v21 = vmax.f32 %v1108_v62, 0.0  ;;  %v1111_v58 = vpop.f32.mrf.mxu1 }
 0x1f1   : > { %v1286_v3 = vmin.f32 %v1222_v28, 6.0  ;;  %v1110_v57 = vadd.f32 %v1109_v34, %v6169_v8  ;;  %v4332_v35 = vshrl.u32 %v4243_v2, 16  ;;  %v4335_v45 = vshll.u32 %v4243_v2, 16 }
 0x1f2   : > { %v4326_v37 = vrot.slane %v4324_v63, 3  ;;  %v4329_v5 = vrot.slane %v4327_v9, 4  ;;  %v2427_v24 = vadd.f32 %v6548_v43, %v6479_v47  ;;  %v1287_v59 = vmin.f32 %v1223_v21, 6.0  ;;  %v1115_v41 = vpop.f32.mrf.mxu1  ;;  %v10127_v63 = vld [vmem:[#allocation58_spill] sm:$0xff] }
 0x1f3   : > { %1350 = vst [vmem:[#allocation2 + $0x110] sm:$0xff] %v1286_v3  ;;  %v1224_v10 = vmax.f32 %v1110_v57, 0.0  ;;  %v1112_v1 = vadd.f32 %v1111_v58, %v6188_v27  ;;  %v4334_v23 = vrot.slane %v4332_v35, 3  ;;  %v4337_v42 = vrot.slane %v4335_v45, 4  ;;  %v3169_v35 = vld [vmem:[#allocation2 + $0x50] sm:$0xfe] }
 0x1f4   : > { %v4330_v36 = vor.u32 %v4329_v5, %v4326_v37  ;;  %v2429_v46 = vadd.f32 %v2365_v60, %v6514_v15  ;;  %v2499_v33 = vmul.f32 %v6367_v18, %v6558_v11  ;;  %1351 = vst.msk [vmem:[#allocation2 + $0x118] sm:$0xff] %vm442_vm3, %v1287_v59  ;;  %v1116_v47 = vadd.f32 %v1115_v41, %v6169_v8  ;;  %v1117_v28 = vpop.f32.mrf.mxu1  ;;  %v10129_v5 = vld [vmem:[#allocation62_spill] sm:$0xff]  ;;  %v10130_v45 = vld [vmem:[#allocation84_spill] sm:$0xff] }
 0x1f5   : > { %v1288_v7 = vmin.f32 %v1224_v10, 6.0  ;;  %v1225_v55 = vmax.f32 %v1112_v1, 0.0  ;;  %v2501_v43 = vmul.f32 %v6367_v18, %v6582_v6  ;;  %v6766_v14 = vor.u32 %v4337_v42, %v4334_v23  ;;  %v10131_v23 = vld [vmem:[#allocation76_spill] sm:$0xff] }
 0x1f6   : > { %v2503_v54 = vmul.f32 %v6367_v18, %v6609_v44  ;;  %v2561_v15 = vadd.f32 %v6552_v30, %v6494_v20  ;;  %v2563_v4 = vadd.f32 %v2499_v33, %v6529_v52  ;;  %v1226_v2 = vmax.f32 %v1116_v47, 0.0  ;;  %v1119_v58 = vpop.f32.mrf.mxu1  ;;  %v6784_v52 = vld [vmem:[%s9769_s7 + $0x10] ss:$0 sm:$0xff] }
 0x1f7   : > { %1352 = vst [vmem:[#allocation2 + $0x120] sm:$0xff] %v1288_v7  ;;  %v1289_v62 = vmin.f32 %v1225_v55, 6.0  ;;  %v2565_v34 = vadd.f32 %v2501_v43, %v2427_v24  ;;  %v3041_v9 = vmul.f32 %v10127_v63, %v6522_v48  ;;  %v4339_v60 = vsel %vm4305_vm7, %v4330_v36, %v6766_v14  ;;  %10128 = vst [vmem:[#allocation53_spill] sm:$0xff] %v6784_v52 }
 0x1f8   : > { %v6777_v3 = vadd.f32 %v2503_v54, %v2429_v46  ;;  %v2689_v21 = vrot.slane %v2561_v15, 1  ;;  %v2691_v57 = vrot.slane %v2563_v4, 1  ;;  %5384 = vmatprep.mubr.msk.bf16.mxu0 %vm442_vm3, %v4339_v60  ;;  %v1290_v20 = vmin.f32 %v1226_v2, 6.0  ;;  %v10132_v46 = vld [vmem:[#allocation81_spill] sm:$0xff]  ;;  %v1121_v55 = vpop.f32.mrf.mxu1  ;;  %v10133_v2 = vld [vmem:[#allocation82_spill] sm:$0xff] }
 0x1f9   : > { %1353 = vst.msk [vmem:[#allocation2 + $0x128] sm:$0xff] %vm442_vm3, %v1289_v62  ;;  %v2695_v30 = vrot.slane %v2565_v34, 1  ;;  %v3043_v37 = vmul.f32 %v10127_v63, %v6558_v11  ;;  %v3103_v24 = vadd.f32 %v10130_v45, %v10129_v5  ;;  %v3107_v36 = vadd.f32 %v3041_v9, %v10131_v23  ;;  %v10138_v45 = vld [vmem:[#allocation63_spill] sm:$0xff] }
 0x1fa   : > { %v2692_v59 = vsel %vm1954_vm4, %v2689_v21, %v2691_v57  ;;  %v2699_v10 = vrot.slane %v6777_v3, 1  ;;  %v2881_v1 = vadd.f32 %v2689_v21, %v6740_v29  ;;  %1354 = vst [vmem:[#allocation2 + $0x130] sm:$0xff] %v1290_v20  ;;  %v3181_v7 = vmul.f32 %v6784_v52, %v3169_v35 }
 0x1fb   : > { %v2696_v42 = vsel %vm1954_vm4, %v2691_v57, %v2695_v30  ;;  %v2883_v41 = vadd.f32 %v2692_v59, %v6743_v0  ;;  %v3109_v33 = vadd.f32 %v3043_v37, %v10132_v46  ;;  %v3183_v29 = vmul.f32 %v6784_v52, %v6558_v11  ;;  %v10134_v57 = vld [vmem:[#allocation51_spill] sm:$0xff]  ;;  %v10136_v37 = vld [vmem:[#allocation85_spill] sm:$0xff] }
 0x1fc   : > { %v2700_v47 = vsel %vm1954_vm4, %v2695_v30, %v2699_v10  ;;  %v2885_v43 = vadd.f32 %v2696_v42, %v6746_v19  ;;  %v3185_v54 = vmul.f32 %v6784_v52, %v6582_v6  ;;  %v3187_v0 = vmul.f32 %v6784_v52, %v6609_v44  ;;  %v6819_v46 = vld [vmem:[#allocation2 + $0x98] sm:$0xff] }
 0x1fd   : > { %v2887_v15 = vadd.f32 %v2700_v47, %v6750_v51  ;;  %v3247_v4 = vadd.f32 %v3181_v7, %v3103_v24  ;;  %v1118_v62 = vadd.f32 %v1117_v28, %v6188_v27  ;;  %v3249_v34 = vadd.f32 %v3183_v29, %v10133_v2  ;;  %v10137_v51 = vld [vmem:[#allocation39_spill] sm:$0xff]  ;;  %v10139_v24 = vld [vmem:[#allocation64_spill] sm:$0xff] }
 0x1fe   : > { %v3251_v9 = vadd.f32 %v3185_v54, %v3107_v36  ;;  %v1120_v60 = vadd.f32 %v1119_v58, %v6169_v8  ;;  %v1122_v19 = vadd.f32 %v1121_v55, %v6188_v27  ;;  %v3253_v21 = vadd.f32 %v3187_v0, %v3109_v33  ;;  %v10140_v36 = vld [vmem:[#allocation65_spill] sm:$0xff]  ;;  %v10141_v2 = vld [vmem:[#allocation40_spill] sm:$0xff] }
 0x1ff   : > { %v10135_v35 = vrot.slane %v10134_v57, 7  ;;  %v1227_v30 = vmax.f32 %v1118_v62, 0.0  ;;  %v1473_v5 = vmul.f32 %v10137_v51, %v10136_v37  ;;  %v3637_v59 = vmul.f32 %v10138_v45, %v3249_v34 }
 0x200   : > { %v3639_v23 = vmul.f32 %v10139_v24, %v3251_v9  ;;  %v1228_v28 = vmax.f32 %v1120_v60, 0.0  ;;  %v1229_v42 = vmax.f32 %v1122_v19, 0.0  ;;  %v6822_v58 = vmul.f32 %v10140_v36, %v3253_v21 }
 0x201   : > { %v3635_v20 = vmul.f32 %v10135_v35, %v3247_v4  ;;  %v1291_v33 = vmin.f32 %v1227_v30, 6.0  ;;  %v1475_v55 = vmul.f32 %v10137_v51, %v6599_v49  ;;  %v3770_v47 = vrot.slane %v3637_v59, 2  ;;  %v10142_v30 = vld [vmem:[#allocation52_spill] sm:$0xff] }
 0x202   : > { %v3774_v29 = vrot.slane %v3639_v23, 2  ;;  %v1292_v54 = vmin.f32 %v1228_v28, 6.0  ;;  %v1293_v0 = vmin.f32 %v1229_v42, 6.0  ;;  %v9847_v4 = vrot.slane %v6822_v58, 2  ;;  %v10143_v23 = vld [vmem:[#allocation41_spill] sm:$0xff] }
 0x203   : > { %v3768_v7 = vrot.slane %v3635_v20, 2  ;;  %1355 = vst.msk [vmem:[#allocation2 + $0x138] sm:$0xff] %vm442_vm3, %v1291_v33  ;;  %v1555_v34 = vmul.f32 %v10141_v2, %v6624_v31  ;;  %v1557_v9 = vmul.f32 %v10141_v2, %v6641_v50  ;;  %v1703_v21 = vmul.f32 %v6204_v40, %v6664_v13 }
 0x204   : > { %v3775_v19 = vsel %vm3767_vm6, %v3770_v47, %v3774_v29  ;;  %1356 = vst [vmem:[#allocation2 + $0x140] sm:$0xff] %v1292_v54  ;;  %1357 = vst.msk [vmem:[#allocation2 + $0x148] sm:$0xff] %vm442_vm3, %v1293_v0  ;;  %v3779_v57 = vsel %vm3767_vm6, %v3774_v29, %v9847_v4  ;;  %v2296_v28 = vmul.f32 %v10143_v23, %v6599_v49  ;;  %v10147_v4 = vld [vmem:[#allocation68_spill] sm:$0xff] }
 0x205   : > { %v3964_v62 = vadd.f32 %v3768_v7, %v2881_v1  ;;  %v3771_v60 = vsel %vm3767_vm6, %v3768_v7, %v3770_v47  ;;  %v1705_v1 = vmul.f32 %v6204_v40, %v6819_v46  ;;  %v3968_v20 = vadd.f32 %v3775_v19, %v2885_v43 }
 0x206   : > { %v3966_v35 = vadd.f32 %v3771_v60, %v2883_v41  ;;  %v3970_v45 = vadd.f32 %v3779_v57, %v2887_v15  ;;  %v1621_v59 = vadd.f32 %v1555_v34, %v1473_v5  ;;  %v1623_v24 = vadd.f32 %v1557_v9, %v1475_v55  ;;  %v6852_v5 = vld [vmem:[#allocation2 + $0xa8] sm:$0xff] }
 0x207   : > { %v4042_v37 = vadd.f32 %v10142_v30, %v3964_v62  ;;  %v4046_v36 = vadd.f32 %v10142_v30, %v3968_v20  ;;  %v2298_v33 = vmul.f32 %v10143_v23, %v6624_v31  ;;  %v2368_v15 = vmul.f32 %v6201_v38, %v6641_v50  ;;  %v10144_v34 = vld [vmem:[#allocation66_spill] sm:$0xff]  ;;  %v10145_v60 = vld [vmem:[#allocation67_spill] sm:$0xff] }
 0x208   : > { %v4044_v42 = vadd.f32 %v10142_v30, %v3966_v35  ;;  %v4048_v47 = vadd.f32 %v10142_v30, %v3970_v45  ;;  %v1769_v41 = vadd.f32 %v1703_v21, %v1621_v59  ;;  %v1771_v43 = vadd.f32 %v1705_v1, %v1623_v24  ;;  %v10146_v59 = vld [vmem:[#allocation42_spill] sm:$0xff] }
 0x209   : > { %v4108_v7 = vmax.f32 %v4042_v37, 0.0  ;;  %v4112_v29 = vmax.f32 %v4046_v36, 0.0  ;;  %v2370_v0 = vmul.f32 %v6201_v38, %v6664_v13  ;;  %v2432_v57 = vadd.f32 %v2368_v15, %v2296_v28 }
 0x20a   : > { %v4110_v55 = vmax.f32 %v4044_v42, 0.0  ;;  %v4114_v62 = vmax.f32 %v4048_v47, 0.0  ;;  %v2156_v9 = vmul.f32 %v10144_v34, %v1769_v41  ;;  %v2158_v19 = vmul.f32 %v10145_v60, %v1771_v43 }
 0x20b   : > { %v4174_v54 = vmin.f32 %v4108_v7, 6.0  ;;  %v4178_v21 = vmin.f32 %v4112_v29, 6.0  ;;  %v2434_v1 = vadd.f32 %v2370_v0, %v2298_v33  ;;  %v2506_v20 = vmul.f32 %v6265_v17, %v6819_v46 }
 0x20c   : > { %v4176_v35 = vmin.f32 %v4110_v55, 6.0  ;;  %v4180_v37 = vmin.f32 %v4114_v62, 6.0  ;;  %v2508_v45 = vmul.f32 %v6265_v17, %v6852_v5  ;;  %v2968_v24 = vmul.f32 %v10146_v59, %v6599_v49 }
 0x20d   : > { %v2970_v42 = vmul.f32 %v10146_v59, %v6624_v31  ;;  %v2570_v7 = vadd.f32 %v2506_v20, %v2432_v57  ;;  %v3046_v28 = vmul.f32 %v6216_v56, %v6641_v50  ;;  %v3048_v33 = vmul.f32 %v6216_v56, %v6664_v13  ;;  %v1125_v20 = vpop.f32.mrf.mxu1 }
 0x20e   : > { %v4240_v36 = vpack.c.bf16 %v4176_v35, %v4174_v54  ;;  %v4242_v47 = vpack.c.bf16 %v4180_v37, %v4178_v21  ;;  %v6870_v41 = vadd.f32 %v2508_v45, %v2434_v1  ;;  %v3190_v43 = vmul.f32 %v6662_v32, %v6819_v46 }
 0x20f   : > { %v3192_v49 = vmul.f32 %v6662_v32, %v6852_v5  ;;  %v2705_v29 = vrot.slane %v2570_v7, 1  ;;  %v3112_v54 = vadd.f32 %v3046_v28, %v2968_v24  ;;  %v3114_v60 = vadd.f32 %v3048_v33, %v2970_v42 }
 0x210   : > { %v4307_v15 = vshrl.u32 %v4240_v36, 16  ;;  %v4310_v55 = vshll.u32 %v4240_v36, 16  ;;  %v4315_v0 = vshrl.u32 %v4242_v47, 16  ;;  %v4318_v62 = vshll.u32 %v4242_v47, 16 }
 0x211   : > { %v9849_v34 = vrot.slane %v6870_v41, 1  ;;  %v2706_v21 = vsel %vm1954_vm4, %v2701_v25, %v2705_v29  ;;  %v3256_v1 = vadd.f32 %v3190_v43, %v3112_v54  ;;  %v3258_v47 = vadd.f32 %v3192_v49, %v3114_v60  ;;  %v10148_v25 = vld [vmem:[#allocation43_spill] sm:$0xff]  ;;  %v10150_v54 = vld [vmem:[#allocation69_spill] sm:$0xff] }
 0x212   : > { %v4309_v57 = vrot.slane %v4307_v15, 3  ;;  %v4312_v35 = vrot.slane %v4310_v55, 4  ;;  %v4317_v37 = vrot.slane %v4315_v0, 3  ;;  %v4320_v45 = vrot.slane %v4318_v62, 4  ;;  %v10149_v15 = vld [vmem:[#allocation46_spill] sm:$0xff]  ;;  %v10151_v60 = vld [vmem:[#allocation83_spill] sm:$0xff] }
 0x213   : > { %v2710_v36 = vsel %vm1954_vm4, %v2705_v29, %v9849_v34  ;;  %v2890_v24 = vadd.f32 %v2706_v21, %v2156_v9  ;;  %v3644_v42 = vmul.f32 %v10147_v4, %v3256_v1  ;;  %v1126_v16 = vadd.f32 %v1125_v20, %v6169_v8 }
 0x214   : > { %v4313_v7 = vor.u32 %v4312_v35, %v4309_v57  ;;  %v2892_v28 = vadd.f32 %v2710_v36, %v2158_v19  ;;  %v6884_v33 = vor.u32 %v4320_v45, %v4317_v37  ;;  %v1474_v43 = vmul.f32 %v10148_v25, %v6522_v48  ;;  %v1127_v19 = vpop.f32.mrf.mxu1  ;;  %v10152_v35 = vld [vmem:[#allocation86_spill] sm:$0xff]  ;;  %v10153_v45 = vld [vmem:[#allocation48_spill] sm:$0xff] }
 0x215   : > { %v1554_v55 = vmul.f32 %v10149_v15, %v6558_v11  ;;  %v6892_v0 = vmul.f32 %v10150_v54, %v3258_v47  ;;  %v3784_v29 = vrot.slane %v3644_v42, 2  ;;  %v1556_v9 = vmul.f32 %v10149_v15, %v6582_v6 }
 0x216   : > { %v1702_v4 = vmul.f32 %v6284_v12, %v6609_v44  ;;  %v4322_v49 = vsel %vm4305_vm7, %v4313_v7, %v6884_v33  ;;  %v1230_v62 = vmax.f32 %v1126_v16, 0.0  ;;  %v1704_v21 = vmul.f32 %v6284_v12, %v10152_v35 }
 0x217   : > { %v1620_v57 = vadd.f32 %v1554_v55, %v10151_v60  ;;  %4779 = vmatmul.mubr.bf16.vlgmr.msra.gmra.mxu0 %v4322_v49  ;;  %v3785_v1 = vsel %vm3767_vm6, %v3780_v53, %v3784_v29  ;;  %v9848_v20 = vrot.slane %v6892_v0, 2  ;;  %v1622_v37 = vadd.f32 %v1556_v9, %v1474_v43  ;;  %v1129_v43 = vpop.f32.mrf.mxu1  ;;  %v10155_v60 = vld [vmem:[#allocation71_spill] sm:$0xff] }
 0x218   : > { %v2295_v36 = vmul.f32 %v10153_v45, %v6522_v48  ;;  %v3973_v47 = vadd.f32 %v3785_v1, %v2890_v24  ;;  %v1294_v42 = vmin.f32 %v1230_v62, 6.0  ;;  %v2297_v16 = vmul.f32 %v10153_v45, %v6558_v11  ;;  %v10156_v1 = vld [vmem:[#allocation87_spill] sm:$0xff] }
 0x219   : > { %v1768_v7 = vadd.f32 %v1702_v4, %v1620_v57  ;;  %v3789_v55 = vsel %vm3767_vm6, %v3784_v29, %v9848_v20  ;;  %v1770_v54 = vadd.f32 %v1704_v21, %v1622_v37  ;;  %v2367_v22 = vmul.f32 %v6305_v39, %v6582_v6  ;;  %v10154_v4 = vld [vmem:[#allocation70_spill] sm:$0xff] }
 0x21a   : > { %v2369_v53 = vmul.f32 %v6305_v39, %v6609_v44  ;;  %v3975_v9 = vadd.f32 %v3789_v55, %v2892_v28  ;;  %v4051_v24 = vadd.f32 %v10121_v26, %v3973_v47  ;;  %1358 = vst [vmem:[#allocation2 + $0x150] sm:$0xff] %v1294_v42  ;;  %v2505_v62 = vmul.f32 %v6367_v18, %v10152_v35  ;;  %v10157_v28 = vld [vmem:[#allocation55_spill] sm:$0xff] }
 0x21b   : > { %v2155_v49 = vmul.f32 %v10154_v4, %v1768_v7  ;;  %v2157_v57 = vmul.f32 %v10155_v60, %v1770_v54  ;;  %v2431_v29 = vadd.f32 %v2367_v22, %v2295_v36  ;;  %v2507_v37 = vmul.f32 %v6367_v18, %v10156_v1 }
 0x21c   : > { %v2433_v21 = vadd.f32 %v2369_v53, %v2297_v16  ;;  %v4053_v20 = vadd.f32 %v10121_v26, %v3975_v9  ;;  %v4117_v34 = vmax.f32 %v4051_v24, 0.0  ;;  %v2967_v55 = vmul.f32 %v10157_v28, %v6522_v48  ;;  %v1131_v16 = vpop.f32.mrf.mxu1 }
 0x21d   : > { %v2969_v47 = vmul.f32 %v10157_v28, %v6558_v11  ;;  %v2569_v42 = vadd.f32 %v2505_v62, %v2431_v29  ;;  %v3045_v54 = vmul.f32 %v10127_v63, %v6582_v6  ;;  %v3047_v36 = vmul.f32 %v10127_v63, %v6609_v44 }
 0x21e   : > { %v6930_v7 = vadd.f32 %v2507_v37, %v2433_v21  ;;  %v4119_v22 = vmax.f32 %v4053_v20, 0.0  ;;  %v4183_v53 = vmin.f32 %v4117_v34, 6.0  ;;  %v3189_v9 = vmul.f32 %v6784_v52, %v10152_v35 }
 0x21f   : > { %v3191_v48 = vmul.f32 %v6784_v52, %v10156_v1  ;;  %v2703_v24 = vrot.slane %v2569_v42, 1  ;;  %v3111_v4 = vadd.f32 %v3045_v54, %v2967_v55  ;;  %v3113_v62 = vadd.f32 %v3047_v36, %v2969_v47  ;;  %v10159_v36 = vld [vmem:[#allocation72_spill] sm:$0xff] }
 0x220   : > { %10158 = vst [vmem:[#allocation49_spill] sm:$0xff] %v6930_v7  ;;  %v2707_v11 = vrot.slane %v6930_v7, 1  ;;  %v4185_v60 = vmin.f32 %v4119_v22, 6.0  ;;  %v1128_v29 = vadd.f32 %v1127_v19, %v6188_v27  ;;  %v1130_v21 = vadd.f32 %v1129_v43, %v6169_v8  ;;  %v10160_v22 = vld [vmem:[#allocation75_spill] sm:$0xff] }
 0x221   : > { %v1132_v37 = vadd.f32 %v1131_v16, %v6188_v27  ;;  %v2704_v34 = vsel %vm1954_vm4, %v2699_v10, %v2703_v24  ;;  %v3255_v42 = vadd.f32 %v3189_v9, %v3111_v4  ;;  %v3257_v52 = vadd.f32 %v3191_v48, %v3113_v62 }
 0x222   : > { %v2708_v20 = vsel %vm1954_vm4, %v2703_v24, %v2707_v11  ;;  %v4245_v63 = vpack.c.bf16 %v4185_v60, %v4183_v53  ;;  %v2889_v55 = vadd.f32 %v2704_v34, %v2155_v49  ;;  %v1231_v54 = vmax.f32 %v1128_v29, 0.0  ;;  %v6977_v34 = vld [vmem:[#allocation2 + $0xc8] sm:$0xff] }
 0x223   : > { %v2891_v47 = vadd.f32 %v2708_v20, %v2157_v57  ;;  %v3643_v19 = vmul.f32 %v10159_v36, %v3255_v42  ;;  %v6952_v43 = vmul.f32 %v10160_v22, %v3257_v52  ;;  %v1232_v16 = vmax.f32 %v1130_v21, 0.0  ;;  %v6957_v57 = vld [vmem:[#allocation2 + $0xb8] sm:$0xff] }
 0x224   : > { %v1233_v27 = vmax.f32 %v1132_v37, 0.0  ;;  %v4350_v3 = vshrl.u32 %v4245_v63, 16  ;;  %v4353_v28 = vshll.u32 %v4245_v63, 16  ;;  %v1295_v10 = vmin.f32 %v1231_v54, 6.0 }
 0x225   : > { %v1477_v7 = vmul.f32 %v10137_v51, %v6624_v31  ;;  %v3782_v24 = vrot.slane %v3643_v19, 2  ;;  %v9860_v9 = vrot.slane %v6952_v43, 2  ;;  %v1296_v53 = vmin.f32 %v1232_v16, 6.0 }
 0x226   : > { %v1297_v49 = vmin.f32 %v1233_v27, 6.0  ;;  %v4352_v48 = vrot.slane %v4350_v3, 3  ;;  %v4355_v4 = vrot.slane %v4353_v28, 4  ;;  %1359 = vst.msk [vmem:[#allocation2 + $0x158] sm:$0xff] %vm442_vm3, %v1295_v10  ;;  %v1479_v52 = vmul.f32 %v10137_v51, %v6641_v50 }
 0x227   : > { %v1559_v63 = vmul.f32 %v10141_v2, %v6664_v13  ;;  %v10161_v62 = vrot.slane %v6822_v58, 2  ;;  %v3787_v27 = vsel %vm3767_vm6, %v3782_v24, %v9860_v9  ;;  %1360 = vst [vmem:[#allocation2 + $0x160] sm:$0xff] %v1296_v53  ;;  %v1561_v28 = vmul.f32 %v10141_v2, %v6819_v46 }
 0x228   : > { %1361 = vst.msk [vmem:[#allocation2 + $0x168] sm:$0xff] %vm442_vm3, %v1297_v49  ;;  %v1707_v60 = vmul.f32 %v6204_v40, %v6852_v5  ;;  %v6975_v29 = vor.u32 %v4355_v4, %v4352_v48  ;;  %v3974_v37 = vadd.f32 %v3787_v27, %v2891_v47  ;;  %v1709_v42 = vmul.f32 %v6204_v40, %v6957_v57  ;;  %v10163_v4 = vld [vmem:[#allocation78_spill] sm:$0xff] }
 0x229   : > { %v3783_v31 = vsel %vm3767_vm6, %v10161_v62, %v3782_v24  ;;  %v1625_v58 = vadd.f32 %v1559_v63, %v1477_v7  ;;  %v1627_v20 = vadd.f32 %v1561_v28, %v1479_v52  ;;  %v2300_v54 = vmul.f32 %v10143_v23, %v6641_v50 }
 0x22a   : > { %v3972_v21 = vadd.f32 %v3783_v31, %v2889_v55  ;;  %v2302_v36 = vmul.f32 %v10143_v23, %v6664_v13  ;;  %v4357_v19 = vsel %vm4305_vm7, %v6766_v14, %v6975_v29  ;;  %v4052_v7 = vadd.f32 %v10142_v30, %v3974_v37  ;;  %v10162_v14 = vld [vmem:[#allocation77_spill] sm:$0xff]  ;;  %v1135_v37 = vpop.f32.mrf.mxu1 }
 0x22b   : > { %v1773_v47 = vadd.f32 %v1707_v60, %v1625_v58  ;;  %5385 = vmatprep.mubr.msk.bf16.mxu0 %vm442_vm3, %v4357_v19  ;;  %v1775_v22 = vadd.f32 %v1709_v42, %v1627_v20  ;;  %v2372_v16 = vmul.f32 %v6201_v38, %v6819_v46  ;;  %v2374_v3 = vmul.f32 %v6201_v38, %v6852_v5 }
 0x22c   : > { %v4050_v55 = vadd.f32 %v10142_v30, %v3972_v21  ;;  %v2510_v10 = vmul.f32 %v6265_v17, %v6957_v57  ;;  %v4118_v53 = vmax.f32 %v4052_v7, 0.0  ;;  %v2512_v48 = vmul.f32 %v6265_v17, %v6977_v34  ;;  %v10166_v7 = vld [vmem:[#allocation74_spill] sm:$0xff] }
 0x22d   : > { %v2160_v49 = vmul.f32 %v10162_v14, %v1773_v47  ;;  %v2162_v52 = vmul.f32 %v10163_v4, %v1775_v22  ;;  %v2436_v63 = vadd.f32 %v2372_v16, %v2300_v54  ;;  %v2438_v62 = vadd.f32 %v2374_v3, %v2302_v36  ;;  %v5620_v4 = vld [vmem:[#allocation2 + $0x60] sm:$0xff] }
 0x22e   : > { %v4116_v24 = vmax.f32 %v4050_v55, 0.0  ;;  %v2972_v31 = vmul.f32 %v10146_v59, %v6641_v50  ;;  %v4184_v28 = vmin.f32 %v4118_v53, 6.0  ;;  %v2974_v60 = vmul.f32 %v10146_v59, %v6664_v13  ;;  %v10164_v55 = vld [vmem:[#allocation80_spill] sm:$0xff] }
 0x22f   : > { %v3050_v21 = vmul.f32 %v6216_v56, %v6819_v46  ;;  %v2574_v58 = vadd.f32 %v2510_v10, %v2436_v63  ;;  %v7007_v20 = vadd.f32 %v2512_v48, %v2438_v62  ;;  %v3052_v42 = vmul.f32 %v6216_v56, %v6852_v5 }
 0x230   : > { %v4182_v27 = vmin.f32 %v4116_v24, 6.0  ;;  %v3194_v54 = vmul.f32 %v6662_v32, %v6957_v57  ;;  %v3196_v19 = vmul.f32 %v6662_v32, %v6977_v34  ;;  %v10165_v13 = vrot.slane %v10164_v55, 7 }
 0x231   : > { %v3116_v50 = vadd.f32 %v3050_v21, %v2972_v31  ;;  %v10167_v47 = vrot.slane %v10166_v7, 7  ;;  %v2713_v16 = vrot.slane %v2574_v58, 1  ;;  %v9859_v3 = vrot.slane %v7007_v20, 1 }
 0x232   : > { %v4244_v36 = vpack.c.bf16 %v4184_v28, %v4182_v27  ;;  %v3118_v10 = vadd.f32 %v3052_v42, %v2974_v60  ;;  %v1136_v24 = vadd.f32 %v1135_v37, %v6169_v8  ;;  %v1476_v63 = vmul.f32 %v5620_v4, %v10148_v25  ;;  %v1838_v42 = vld [vmem:[%s10056_s1 + $0x60] sm:$0xff] }
 0x233   : > { %v3472_v22 = vsel %vm3442_vm5, %v10167_v47, %v10165_v13  ;;  %v3260_v48 = vadd.f32 %v3194_v54, %v3116_v50  ;;  %v10168_v32 = vrot.slane %v6870_v41, 1  ;;  %v2718_v31 = vsel %vm1954_vm4, %v2713_v16, %v9859_v3  ;;  %v10169_v54 = vld [vmem:[#allocation79_spill] sm:$0xff] }
 0x234   : > { %v4341_v53 = vshrl.u32 %v4244_v36, 16  ;;  %v4344_v14 = vshll.u32 %v4244_v36, 16  ;;  %v3262_v27 = vadd.f32 %v3196_v19, %v3118_v10  ;;  %v1234_v28 = vmax.f32 %v1136_v24, 0.0  ;;  %v7040_v19 = vld [vmem:[%s10056_s1 + $0x70] sm:$0xff] }
 0x235   : > { %v2714_v62 = vsel %vm1954_vm4, %v10168_v32, %v2713_v16  ;;  %v2896_v37 = vadd.f32 %v2718_v31, %v2162_v52  ;;  %v3648_v36 = vmul.f32 %v10169_v54, %v3260_v48  ;;  %v1478_v13 = vmul.f32 %v10148_v25, %v6582_v6  ;;  %v10170_v6 = vld [vmem:[#allocation88_spill] sm:$0xff] }
 0x236   : > { %v4343_v21 = vrot.slane %v4341_v53, 3  ;;  %v4346_v60 = vrot.slane %v4344_v14, 4  ;;  %v2894_v58 = vadd.f32 %v2714_v62, %v2160_v49  ;;  %v7033_v50 = vmul.f32 %v3472_v22, %v3262_v27  ;;  %v10172_v27 = vld [vmem:[#allocation59_spill] sm:$0xff] }
 0x237   : > { %v1298_v41 = vmin.f32 %v1234_v28, 6.0  ;;  %v1558_v49 = vmul.f32 %v10149_v15, %v6609_v44  ;;  %v1560_v52 = vmul.f32 %v10149_v15, %v10152_v35  ;;  %v1706_v47 = vmul.f32 %v6284_v12, %v10156_v1 }
 0x238   : > { %v7042_v7 = vor.u32 %v4346_v60, %v4343_v21  ;;  %v3792_v22 = vrot.slane %v3648_v36, 2  ;;  %v9858_v16 = vrot.slane %v7033_v50, 2  ;;  %v1708_v10 = vmul.f32 %v6284_v12, %v10170_v6  ;;  %v5621_v60 = vld [vmem:[#allocation2 + $0x70] sm:$0xff] }
 0x239   : > { %1362 = vst [vmem:[#allocation2 + $0x170] sm:$0xff] %v1298_v41  ;;  %v1977_v24 = vrot.slane %v1838_v42, 1  ;;  %v1624_v14 = vadd.f32 %v1558_v49, %v1476_v63  ;;  %v1626_v48 = vadd.f32 %v1560_v52, %v1478_v13  ;;  %v9857_v4 = vrot.slane %v7040_v19, 1 }
 0x23a   : > { %v4348_v53 = vsel %vm4305_vm7, %v6884_v33, %v7042_v7  ;;  %v10171_v32 = vrot.slane %v6892_v0, 2  ;;  %v3797_v31 = vsel %vm3767_vm6, %v3792_v22, %v9858_v16  ;;  %v10173_v28 = vrot.slane %v10172_v27, 1 }
 0x23b   : > { %4787 = vmatmul.mubr.bf16.gmra.mxu0 %v4348_v53  ;;  %v2299_v33 = vmul.f32 %v5621_v60, %v10153_v45  ;;  %v3979_v42 = vadd.f32 %v3797_v31, %v2896_v37  ;;  %v1772_v54 = vadd.f32 %v1706_v47, %v1624_v14  ;;  %v1774_v36 = vadd.f32 %v1708_v10, %v1626_v48  ;;  %v7083_v31 = vld [vmem:[#allocation2 + $0x80] sm:$0xff] }
 0x23c   : > { %v3793_v62 = vsel %vm3767_vm6, %v10171_v32, %v3792_v22  ;;  %v1978_v21 = vsel %vm1954_vm4, %v10173_v28, %v1977_v24  ;;  %v1982_v0 = vsel %vm1954_vm4, %v1977_v24, %v9857_v4  ;;  %v2301_v41 = vmul.f32 %v10153_v45, %v6609_v44  ;;  %v1137_v22 = vpop.f32.mrf.mxu1  ;;  %v10174_v32 = vld [vmem:[#allocation55_spill] sm:$0xff]  ;;  %v10177_v4 = vld [vmem:[#allocation44_spill] sm:$0xff] }
 0x23d   : > { %v3977_v63 = vadd.f32 %v3793_v62, %v2894_v58  ;;  %v2371_v13 = vmul.f32 %v6305_v39, %v10152_v35  ;;  %v2373_v49 = vmul.f32 %v6305_v39, %v10156_v1  ;;  %v4057_v58 = vadd.f32 %v10121_v26, %v3979_v42 }
 0x23e   : > { %v2159_v37 = vmul.f32 %v1978_v21, %v1772_v54  ;;  %v2161_v47 = vmul.f32 %v1982_v0, %v1774_v36  ;;  %v2509_v24 = vmul.f32 %v6367_v18, %v10170_v6  ;;  %v2511_v44 = vmul.f32 %v6367_v18, %v6689_v61  ;;  %v5319_v54 = vld [vmem:[%s10056_s1 + $0x260] sm:$0xff] }
 0x23f   : > { %v4055_v52 = vadd.f32 %v10121_v26, %v3977_v63  ;;  %v2435_v10 = vadd.f32 %v2371_v13, %v2299_v33  ;;  %v2437_v53 = vadd.f32 %v2373_v49, %v2301_v41  ;;  %v4123_v48 = vmax.f32 %v4057_v58, 0.0  ;;  %v10175_v33 = vld [vmem:[#allocation58_spill] sm:$0xff]  ;;  %v10176_v41 = vld [vmem:[#allocation53_spill] sm:$0xff]  ;;  %v1139_v49 = vpop.f32.mrf.mxu1 }
 0x240   : > { %v2971_v62 = vmul.f32 %v5621_v60, %v10174_v32  ;;  %v2973_v27 = vmul.f32 %v7083_v31, %v10174_v32  ;;  %v3049_v63 = vmul.f32 %v10175_v33, %v10152_v35  ;;  %v3051_v42 = vmul.f32 %v10175_v33, %v10156_v1  ;;  %v7099_v60 = vld [vmem:[%s10056_s1 + $0x270] sm:$0xff] }
 0x241   : > { %v4121_v14 = vmax.f32 %v4055_v52, 0.0  ;;  %v2573_v28 = vadd.f32 %v2509_v24, %v2435_v10  ;;  %v7087_v21 = vadd.f32 %v2511_v44, %v2437_v53  ;;  %v4189_v0 = vmin.f32 %v4123_v48, 6.0 }
 0x242   : > { %v3193_v13 = vmul.f32 %v10176_v41, %v10170_v6  ;;  %v3195_v35 = vmul.f32 %v10176_v41, %v6689_v61  ;;  %v3115_v58 = vadd.f32 %v3049_v63, %v2971_v62  ;;  %v3117_v10 = vadd.f32 %v3051_v42, %v2973_v27  ;;  %v1141_v63 = vpop.f32.mrf.mxu1  ;;  %v10179_v42 = vld [vmem:[#allocation61_spill] sm:$0xff] }
 0x243   : > { %v4187_v36 = vmin.f32 %v4121_v14, 6.0  ;;  %v2711_v52 = vrot.slane %v2573_v28, 1  ;;  %v9863_v1 = vrot.slane %v7087_v21, 1  ;;  %v3465_v24 = vrot.slane %v5319_v54, 7 }
 0x244   : > { %v9864_v44 = vrot.slane %v7099_v60, 7  ;;  %v1138_v16 = vadd.f32 %v1137_v22, %v10177_v4  ;;  %v3259_v6 = vadd.f32 %v3193_v13, %v3115_v58  ;;  %v3261_v28 = vadd.f32 %v3195_v35, %v3117_v10  ;;  %v5623_v10 = vld [vmem:[#allocation2 + $0x88] sm:$0xff] }
 0x245   : > { %v4247_v53 = vpack.c.bf16 %v4189_v0, %v4187_v36  ;;  %v2712_v48 = vsel %vm1954_vm4, %v2707_v11, %v2711_v52  ;;  %v2716_v61 = vsel %vm1954_vm4, %v2711_v52, %v9863_v1  ;;  %v10180_v54 = vrot.slane %v10179_v42, 7  ;;  %v7143_v42 = vld [vmem:[%s10056_s1 + $0x98] sm:$0xff] }
 0x246   : > { %v2893_v62 = vadd.f32 %v2712_v48, %v2159_v37  ;;  %v2895_v27 = vadd.f32 %v2716_v61, %v2161_v47  ;;  %v3470_v22 = vsel %vm3442_vm5, %v3465_v24, %v9864_v44  ;;  %v1235_v11 = vmax.f32 %v1138_v16, 0.0 }
 0x247   : > { %v4368_v3 = vshrl.u32 %v4247_v53, 16  ;;  %v4371_v9 = vshll.u32 %v4247_v53, 16  ;;  %v3466_v36 = vsel %vm3442_vm5, %v10180_v54, %v3465_v24  ;;  %v1140_v0 = vadd.f32 %v1139_v49, %v6169_v8 }
 0x248   : > { %v3647_v13 = vmul.f32 %v3466_v36, %v3259_v6  ;;  %v7121_v35 = vmul.f32 %v3470_v22, %v3261_v28  ;;  %v1299_v58 = vmin.f32 %v1235_v11, 6.0  ;;  %v1142_v47 = vadd.f32 %v1141_v63, %v10177_v4  ;;  %v1843_v63 = vld [vmem:[%s10056_s1 + $0x88] sm:$0xff] }
 0x249   : > { %v4370_v14 = vrot.slane %v4368_v3, 3  ;;  %v4373_v52 = vrot.slane %v4371_v9, 4  ;;  %v1236_v37 = vmax.f32 %v1140_v0, 0.0  ;;  %v1481_v53 = vmul.f32 %v5623_v10, %v10137_v51  ;;  %v7130_v3 = vld [vmem:[#allocation2 + $0xd8] sm:$0xff]  ;;  %v7160_v10 = vld [vmem:[#allocation2 + $0xe8] sm:$0xff] }
 0x24a   : > { %v3790_v61 = vrot.slane %v3647_v13, 2  ;;  %v9862_v24 = vrot.slane %v7121_v35, 2  ;;  %v1483_v16 = vmul.f32 %v10137_v51, %v6819_v46  ;;  %1363 = vst.msk [vmem:[#allocation2 + $0x178] sm:$0xff] %vm442_vm3, %v1299_v58  ;;  %v1237_v49 = vmax.f32 %v1142_v47, 0.0 }
 0x24b   : > { %v7125_v48 = vor.u32 %v4373_v52, %v4370_v14  ;;  %v1300_v9 = vmin.f32 %v1236_v37, 6.0  ;;  %v1563_v6 = vmul.f32 %v10141_v2, %v6852_v5  ;;  %v1565_v28 = vmul.f32 %v10141_v2, %v6957_v57 }
 0x24c   : > { %v10181_v36 = vrot.slane %v6952_v43, 2  ;;  %v3795_v11 = vsel %vm3767_vm6, %v3790_v61, %v9862_v24  ;;  %v1711_v0 = vmul.f32 %v6204_v40, %v6977_v34  ;;  %v1301_v13 = vmin.f32 %v1237_v49, 6.0 }
 0x24d   : > { %v4375_v54 = vsel %vm4305_vm7, %v6975_v29, %v7125_v48  ;;  %v3978_v52 = vadd.f32 %v3795_v11, %v2895_v27  ;;  %1364 = vst [vmem:[#allocation2 + $0x180] sm:$0xff] %v1300_v9  ;;  %v1629_v58 = vadd.f32 %v1563_v6, %v1481_v53  ;;  %v1631_v37 = vadd.f32 %v1565_v28, %v1483_v16  ;;  %v10182_v16 = vld [vmem:[#allocation73_spill] sm:$0xff] }
 0x24e   : > { %v3791_v22 = vsel %vm3767_vm6, %v10181_v36, %v3790_v61  ;;  %5386 = vmatprep.mubr.msk.bf16.mxu0 %vm442_vm3, %v4375_v54  ;;  %v1713_v43 = vmul.f32 %v6204_v40, %v7130_v3  ;;  %v1987_v29 = vrot.slane %v1843_v63, 1  ;;  %v9861_v47 = vrot.slane %v7143_v42, 1  ;;  %1365 = vst.msk [vmem:[#allocation2 + $0x188] sm:$0xff] %vm442_vm3, %v1301_v13 }
 0x24f   : > { %v3976_v14 = vadd.f32 %v3791_v22, %v2893_v62  ;;  %v4056_v36 = vadd.f32 %v10142_v30, %v3978_v52  ;;  %v1777_v62 = vadd.f32 %v1711_v0, %v1629_v58  ;;  %v2304_v27 = vmul.f32 %v10143_v23, %v6819_v46 }
 0x250   : > { %v1779_v53 = vadd.f32 %v1713_v43, %v1631_v37  ;;  %v10183_v9 = vrot.slane %v10182_v16, 1  ;;  %v1992_v6 = vsel %vm1954_vm4, %v1987_v29, %v9861_v47  ;;  %v2306_v28 = vmul.f32 %v10143_v23, %v6852_v5 }
 0x251   : > { %v4054_v61 = vadd.f32 %v10142_v30, %v3976_v14  ;;  %v4122_v54 = vmax.f32 %v4056_v36, 0.0  ;;  %v2376_v11 = vmul.f32 %v6201_v38, %v6957_v57  ;;  %v2378_v14 = vmul.f32 %v6201_v38, %v6977_v34 }
 0x252   : > { %v1988_v49 = vsel %vm1954_vm4, %v10183_v9, %v1987_v29  ;;  %v2166_v0 = vmul.f32 %v1992_v6, %v1779_v53  ;;  %v2514_v52 = vmul.f32 %v6265_v17, %v7130_v3  ;;  %v2516_v13 = vmul.f32 %v6265_v17, %v7160_v10 }
 0x253   : > { %v4120_v63 = vmax.f32 %v4054_v61, 0.0  ;;  %v2164_v22 = vmul.f32 %v1988_v49, %v1777_v62  ;;  %v4188_v37 = vmin.f32 %v4122_v54, 6.0  ;;  %v2440_v43 = vadd.f32 %v2376_v11, %v2304_v27  ;;  %v5324_v61 = vld [vmem:[%s10056_s1 + $0x288] sm:$0xff]  ;;  %v7197_v27 = vld [vmem:[%s10056_s1 + $0x298] sm:$0xff] }
 0x254   : > { %v2976_v29 = vmul.f32 %v10146_v59, %v6819_v46  ;;  %v2442_v36 = vadd.f32 %v2378_v14, %v2306_v28  ;;  %v2978_v62 = vmul.f32 %v10146_v59, %v6852_v5  ;;  %v3054_v53 = vmul.f32 %v6216_v56, %v6957_v57  ;;  %v7202_v49 = vld [vmem:[%s9769_s7 + $0x18] ss:$0 sm:$0xff]  ;;  %v1145_v59 = vpop.f32.mrf.mxu1 }
 0x255   : > { %v4186_v58 = vmin.f32 %v4120_v63, 6.0  ;;  %v3056_v16 = vmul.f32 %v6216_v56, %v6977_v34  ;;  %v2578_v9 = vadd.f32 %v2514_v52, %v2440_v43  ;;  %10184 = vst [vmem:[#allocation47_spill] sm:$0xff] %v7202_v49  ;;  %v3198_v6 = vmul.f32 %v7202_v49, %v7130_v3 }
 0x256   : > { %v3200_v28 = vmul.f32 %v7202_v49, %v7160_v10  ;;  %v7208_v63 = vadd.f32 %v2516_v13, %v2442_v36  ;;  %v3120_v54 = vadd.f32 %v3054_v53, %v2976_v29  ;;  %v3475_v14 = vrot.slane %v5324_v61, 7 }
 0x257   : > { %v4246_v46 = vpack.c.bf16 %v4188_v37, %v4186_v58  ;;  %v3122_v11 = vadd.f32 %v3056_v16, %v2978_v62  ;;  %v2721_v58 = vrot.slane %v2578_v9, 1  ;;  %v9871_v52 = vrot.slane %v7197_v27, 7 }
 0x258   : > { %v9870_v37 = vrot.slane %v7208_v63, 1  ;;  %v3264_v43 = vadd.f32 %v3198_v6, %v3120_v54  ;;  %v10185_v44 = vrot.slane %v10164_v55, 7  ;;  %v10186_v29 = vrot.slane %v7007_v20, 1  ;;  %v5625_v6 = vld [vmem:[#allocation2 + $0x90] sm:$0xff]  ;;  %v7233_v54 = vld [vmem:[#allocation2 + $0xa0] sm:$0xff] }
 0x259   : > { %v4359_v47 = vshrl.u32 %v4246_v46, 16  ;;  %v4362_v24 = vshll.u32 %v4246_v46, 16  ;;  %v3266_v1 = vadd.f32 %v3200_v28, %v3122_v11  ;;  %v3480_v36 = vsel %vm3442_vm5, %v3475_v14, %v9871_v52  ;;  %v1842_v11 = vld [vmem:[%s10056_s1 + $0x80] sm:$0xff] }
 0x25a   : > { %v3476_v56 = vsel %vm3442_vm5, %v10185_v44, %v3475_v14  ;;  %v2722_v61 = vsel %vm1954_vm4, %v10186_v29, %v2721_v58  ;;  %v2726_v62 = vsel %vm1954_vm4, %v2721_v58, %v9870_v37  ;;  %v1480_v20 = vmul.f32 %v7083_v31, %v10148_v25  ;;  %v7254_v14 = vld [vmem:[%s10056_s1 + $0x90] sm:$0xff] }
 0x25b   : > { %v4361_v49 = vrot.slane %v4359_v47, 3  ;;  %v4364_v13 = vrot.slane %v4362_v24, 4  ;;  %v2898_v53 = vadd.f32 %v2722_v61, %v2164_v22  ;;  %v3652_v16 = vmul.f32 %v3476_v56, %v3264_v43  ;;  %v7262_v29 = vld [vmem:[#allocation2 + $0xd0] sm:$0xff] }
 0x25c   : > { %v7224_v55 = vmul.f32 %v3480_v36, %v3266_v1  ;;  %v2900_v47 = vadd.f32 %v2726_v62, %v2166_v0  ;;  %v1146_v24 = vadd.f32 %v1145_v59, %v6169_v8  ;;  %v1482_v28 = vmul.f32 %v5625_v6, %v10148_v25  ;;  %v7240_v59 = vld [vmem:[#allocation2 + $0xb0] sm:$0xff]  ;;  %v7244_v0 = vld [vmem:[#allocation2 + $0xc0] sm:$0xff] }
 0x25d   : > { %v7226_v44 = vor.u32 %v4364_v13, %v4361_v49  ;;  %v3800_v46 = vrot.slane %v3652_v16, 2  ;;  %v1562_v56 = vmul.f32 %v7233_v54, %v10149_v15  ;;  %v1564_v31 = vmul.f32 %v7240_v59, %v10149_v15 }
 0x25e   : > { %v9873_v9 = vrot.slane %v7224_v55, 2  ;;  %v1238_v22 = vmax.f32 %v1146_v24, 0.0  ;;  %v1710_v49 = vmul.f32 %v7244_v0, %v6284_v12  ;;  %v1712_v61 = vmul.f32 %v7262_v29, %v6284_v12 }
 0x25f   : > { %v4366_v1 = vsel %vm4305_vm7, %v7042_v7, %v7226_v44  ;;  %v10187_v7 = vrot.slane %v7033_v50, 2  ;;  %v1628_v13 = vadd.f32 %v1562_v56, %v1480_v20  ;;  %v1630_v24 = vadd.f32 %v1564_v31, %v1482_v28 }
 0x260   : > { %4795 = vmatmul.mubr.bf16.gmra.mxu0 %v4366_v1  ;;  %v3805_v43 = vsel %vm3767_vm6, %v3800_v46, %v9873_v9  ;;  %v1302_v16 = vmin.f32 %v1238_v22, 6.0  ;;  %v1985_v1 = vrot.slane %v1842_v11, 1  ;;  %v9872_v50 = vrot.slane %v7254_v14, 1 }
 0x261   : > { %v3801_v58 = vsel %vm3767_vm6, %v10187_v7, %v3800_v46  ;;  %v3983_v62 = vadd.f32 %v3805_v43, %v2900_v47  ;;  %v1776_v37 = vadd.f32 %v1710_v49, %v1628_v13  ;;  %v2303_v7 = vmul.f32 %v5625_v6, %v10153_v45  ;;  %v1147_v49 = vpop.f32.mrf.mxu1 }
 0x262   : > { %v3981_v36 = vadd.f32 %v3801_v58, %v2898_v53  ;;  %1366 = vst [vmem:[#allocation2 + $0x190] sm:$0xff] %v1302_v16  ;;  %v1778_v20 = vadd.f32 %v1712_v61, %v1630_v24  ;;  %v2305_v56 = vmul.f32 %v7233_v54, %v10153_v45  ;;  %v10188_v53 = vrot.slane %v7040_v19, 1  ;;  %v5323_v24 = vld [vmem:[%s10056_s1 + $0x280] sm:$0xff] }
 0x263   : > { %v4061_v46 = vadd.f32 %v10121_v26, %v3983_v62  ;;  %v1990_v28 = vsel %vm1954_vm4, %v1985_v1, %v9872_v50  ;;  %v2375_v22 = vmul.f32 %v7240_v59, %v6305_v39  ;;  %v2377_v31 = vmul.f32 %v7244_v0, %v6305_v39  ;;  %v7284_v62 = vld [vmem:[#allocation2 + $0xe0] sm:$0xff] }
 0x264   : > { %v4059_v52 = vadd.f32 %v10121_v26, %v3981_v36  ;;  %v1986_v47 = vsel %vm1954_vm4, %v10188_v53, %v1985_v1  ;;  %v2165_v13 = vmul.f32 %v1990_v28, %v1778_v20  ;;  %v2513_v19 = vmul.f32 %v7262_v29, %v6367_v18  ;;  %v1149_v28 = vpop.f32.mrf.mxu1 }
 0x265   : > { %v4127_v58 = vmax.f32 %v4061_v46, 0.0  ;;  %v2163_v43 = vmul.f32 %v1986_v47, %v1776_v37  ;;  %v2439_v61 = vadd.f32 %v2375_v22, %v2303_v7  ;;  %v2441_v36 = vadd.f32 %v2377_v31, %v2305_v56  ;;  %v7303_v47 = vld [vmem:[%s10056_s1 + $0x290] sm:$0xff] }
 0x266   : > { %v4125_v11 = vmax.f32 %v4059_v52, 0.0  ;;  %v2515_v16 = vmul.f32 %v7284_v62, %v6367_v18  ;;  %v2975_v52 = vmul.f32 %v5625_v6, %v10174_v32  ;;  %v2977_v37 = vmul.f32 %v7233_v54, %v10174_v32 }
 0x267   : > { %v4193_v53 = vmin.f32 %v4127_v58, 6.0  ;;  %v2577_v7 = vadd.f32 %v2513_v19, %v2439_v61  ;;  %v3053_v20 = vmul.f32 %v7240_v59, %v10175_v33  ;;  %v3055_v56 = vmul.f32 %v7244_v0, %v10175_v33 }
 0x268   : > { %v4191_v1 = vmin.f32 %v4125_v11, 6.0  ;;  %v7294_v46 = vadd.f32 %v2515_v16, %v2441_v36  ;;  %v3197_v6 = vmul.f32 %v7262_v29, %v10176_v41  ;;  %v3199_v31 = vmul.f32 %v7284_v62, %v10176_v41 }
 0x269   : > { %v3473_v11 = vrot.slane %v5323_v24, 7  ;;  %v2719_v58 = vrot.slane %v2577_v7, 1  ;;  %v3119_v36 = vadd.f32 %v3053_v20, %v2975_v52  ;;  %v3121_v19 = vadd.f32 %v3055_v56, %v2977_v37  ;;  %v1151_v52 = vpop.f32.mrf.mxu1 }
 0x26a   : > { %10189 = vst [vmem:[#allocation56_spill] sm:$0xff] %v7294_v46  ;;  %v4249_v22 = vpack.c.bf16 %v4193_v53, %v4191_v1  ;;  %v9882_v61 = vrot.slane %v7294_v46, 1  ;;  %v10190_v9 = vrot.slane %v7099_v60, 7  ;;  %v9881_v1 = vrot.slane %v7303_v47, 7 }
 0x26b   : > { %v10191_v53 = vrot.slane %v7087_v21, 1  ;;  %v3263_v24 = vadd.f32 %v3197_v6, %v3119_v36  ;;  %v3265_v7 = vadd.f32 %v3199_v31, %v3121_v19  ;;  %v1148_v21 = vadd.f32 %v1147_v49, %v10177_v4 }
 0x26c   : > { %v4386_v16 = vshrl.u32 %v4249_v22, 16  ;;  %v4389_v50 = vshll.u32 %v4249_v22, 16  ;;  %v3474_v33 = vsel %vm3442_vm5, %v10190_v9, %v3473_v11  ;;  %v2724_v41 = vsel %vm1954_vm4, %v2719_v58, %v9882_v61 }
 0x26d   : > { %v2720_v32 = vsel %vm1954_vm4, %v10191_v53, %v2719_v58  ;;  %v2899_v22 = vadd.f32 %v2724_v41, %v2165_v13  ;;  %v3478_v60 = vsel %vm3442_vm5, %v3473_v11, %v9881_v1  ;;  %v3651_v9 = vmul.f32 %v3474_v33, %v3263_v24  ;;  %v7334_v33 = vld [vmem:[#allocation2 + $0xf8] sm:$0xff] }
 0x26e   : > { %v4388_v37 = vrot.slane %v4386_v16, 3  ;;  %v4391_v20 = vrot.slane %v4389_v50, 4  ;;  %v2897_v56 = vadd.f32 %v2720_v32, %v2163_v43  ;;  %v1150_v53 = vadd.f32 %v1149_v28, %v6169_v8  ;;  %v7354_v24 = vld [vmem:[%s10056_s1 + $0xb8] sm:$0xff] }
 0x26f   : > { %v7327_v46 = vmul.f32 %v3478_v60, %v3265_v7  ;;  %v1152_v6 = vadd.f32 %v1151_v52, %v10177_v4  ;;  %v1485_v50 = vmul.f32 %v10137_v51, %v6852_v5  ;;  %v3798_v32 = vrot.slane %v3651_v9, 2 }
 0x270   : > { %v7325_v18 = vor.u32 %v4391_v20, %v4388_v37  ;;  %v1239_v43 = vmax.f32 %v1148_v21, 0.0  ;;  %v1240_v13 = vmax.f32 %v1150_v53, 0.0  ;;  %v1487_v31 = vmul.f32 %v10137_v51, %v6957_v57 }
 0x271   : > { %v9880_v28 = vrot.slane %v7327_v46, 2  ;;  %v1241_v11 = vmax.f32 %v1152_v6, 0.0  ;;  %v1567_v58 = vmul.f32 %v10141_v2, %v6977_v34  ;;  %v10192_v5 = vrot.slane %v7121_v35, 2 }
 0x272   : > { %v4393_v49 = vsel %vm4305_vm7, %v7125_v48, %v7325_v18  ;;  %v1303_v19 = vmin.f32 %v1239_v43, 6.0  ;;  %v1304_v16 = vmin.f32 %v1240_v13, 6.0  ;;  %v1569_v41 = vmul.f32 %v10141_v2, %v7130_v3  ;;  %v1847_v48 = vld [vmem:[%s10056_s1 + $0xa8] sm:$0xff] }
 0x273   : > { %5387 = vmatprep.mubr.msk.bf16.mxu0 %vm442_vm3, %v4393_v49  ;;  %v3799_v36 = vsel %vm3767_vm6, %v10192_v5, %v3798_v32  ;;  %v3803_v35 = vsel %vm3767_vm6, %v3798_v32, %v9880_v28  ;;  %v1305_v52 = vmin.f32 %v1241_v11, 6.0  ;;  %v1633_v37 = vadd.f32 %v1567_v58, %v1485_v50  ;;  %v7369_v50 = vld [vmem:[#allocation2 + $0x108] sm:$0xff] }
 0x274   : > { %v3980_v7 = vadd.f32 %v3799_v36, %v2897_v56  ;;  %v3982_v20 = vadd.f32 %v3803_v35, %v2899_v22  ;;  %1367 = vst.msk [vmem:[#allocation2 + $0x198] sm:$0xff] %vm442_vm3, %v1303_v19  ;;  %1368 = vst [vmem:[#allocation2 + $0x1a0] sm:$0xff] %v1304_v16  ;;  %v1635_v60 = vadd.f32 %v1569_v41, %v1487_v31  ;;  %v1995_v6 = vrot.slane %v1847_v48, 1 }
 0x275   : > { %v1715_v9 = vmul.f32 %v6204_v40, %v7160_v10  ;;  %v1717_v21 = vmul.f32 %v6204_v40, %v7334_v33  ;;  %1369 = vst.msk [vmem:[#allocation2 + $0x1a8] sm:$0xff] %vm442_vm3, %v1305_v52  ;;  %v9879_v56 = vrot.slane %v7354_v24, 1  ;;  %v2308_v22 = vmul.f32 %v10143_v23, %v6957_v57 }
 0x276   : > { %v4058_v53 = vadd.f32 %v10142_v30, %v3980_v7  ;;  %v4060_v32 = vadd.f32 %v10142_v30, %v3982_v20  ;;  %v2310_v31 = vmul.f32 %v10143_v23, %v6977_v34  ;;  %v10193_v11 = vrot.slane %v7143_v42, 1 }
 0x277   : > { %v1781_v43 = vadd.f32 %v1715_v9, %v1633_v37  ;;  %v1783_v13 = vadd.f32 %v1717_v21, %v1635_v60  ;;  %v2000_v5 = vsel %vm1954_vm4, %v1995_v6, %v9879_v56  ;;  %v2380_v36 = vmul.f32 %v6201_v38, %v7130_v3  ;;  %v5328_v37 = vld [vmem:[%s10056_s1 + $0x2a8] sm:$0xff] }
 0x278   : > { %v4124_v49 = vmax.f32 %v4058_v53, 0.0  ;;  %v1996_v58 = vsel %vm1954_vm4, %v10193_v11, %v1995_v6  ;;  %v4126_v19 = vmax.f32 %v4060_v32, 0.0  ;;  %v2382_v48 = vmul.f32 %v6201_v38, %v7160_v10  ;;  %v10194_v9 = vld [vmem:[#allocation42_spill] sm:$0xff]  ;;  %v7398_v6 = vld [vmem:[%s10056_s1 + $0x2b8] sm:$0xff] }
 0x279   : > { %v2168_v16 = vmul.f32 %v1996_v58, %v1781_v43  ;;  %v2170_v41 = vmul.f32 %v2000_v5, %v1783_v13  ;;  %v2444_v7 = vadd.f32 %v2380_v36, %v2308_v22  ;;  %v2518_v42 = vmul.f32 %v6265_v17, %v7334_v33  ;;  %v10195_v32 = vld [vmem:[#allocation45_spill] sm:$0xff] }
 0x27a   : > { %v4190_v35 = vmin.f32 %v4124_v49, 6.0  ;;  %v2520_v52 = vmul.f32 %v6265_v17, %v7369_v50  ;;  %v4192_v20 = vmin.f32 %v4126_v19, 6.0  ;;  %v2446_v60 = vadd.f32 %v2382_v48, %v2310_v31  ;;  %v10196_v31 = vld [vmem:[#allocation47_spill] sm:$0xff] }
 0x27b   : > { %v2980_v21 = vmul.f32 %v10194_v9, %v6957_v57  ;;  %v2982_v53 = vmul.f32 %v10194_v9, %v6977_v34  ;;  %v2582_v22 = vadd.f32 %v2518_v42, %v2444_v7  ;;  %v3058_v43 = vmul.f32 %v10195_v32, %v7130_v3 }
 0x27c   : > { %v3060_v13 = vmul.f32 %v10195_v32, %v7160_v10  ;;  %v3202_v49 = vmul.f32 %v10196_v31, %v7334_v33  ;;  %v4248_v11 = vpack.c.bf16 %v4192_v20, %v4190_v35  ;;  %v7406_v57 = vadd.f32 %v2520_v52, %v2446_v60  ;;  %v1155_v35 = vpop.f32.mrf.mxu1 }
 0x27d   : > { %v3204_v58 = vmul.f32 %v10196_v31, %v7369_v50  ;;  %v3483_v5 = vrot.slane %v5328_v37, 7  ;;  %v2729_v36 = vrot.slane %v2582_v22, 1  ;;  %v3124_v19 = vadd.f32 %v3058_v43, %v2980_v21 }
 0x27e   : > { %v3126_v48 = vadd.f32 %v3060_v13, %v2982_v53  ;;  %v9886_v7 = vrot.slane %v7398_v6, 7  ;;  %v4377_v42 = vshrl.u32 %v4248_v11, 16  ;;  %v4380_v56 = vshll.u32 %v4248_v11, 16 }
 0x27f   : > { %v9885_v28 = vrot.slane %v7406_v57, 1  ;;  %v10197_v1 = vrot.slane %v7197_v27, 7  ;;  %v10198_v52 = vrot.slane %v7208_v63, 1  ;;  %v3268_v60 = vadd.f32 %v3202_v49, %v3124_v19 }
 0x280   : > { %v3270_v37 = vadd.f32 %v3204_v58, %v3126_v48  ;;  %v3488_v21 = vsel %vm3442_vm5, %v3483_v5, %v9886_v7  ;;  %v4379_v53 = vrot.slane %v4377_v42, 3  ;;  %v4382_v22 = vrot.slane %v4380_v56, 4  ;;  %v7446_v42 = vld [vmem:[#allocation2 + $0xf0] sm:$0xff] }
 0x281   : > { %v3484_v61 = vsel %vm3442_vm5, %v10197_v1, %v3483_v5  ;;  %v2730_v20 = vsel %vm1954_vm4, %v10198_v52, %v2729_v36  ;;  %v2734_v43 = vsel %vm1954_vm4, %v2729_v36, %v9885_v28  ;;  %v1156_v63 = vadd.f32 %v1155_v35, %v6169_v8  ;;  %v1846_v36 = vld [vmem:[%s10056_s1 + $0xa0] sm:$0xff] }
 0x282   : > { %v2902_v27 = vadd.f32 %v2730_v20, %v2168_v16  ;;  %v2904_v13 = vadd.f32 %v2734_v43, %v2170_v41  ;;  %v3656_v1 = vmul.f32 %v3484_v61, %v3268_v60  ;;  %v7424_v11 = vmul.f32 %v3488_v21, %v3270_v37  ;;  %v7453_v20 = vld [vmem:[%s10056_s1 + $0xb0] sm:$0xff] }
 0x283   : > { %v7427_v52 = vor.u32 %v4382_v22, %v4379_v53  ;;  %v1484_v49 = vmul.f32 %v7233_v54, %v10148_v25  ;;  %v1486_v58 = vmul.f32 %v7240_v59, %v10148_v25  ;;  %v1566_v56 = vmul.f32 %v7244_v0, %v10149_v15  ;;  %10199 = vst [vmem:[#allocation60_spill] sm:$0xff] %v7453_v20 }
 0x284   : > { %v3808_v5 = vrot.slane %v3656_v1, 2  ;;  %v9884_v16 = vrot.slane %v7424_v11, 2  ;;  %v1242_v41 = vmax.f32 %v1156_v63, 0.0  ;;  %v1568_v61 = vmul.f32 %v7262_v29, %v10149_v15 }
 0x285   : > { %v4384_v54 = vsel %vm4305_vm7, %v7226_v44, %v7427_v52  ;;  %v1632_v19 = vadd.f32 %v1566_v56, %v1484_v49  ;;  %v1714_v48 = vmul.f32 %v7284_v62, %v6284_v12  ;;  %v1716_v35 = vmul.f32 %v7446_v42, %v6284_v12 }
 0x286   : > { %4803 = vmatmul.mubr.bf16.gmra.mxu0 %v4384_v54  ;;  %v10200_v60 = vrot.slane %v7224_v55, 2  ;;  %v3813_v44 = vsel %vm3767_vm6, %v3808_v5, %v9884_v16  ;;  %v1306_v21 = vmin.f32 %v1242_v41, 6.0  ;;  %v1634_v53 = vadd.f32 %v1568_v61, %v1486_v58 }
 0x287   : > { %v3987_v43 = vadd.f32 %v3813_v44, %v2904_v13  ;;  %v1780_v1 = vadd.f32 %v1714_v48, %v1632_v19  ;;  %v1993_v63 = vrot.slane %v1846_v36, 1  ;;  %v9883_v56 = vrot.slane %v7453_v20, 1  ;;  %v10202_v19 = vld [vmem:[#allocation57_spill] sm:$0xff] }
 0x288   : > { %v3809_v37 = vsel %vm3767_vm6, %v10200_v60, %v3808_v5  ;;  %1370 = vst [vmem:[#allocation2 + $0x1b0] sm:$0xff] %v1306_v21  ;;  %v1782_v49 = vadd.f32 %v1716_v35, %v1634_v53  ;;  %v2307_v54 = vmul.f32 %v7240_v59, %v10153_v45  ;;  %v2309_v55 = vmul.f32 %v7244_v0, %v10153_v45  ;;  %v1157_v35 = vpop.f32.mrf.mxu1 }
 0x289   : > { %v3985_v22 = vadd.f32 %v3809_v37, %v2902_v27  ;;  %v4065_v5 = vadd.f32 %v10121_v26, %v3987_v43  ;;  %v10201_v58 = vrot.slane %v7254_v14, 1  ;;  %v2379_v13 = vmul.f32 %v7262_v29, %v6305_v39 }
 0x28a   : > { %v1998_v41 = vsel %vm1954_vm4, %v1993_v63, %v9883_v56  ;;  %v2381_v36 = vmul.f32 %v7284_v62, %v6305_v39  ;;  %v2517_v48 = vmul.f32 %v7446_v42, %v10202_v19  ;;  %v10206_v39 = vld [vmem:[#allocation56_spill] sm:$0xff] }
 0x28b   : > { %v4063_v60 = vadd.f32 %v10121_v26, %v3985_v22  ;;  %v1994_v27 = vsel %vm1954_vm4, %v10201_v58, %v1993_v63  ;;  %v4131_v44 = vmax.f32 %v4065_v5, 0.0  ;;  %v2169_v14 = vmul.f32 %v1998_v41, %v1782_v49  ;;  %v7480_v22 = vld [vmem:[#allocation2 + $0x100] sm:$0xff]  ;;  %v10203_v58 = vld [vmem:[#allocation55_spill] sm:$0xff] }
 0x28c   : > { %v2167_v61 = vmul.f32 %v1994_v27, %v1780_v1  ;;  %v2443_v21 = vadd.f32 %v2379_v13, %v2307_v54  ;;  %v2445_v53 = vadd.f32 %v2381_v36, %v2309_v55  ;;  %v2519_v43 = vmul.f32 %v7480_v22, %v10202_v19  ;;  %v5327_v27 = vld [vmem:[%s10056_s1 + $0x2a0] sm:$0xff]  ;;  %v7496_v13 = vld [vmem:[%s10056_s1 + $0x2b0] sm:$0xff] }
 0x28d   : > { %v4129_v37 = vmax.f32 %v4063_v60, 0.0  ;;  %v2979_v1 = vmul.f32 %v7240_v59, %v10203_v58  ;;  %v2981_v63 = vmul.f32 %v7244_v0, %v10203_v58  ;;  %v4197_v5 = vmin.f32 %v4131_v44, 6.0  ;;  %v10204_v54 = vld [vmem:[#allocation58_spill] sm:$0xff]  ;;  %v7505_v36 = vld [vmem:[%s9769_s7 + $0x10] ss:$0 sm:$0xff]  ;;  %v1159_v44 = vpop.f32.mrf.mxu1 }
 0x28e   : > { %v2581_v49 = vadd.f32 %v2517_v48, %v2443_v21  ;;  %v3057_v55 = vmul.f32 %v7262_v29, %v10204_v54  ;;  %v7498_v41 = vadd.f32 %v2519_v43, %v2445_v53  ;;  %v3059_v59 = vmul.f32 %v7284_v62, %v10204_v54  ;;  %10205 = vst [vmem:[#allocation62_spill] sm:$0xff] %v7505_v36 }
 0x28f   : > { %v4195_v60 = vmin.f32 %v4129_v37, 6.0  ;;  %v3201_v48 = vmul.f32 %v7505_v36, %v7446_v42  ;;  %v3203_v37 = vmul.f32 %v7505_v36, %v7480_v22  ;;  %v3481_v53 = vrot.slane %v5327_v27, 7 }
 0x290   : > { %v2727_v56 = vrot.slane %v2581_v49, 1  ;;  %v3123_v16 = vadd.f32 %v3057_v55, %v2979_v1  ;;  %v9897_v43 = vrot.slane %v7498_v41, 1  ;;  %v3125_v28 = vadd.f32 %v3059_v59, %v2981_v63  ;;  %v1161_v49 = vpop.f32.mrf.mxu1 }
 0x291   : > { %v4251_v21 = vpack.c.bf16 %v4197_v5, %v4195_v60  ;;  %v9898_v7 = vrot.slane %v7496_v13, 7  ;;  %v1158_v54 = vadd.f32 %v1157_v35, %v10177_v4  ;;  %v10207_v20 = vrot.slane %v10206_v39, 1 }
 0x292   : > { %v3267_v45 = vadd.f32 %v3201_v48, %v3123_v16  ;;  %v2732_v60 = vsel %vm1954_vm4, %v2727_v56, %v9897_v43  ;;  %v3269_v27 = vadd.f32 %v3203_v37, %v3125_v28  ;;  %v10208_v5 = vrot.slane %v7303_v47, 7  ;;  %v7537_v37 = vld [vmem:[#allocation2 + $0x118] sm:$0xff]  ;;  %v1165_v43 = vpop.f32.mrf.mxu1 }
 0x293   : > { %v4404_v58 = vshrl.u32 %v4251_v21, 16  ;;  %v4407_v19 = vshll.u32 %v4251_v21, 16  ;;  %v2728_v26 = vsel %vm1954_vm4, %v10207_v20, %v2727_v56  ;;  %v2903_v59 = vadd.f32 %v2732_v60, %v2169_v14  ;;  %v7552_v60 = vld [vmem:[%s10056_s1 + $0xd8] sm:$0xff] }
 0x294   : > { %v2901_v1 = vadd.f32 %v2728_v26, %v2167_v61  ;;  %v3482_v63 = vsel %vm3442_vm5, %v10208_v5, %v3481_v53  ;;  %v3486_v39 = vsel %vm3442_vm5, %v3481_v53, %v9898_v7  ;;  %v1243_v48 = vmax.f32 %v1158_v54, 0.0  ;;  %v1851_v53 = vld [vmem:[%s10056_s1 + $0xc8] sm:$0xff] }
 0x295   : > { %v4406_v55 = vrot.slane %v4404_v58, 3  ;;  %v4409_v35 = vrot.slane %v4407_v19, 4  ;;  %v3655_v20 = vmul.f32 %v3482_v63, %v3267_v45  ;;  %v7526_v16 = vmul.f32 %v3486_v39, %v3269_v27 }
 0x296   : > { %v1160_v56 = vadd.f32 %v1159_v44, %v6169_v8  ;;  %v1162_v47 = vadd.f32 %v1161_v49, %v10177_v4  ;;  %v1489_v28 = vmul.f32 %v10137_v51, %v6977_v34  ;;  %v1491_v61 = vmul.f32 %v10137_v51, %v7130_v3 }
 0x297   : > { %v7529_v26 = vor.u32 %v4409_v35, %v4406_v55  ;;  %v3806_v19 = vrot.slane %v3655_v20, 2  ;;  %v9896_v14 = vrot.slane %v7526_v16, 2  ;;  %v1307_v58 = vmin.f32 %v1243_v48, 6.0 }
 0x298   : > { %v1244_v45 = vmax.f32 %v1160_v56, 0.0  ;;  %v1245_v44 = vmax.f32 %v1162_v47, 0.0  ;;  %v1571_v21 = vmul.f32 %v10141_v2, %v7160_v10  ;;  %v1573_v34 = vmul.f32 %v10141_v2, %v7334_v33 }
 0x299   : > { %v4411_v54 = vsel %vm4305_vm7, %v7325_v18, %v7529_v26  ;;  %v10209_v18 = vrot.slane %v7327_v46, 2  ;;  %v3811_v5 = vsel %vm3767_vm6, %v3806_v19, %v9896_v14  ;;  %1371 = vst.msk [vmem:[#allocation2 + $0x1b8] sm:$0xff] %vm442_vm3, %v1307_v58  ;;  %v1719_v49 = vmul.f32 %v6204_v40, %v7369_v50 }
 0x29a   : > { %5388 = vmatprep.mubr.msk.bf16.mxu0 %vm442_vm3, %v4411_v54  ;;  %v1308_v63 = vmin.f32 %v1244_v45, 6.0  ;;  %v3986_v35 = vadd.f32 %v3811_v5, %v2903_v59  ;;  %v1309_v39 = vmin.f32 %v1245_v44, 6.0  ;;  %v1637_v20 = vadd.f32 %v1571_v21, %v1489_v28  ;;  %v7567_v54 = vld [vmem:[#allocation2 + $0x128] sm:$0xff] }
 0x29b   : > { %v3807_v27 = vsel %vm3767_vm6, %v10209_v18, %v3806_v19  ;;  %v1639_v48 = vadd.f32 %v1573_v34, %v1491_v61  ;;  %v1721_v46 = vmul.f32 %v6204_v40, %v7537_v37  ;;  %v2003_v56 = vrot.slane %v1851_v53, 1 }
 0x29c   : > { %v3984_v55 = vadd.f32 %v3807_v27, %v2901_v1  ;;  %1372 = vst [vmem:[#allocation2 + $0x1c0] sm:$0xff] %v1308_v63  ;;  %v9895_v47 = vrot.slane %v7552_v60, 1  ;;  %v4064_v58 = vadd.f32 %v10142_v30, %v3986_v35  ;;  %1373 = vst.msk [vmem:[#allocation2 + $0x1c8] sm:$0xff] %vm442_vm3, %v1309_v39  ;;  %v1785_v1 = vadd.f32 %v1719_v49, %v1637_v20 }
 0x29d   : > { %v2312_v59 = vmul.f32 %v10143_v23, %v7130_v3  ;;  %v1787_v28 = vadd.f32 %v1721_v46, %v1639_v48  ;;  %v10210_v61 = vrot.slane %v7354_v24, 1  ;;  %v2314_v21 = vmul.f32 %v10143_v23, %v7160_v10  ;;  %v5332_v48 = vld [vmem:[%s10056_s1 + $0x2c8] sm:$0xff] }
 0x29e   : > { %v4062_v19 = vadd.f32 %v10142_v30, %v3984_v55  ;;  %v2008_v44 = vsel %vm1954_vm4, %v2003_v56, %v9895_v47  ;;  %v4130_v53 = vmax.f32 %v4064_v58, 0.0  ;;  %v2384_v27 = vmul.f32 %v6201_v38, %v7334_v33 }
 0x29f   : > { %v2004_v45 = vsel %vm1954_vm4, %v10210_v61, %v2003_v56  ;;  %v2174_v5 = vmul.f32 %v2008_v44, %v1787_v28  ;;  %v2386_v63 = vmul.f32 %v6201_v38, %v7369_v50  ;;  %v2522_v24 = vmul.f32 %v6265_v17, %v7537_v37 }
 0x2a0   : > { %v4128_v34 = vmax.f32 %v4062_v19, 0.0  ;;  %v2172_v18 = vmul.f32 %v2004_v45, %v1785_v1  ;;  %v2524_v49 = vmul.f32 %v6265_v17, %v7567_v54  ;;  %v4196_v35 = vmin.f32 %v4130_v53, 6.0  ;;  %v7604_v1 = vld [vmem:[%s10056_s1 + $0x2d8] sm:$0xff] }
 0x2a1   : > { %v2448_v39 = vadd.f32 %v2384_v27, %v2312_v59  ;;  %v2984_v20 = vmul.f32 %v10194_v9, %v7130_v3  ;;  %v2450_v46 = vadd.f32 %v2386_v63, %v2314_v21  ;;  %v2986_v56 = vmul.f32 %v10194_v9, %v7160_v10 }
 0x2a2   : > { %v4194_v55 = vmin.f32 %v4128_v34, 6.0  ;;  %v3062_v19 = vmul.f32 %v10195_v32, %v7334_v33  ;;  %v3064_v58 = vmul.f32 %v10195_v32, %v7369_v50  ;;  %v3206_v28 = vmul.f32 %v10196_v31, %v7537_v37 }
 0x2a3   : > { %v2586_v59 = vadd.f32 %v2522_v24, %v2448_v39  ;;  %v3208_v61 = vmul.f32 %v10196_v31, %v7567_v54  ;;  %v7610_v45 = vadd.f32 %v2524_v49, %v2450_v46  ;;  %v3491_v34 = vrot.slane %v5332_v48, 7 }
 0x2a4   : > { %v4250_v3 = vpack.c.bf16 %v4196_v35, %v4194_v55  ;;  %v3128_v44 = vadd.f32 %v3062_v19, %v2984_v20  ;;  %v3130_v21 = vadd.f32 %v3064_v58, %v2986_v56  ;;  %v9902_v47 = vrot.slane %v7604_v1, 7 }
 0x2a5   : > { %v2737_v63 = vrot.slane %v2586_v59, 1  ;;  %v9901_v14 = vrot.slane %v7610_v45, 1  ;;  %v10211_v35 = vrot.slane %v7398_v6, 7  ;;  %v10212_v20 = vrot.slane %v7406_v57, 1 }
 0x2a6   : > { %v4395_v53 = vshrl.u32 %v4250_v3, 16  ;;  %v4398_v27 = vshll.u32 %v4250_v3, 16  ;;  %v3272_v55 = vadd.f32 %v3206_v28, %v3128_v44  ;;  %v3274_v24 = vadd.f32 %v3208_v61, %v3130_v21 }
 0x2a7   : > { %v3492_v39 = vsel %vm3442_vm5, %v10211_v35, %v3491_v34  ;;  %v2738_v48 = vsel %vm1954_vm4, %v10212_v20, %v2737_v63  ;;  %v3496_v46 = vsel %vm3442_vm5, %v3491_v34, %v9902_v47  ;;  %v2742_v56 = vsel %vm1954_vm4, %v2737_v63, %v9901_v14 }
 0x2a8   : > { %v4397_v7 = vrot.slane %v4395_v53, 3  ;;  %v4400_v49 = vrot.slane %v4398_v27, 4  ;;  %v2906_v19 = vadd.f32 %v2738_v48, %v2172_v18  ;;  %v3660_v58 = vmul.f32 %v3492_v39, %v3272_v55  ;;  %v7651_v53 = vld [vmem:[%s10056_s1 + $0xd0] sm:$0xff] }
 0x2a9   : > { %v7626_v6 = vmul.f32 %v3496_v46, %v3274_v24  ;;  %v2908_v59 = vadd.f32 %v2742_v56, %v2174_v5  ;;  %v1166_v28 = vadd.f32 %v1165_v43, %v6169_v8  ;;  %v1488_v57 = vmul.f32 %v7244_v0, %v10148_v25  ;;  %v1850_v5 = vld [vmem:[%s10056_s1 + $0xc0] sm:$0xff]  ;;  %10213 = vst [vmem:[#allocation84_spill] sm:$0xff] %v7651_v53  ;;  %v7659_v24 = vld [vmem:[#allocation2 + $0x110] sm:$0xff] }
 0x2aa   : > { %v7628_v3 = vor.u32 %v4400_v49, %v4397_v7  ;;  %v3816_v61 = vrot.slane %v3660_v58, 2  ;;  %v1490_v21 = vmul.f32 %v7262_v29, %v10148_v25  ;;  %v1570_v18 = vmul.f32 %v7284_v62, %v10149_v15  ;;  %v10215_v58 = vld [vmem:[#allocation48_spill] sm:$0xff] }
 0x2ab   : > { %v9900_v44 = vrot.slane %v7626_v6, 2  ;;  %v1246_v34 = vmax.f32 %v1166_v28, 0.0  ;;  %v1572_v43 = vmul.f32 %v7446_v42, %v10149_v15  ;;  %v1718_v0 = vmul.f32 %v7480_v22, %v6284_v12 }
 0x2ac   : > { %v4402_v7 = vsel %vm4305_vm7, %v7427_v52, %v7628_v3  ;;  %v10214_v27 = vrot.slane %v7424_v11, 2  ;;  %v1636_v55 = vadd.f32 %v1570_v18, %v1488_v57  ;;  %v1720_v35 = vmul.f32 %v7659_v24, %v6284_v12 }
 0x2ad   : > { %4811 = vmatmul.mubr.bf16.gmra.mxu0 %v4402_v7  ;;  %v3821_v63 = vsel %vm3767_vm6, %v3816_v61, %v9900_v44  ;;  %v1310_v20 = vmin.f32 %v1246_v34, 6.0  ;;  %v1638_v48 = vadd.f32 %v1572_v43, %v1490_v21  ;;  %v2001_v56 = vrot.slane %v1850_v5, 1  ;;  %v10216_v7 = vld [vmem:[#allocation54_spill] sm:$0xff] }
 0x2ae   : > { %v3817_v52 = vsel %vm3767_vm6, %v10214_v27, %v3816_v61  ;;  %v3991_v49 = vadd.f32 %v3821_v63, %v2908_v59  ;;  %v1784_v46 = vadd.f32 %v1718_v0, %v1636_v55  ;;  %v9899_v11 = vrot.slane %v7651_v53, 1  ;;  %v10219_v43 = vld [vmem:[#allocation50_spill] sm:$0xff] }
 0x2af   : > { %v3989_v39 = vadd.f32 %v3817_v52, %v2906_v19  ;;  %v2311_v28 = vmul.f32 %v7262_v29, %v10215_v58  ;;  %1374 = vst [vmem:[#allocation2 + $0x1d0] sm:$0xff] %v1310_v20  ;;  %v1786_v61 = vadd.f32 %v1720_v35, %v1638_v48  ;;  %v2313_v18 = vmul.f32 %v7284_v62, %v10215_v58  ;;  %v10217_v19 = vld [vmem:[#allocation60_spill] sm:$0xff]  ;;  %v1167_v52 = vpop.f32.mrf.mxu1  ;;  %v10220_v48 = vld [vmem:[#allocation57_spill] sm:$0xff] }
 0x2b0   : > { %v4069_v57 = vadd.f32 %v10216_v7, %v3991_v49  ;;  %v10218_v59 = vrot.slane %v10217_v19, 1  ;;  %v2006_v34 = vsel %vm1954_vm4, %v2001_v56, %v9899_v11  ;;  %v2383_v0 = vmul.f32 %v7446_v42, %v10219_v43  ;;  %v5331_v11 = vld [vmem:[%s10056_s1 + $0x2c0] sm:$0xff] }
 0x2b1   : > { %v4067_v27 = vadd.f32 %v10216_v7, %v3989_v39  ;;  %v2385_v5 = vmul.f32 %v7480_v22, %v10219_v43  ;;  %v2173_v39 = vmul.f32 %v2006_v34, %v1786_v61  ;;  %v2521_v19 = vmul.f32 %v7659_v24, %v10220_v48 }
 0x2b2   : > { %v2002_v21 = vsel %vm1954_vm4, %v10218_v59, %v2001_v56  ;;  %v4135_v55 = vmax.f32 %v4069_v57, 0.0  ;;  %v2447_v49 = vadd.f32 %v2383_v0, %v2311_v28  ;;  %v7682_v59 = vld [vmem:[#allocation2 + $0x120] sm:$0xff]  ;;  %v7702_v0 = vld [vmem:[%s10056_s1 + $0x2d0] sm:$0xff] }
 0x2b3   : > { %v4133_v63 = vmax.f32 %v4067_v27, 0.0  ;;  %v2171_v35 = vmul.f32 %v2002_v21, %v1784_v46  ;;  %v2449_v20 = vadd.f32 %v2385_v5, %v2313_v18  ;;  %v2523_v56 = vmul.f32 %v7682_v59, %v10220_v48  ;;  %v10221_v27 = vld [vmem:[#allocation55_spill] sm:$0xff]  ;;  %v10223_v18 = vld [vmem:[#allocation58_spill] sm:$0xff]  ;;  %v1169_v5 = vpop.f32.mrf.mxu1 }
 0x2b4   : > { %v4201_v14 = vmin.f32 %v4135_v55, 6.0  ;;  %v2983_v46 = vmul.f32 %v7262_v29, %v10221_v27  ;;  %v2985_v28 = vmul.f32 %v7284_v62, %v10221_v27  ;;  %v2585_v57 = vadd.f32 %v2521_v19, %v2447_v49 }
 0x2b5   : > { %v4199_v44 = vmin.f32 %v4133_v63, 6.0  ;;  %v7693_v61 = vadd.f32 %v2523_v56, %v2449_v20  ;;  %v3061_v21 = vmul.f32 %v7446_v42, %v10223_v18  ;;  %v3063_v34 = vmul.f32 %v7480_v22, %v10223_v18 }
 0x2b6   : > { %v3205_v29 = vmul.f32 %v7659_v24, %v7505_v36  ;;  %v3207_v55 = vmul.f32 %v7682_v59, %v7505_v36  ;;  %v3489_v49 = vrot.slane %v5331_v11, 7  ;;  %v2735_v20 = vrot.slane %v2585_v57, 1 }
 0x2b7   : > { %10222 = vst [vmem:[#allocation76_spill] sm:$0xff] %v7693_v61  ;;  %v4253_v63 = vpack.c.bf16 %v4201_v14, %v4199_v44  ;;  %v9919_v19 = vrot.slane %v7693_v61, 1  ;;  %v3127_v56 = vadd.f32 %v3061_v21, %v2983_v46  ;;  %v3129_v47 = vadd.f32 %v3063_v34, %v2985_v28  ;;  %v1171_v46 = vpop.f32.mrf.mxu1 }
 0x2b8   : > { %v10224_v48 = vrot.slane %v7496_v13, 7  ;;  %v9918_v14 = vrot.slane %v7702_v0, 7  ;;  %v10225_v44 = vrot.slane %v7498_v41, 1  ;;  %v1168_v41 = vadd.f32 %v1167_v52, %v10177_v4 }
 0x2b9   : > { %v4422_v18 = vshrl.u32 %v4253_v63, 16  ;;  %v4425_v27 = vshll.u32 %v4253_v63, 16  ;;  %v2740_v11 = vsel %vm1954_vm4, %v2735_v20, %v9919_v19  ;;  %v3271_v57 = vadd.f32 %v3205_v29, %v3127_v56 }
 0x2ba   : > { %v3490_v43 = vsel %vm3442_vm5, %v10224_v48, %v3489_v49  ;;  %v2736_v53 = vsel %vm1954_vm4, %v10225_v44, %v2735_v20  ;;  %v3273_v36 = vadd.f32 %v3207_v55, %v3129_v47  ;;  %v2907_v63 = vadd.f32 %v2740_v11, %v2173_v39  ;;  %v7753_v11 = vld [vmem:[%s10056_s1 + $0xf8] sm:$0xff] }
 0x2bb   : > { %v4424_v28 = vrot.slane %v4422_v18, 3  ;;  %v4427_v21 = vrot.slane %v4425_v27, 4  ;;  %v2905_v34 = vadd.f32 %v2736_v53, %v2171_v35  ;;  %v3494_v13 = vsel %vm3442_vm5, %v3489_v49, %v9918_v14 }
 0x2bc   : > { %v3659_v48 = vmul.f32 %v3490_v43, %v3271_v57  ;;  %v1170_v44 = vadd.f32 %v1169_v5, %v6169_v8  ;;  %v7726_v61 = vmul.f32 %v3494_v13, %v3273_v36  ;;  %v1172_v47 = vadd.f32 %v1171_v46, %v10177_v4  ;;  %v7733_v43 = vld [vmem:[#allocation2 + $0x138] sm:$0xff] }
 0x2bd   : > { %v7724_v7 = vor.u32 %v4427_v21, %v4424_v28  ;;  %v1493_v27 = vmul.f32 %v10137_v51, %v7160_v10  ;;  %v1247_v35 = vmax.f32 %v1168_v41, 0.0  ;;  %v1495_v18 = vmul.f32 %v10137_v51, %v7334_v33 }
 0x2be   : > { %v3814_v53 = vrot.slane %v3659_v48, 2  ;;  %v1248_v39 = vmax.f32 %v1170_v44, 0.0  ;;  %v9917_v36 = vrot.slane %v7726_v61, 2  ;;  %v1249_v5 = vmax.f32 %v1172_v47, 0.0 }
 0x2bf   : > { %v4429_v52 = vsel %vm4305_vm7, %v7529_v26, %v7724_v7  ;;  %v1575_v29 = vmul.f32 %v10141_v2, %v7369_v50  ;;  %v10226_v10 = vrot.slane %v7526_v16, 2  ;;  %v1311_v49 = vmin.f32 %v1247_v35, 6.0  ;;  %v1855_v26 = vld [vmem:[%s10056_s1 + $0xe8] sm:$0xff] }
 0x2c0   : > { %5389 = vmatprep.mubr.msk.bf16.mxu0 %vm442_vm3, %v4429_v52  ;;  %v1312_v20 = vmin.f32 %v1248_v39, 6.0  ;;  %v1577_v56 = vmul.f32 %v10141_v2, %v7537_v37  ;;  %v3819_v16 = vsel %vm3767_vm6, %v3814_v53, %v9917_v36  ;;  %v1313_v46 = vmin.f32 %v1249_v5, 6.0 }
 0x2c1   : > { %v3815_v55 = vsel %vm3767_vm6, %v10226_v10, %v3814_v53  ;;  %v1641_v28 = vadd.f32 %v1575_v29, %v1493_v27  ;;  %v3990_v21 = vadd.f32 %v3819_v16, %v2907_v63  ;;  %1375 = vst.msk [vmem:[#allocation2 + $0x1d8] sm:$0xff] %vm442_vm3, %v1311_v49  ;;  %v1723_v48 = vmul.f32 %v6204_v40, %v7567_v54  ;;  %v7768_v27 = vld [vmem:[#allocation2 + $0x148] sm:$0xff] }
 0x2c2   : > { %v3988_v57 = vadd.f32 %v3815_v55, %v2905_v34  ;;  %1376 = vst [vmem:[#allocation2 + $0x1e0] sm:$0xff] %v1312_v20  ;;  %v1643_v13 = vadd.f32 %v1577_v56, %v1495_v18  ;;  %v1725_v41 = vmul.f32 %v6204_v40, %v7733_v43  ;;  %1377 = vst.msk [vmem:[#allocation2 + $0x1e8] sm:$0xff] %vm442_vm3, %v1313_v46  ;;  %v2011_v47 = vrot.slane %v1855_v26, 1 }
 0x2c3   : > { %v9912_v34 = vrot.slane %v7753_v11, 1  ;;  %v2316_v63 = vmul.f32 %v10143_v23, %v7334_v33  ;;  %v4068_v53 = vadd.f32 %v10142_v30, %v3990_v21  ;;  %v1789_v35 = vadd.f32 %v1723_v48, %v1641_v28  ;;  %v5336_v28 = vld [vmem:[%s10056_s1 + $0x2e8] sm:$0xff] }
 0x2c4   : > { %v4066_v44 = vadd.f32 %v10142_v30, %v3988_v57  ;;  %v1791_v39 = vadd.f32 %v1725_v41, %v1643_v13  ;;  %v2318_v18 = vmul.f32 %v10143_v23, %v7369_v50  ;;  %v10227_v5 = vrot.slane %v7552_v60, 1 }
 0x2c5   : > { %v2016_v10 = vsel %vm1954_vm4, %v2011_v47, %v9912_v34  ;;  %v2388_v55 = vmul.f32 %v6201_v38, %v7537_v37  ;;  %v4134_v49 = vmax.f32 %v4068_v53, 0.0  ;;  %v2390_v26 = vmul.f32 %v6201_v38, %v7567_v54 }
 0x2c6   : > { %v4132_v52 = vmax.f32 %v4066_v44, 0.0  ;;  %v2012_v29 = vsel %vm1954_vm4, %v10227_v5, %v2011_v47  ;;  %v2178_v56 = vmul.f32 %v2016_v10, %v1791_v39  ;;  %v2526_v60 = vmul.f32 %v6265_v17, %v7733_v43  ;;  %v7797_v44 = vld [vmem:[%s10056_s1 + $0x2f8] sm:$0xff] }
 0x2c7   : > { %v2176_v20 = vmul.f32 %v2012_v29, %v1789_v35  ;;  %v2452_v57 = vadd.f32 %v2388_v55, %v2316_v63  ;;  %v2528_v46 = vmul.f32 %v6265_v17, %v7768_v27  ;;  %v4200_v21 = vmin.f32 %v4134_v49, 6.0 }
 0x2c8   : > { %v4198_v16 = vmin.f32 %v4132_v52, 6.0  ;;  %v2454_v13 = vadd.f32 %v2390_v26, %v2318_v18  ;;  %v2988_v48 = vmul.f32 %v10194_v9, %v7334_v33  ;;  %v2990_v41 = vmul.f32 %v10194_v9, %v7369_v50 }
 0x2c9   : > { %v2590_v47 = vadd.f32 %v2526_v60, %v2452_v57  ;;  %v3066_v63 = vmul.f32 %v10195_v32, %v7537_v37  ;;  %v3068_v53 = vmul.f32 %v10195_v32, %v7567_v54  ;;  %v3210_v35 = vmul.f32 %v10196_v31, %v7733_v43 }
 0x2ca   : > { %v4252_v39 = vpack.c.bf16 %v4200_v21, %v4198_v16  ;;  %v7805_v33 = vadd.f32 %v2528_v46, %v2454_v13  ;;  %v3212_v18 = vmul.f32 %v10196_v31, %v7768_v27  ;;  %v3499_v52 = vrot.slane %v5336_v28, 7  ;;  %v1175_v16 = vpop.f32.mrf.mxu1 }
 0x2cb   : > { %v2745_v5 = vrot.slane %v2590_v47, 1  ;;  %v3132_v29 = vadd.f32 %v3066_v63, %v2988_v48  ;;  %v3134_v10 = vadd.f32 %v3068_v53, %v2990_v41  ;;  %v9916_v55 = vrot.slane %v7797_v44, 7 }
 0x2cc   : > { %v4413_v49 = vshrl.u32 %v4252_v39, 16  ;;  %v4416_v26 = vshll.u32 %v4252_v39, 16  ;;  %v9914_v57 = vrot.slane %v7805_v33, 1  ;;  %v10228_v60 = vrot.slane %v7604_v1, 7 }
 0x2cd   : > { %v10229_v46 = vrot.slane %v7610_v45, 1  ;;  %v3276_v31 = vadd.f32 %v3210_v35, %v3132_v29  ;;  %v3278_v28 = vadd.f32 %v3212_v18, %v3134_v10  ;;  %v3504_v13 = vsel %vm3442_vm5, %v3499_v52, %v9916_v55 }
 0x2ce   : > { %v3500_v34 = vsel %vm3442_vm5, %v10228_v60, %v3499_v52  ;;  %v4415_v48 = vrot.slane %v4413_v49, 3  ;;  %v4418_v41 = vrot.slane %v4416_v26, 4  ;;  %v2750_v47 = vsel %vm1954_vm4, %v2745_v5, %v9914_v57  ;;  %v7845_v26 = vld [vmem:[#allocation2 + $0x130] sm:$0xff] }
 0x2cf   : > { %v2746_v21 = vsel %vm1954_vm4, %v10229_v46, %v2745_v5  ;;  %v2912_v63 = vadd.f32 %v2750_v47, %v2178_v56  ;;  %v3664_v53 = vmul.f32 %v3500_v34, %v3276_v31  ;;  %v7823_v39 = vmul.f32 %v3504_v13, %v3278_v28  ;;  %v1854_v5 = vld [vmem:[%s10056_s1 + $0xe0] sm:$0xff]  ;;  %v7852_v46 = vld [vmem:[%s10056_s1 + $0xf0] sm:$0xff] }
 0x2d0   : > { %v2910_v1 = vadd.f32 %v2746_v21, %v2176_v20  ;;  %v1176_v45 = vadd.f32 %v1175_v16, %v6169_v8  ;;  %v7826_v60 = vor.u32 %v4418_v41, %v4415_v48  ;;  %v1492_v35 = vmul.f32 %v7284_v62, %v10148_v25  ;;  %10230 = vst [vmem:[#allocation81_spill] sm:$0xff] %v7852_v46  ;;  %v10237_v57 = vld [vmem:[#allocation55_spill] sm:$0xff] }
 0x2d1   : > { %v1494_v18 = vmul.f32 %v7446_v42, %v10148_v25  ;;  %v1574_v52 = vmul.f32 %v7480_v22, %v10149_v15  ;;  %v3824_v29 = vrot.slane %v3664_v53, 2  ;;  %v9913_v20 = vrot.slane %v7823_v39, 2 }
 0x2d2   : > { %v1250_v56 = vmax.f32 %v1176_v45, 0.0  ;;  %v1576_v34 = vmul.f32 %v7659_v24, %v10149_v15  ;;  %v4420_v62 = vsel %vm4305_vm7, %v7628_v3, %v7826_v60  ;;  %v1722_v49 = vmul.f32 %v7682_v59, %v6284_v12 }
 0x2d3   : > { %v1640_v10 = vadd.f32 %v1574_v52, %v1492_v35  ;;  %v1724_v16 = vmul.f32 %v7845_v26, %v6284_v12  ;;  %4819 = vmatmul.mubr.bf16.gmra.mxu0 %v4420_v62  ;;  %v10231_v21 = vrot.slane %v7626_v6, 2  ;;  %v3829_v3 = vsel %vm3767_vm6, %v3824_v29, %v9913_v20  ;;  %v10232_v62 = vld [vmem:[#allocation54_spill] sm:$0xff] }
 0x2d4   : > { %v1314_v28 = vmin.f32 %v1250_v56, 6.0  ;;  %v1642_v13 = vadd.f32 %v1576_v34, %v1494_v18  ;;  %v3995_v41 = vadd.f32 %v3829_v3, %v2912_v63  ;;  %v2009_v53 = vrot.slane %v1854_v5, 1  ;;  %v10233_v56 = vld [vmem:[#allocation84_spill] sm:$0xff]  ;;  %v10235_v63 = vld [vmem:[#allocation50_spill] sm:$0xff]  ;;  %v1177_v3 = vpop.f32.mrf.mxu1 }
 0x2d5   : > { %v3825_v31 = vsel %vm3767_vm6, %v10231_v21, %v3824_v29  ;;  %v1788_v47 = vadd.f32 %v1722_v49, %v1640_v10  ;;  %v9915_v35 = vrot.slane %v7852_v46, 1  ;;  %v2315_v52 = vmul.f32 %v7446_v42, %v10215_v58 }
 0x2d6   : > { %v3993_v48 = vadd.f32 %v3825_v31, %v2910_v1  ;;  %1378 = vst [vmem:[#allocation2 + $0x1f0] sm:$0xff] %v1314_v28  ;;  %v1790_v45 = vadd.f32 %v1724_v16, %v1642_v13  ;;  %v2317_v6 = vmul.f32 %v7480_v22, %v10215_v58  ;;  %v4073_v29 = vadd.f32 %v10232_v62, %v3995_v41  ;;  %v10236_v16 = vld [vmem:[#allocation57_spill] sm:$0xff] }
 0x2d7   : > { %v10234_v18 = vrot.slane %v10233_v56, 1  ;;  %v2387_v34 = vmul.f32 %v7659_v24, %v10235_v63  ;;  %v2014_v5 = vsel %vm1954_vm4, %v2009_v53, %v9915_v35  ;;  %v2389_v49 = vmul.f32 %v7682_v59, %v10235_v63 }
 0x2d8   : > { %v4071_v21 = vadd.f32 %v10232_v62, %v3993_v48  ;;  %v2525_v31 = vmul.f32 %v7845_v26, %v10236_v16  ;;  %v4139_v13 = vmax.f32 %v4073_v29, 0.0  ;;  %v2177_v48 = vmul.f32 %v2014_v5, %v1790_v45 }
 0x2d9   : > { %v2010_v1 = vsel %vm1954_vm4, %v10234_v18, %v2009_v53  ;;  %v2451_v41 = vadd.f32 %v2387_v34, %v2315_v52  ;;  %v2453_v56 = vadd.f32 %v2389_v49, %v2317_v6  ;;  %v7879_v18 = vld [vmem:[#allocation2 + $0x140] sm:$0xff]  ;;  %v2989_v53 = vmul.f32 %v7480_v22, %v10237_v57  ;;  %v7895_v34 = vld [vmem:[%s10056_s1 + $0x2f0] sm:$0xff] }
 0x2da   : > { %v2175_v10 = vmul.f32 %v2010_v1, %v1788_v47  ;;  %v4137_v28 = vmax.f32 %v4071_v21, 0.0  ;;  %v2527_v20 = vmul.f32 %v7879_v18, %v10236_v16  ;;  %v2987_v47 = vmul.f32 %v7446_v42, %v10237_v57  ;;  %v5335_v1 = vld [vmem:[%s10056_s1 + $0x2e0] sm:$0xff]  ;;  %v10240_v16 = vld [vmem:[#allocation76_spill] sm:$0xff] }
 0x2db   : > { %v4205_v29 = vmin.f32 %v4139_v13, 6.0  ;;  %v2589_v45 = vadd.f32 %v2525_v31, %v2451_v41  ;;  %v10238_v52 = vld [vmem:[#allocation58_spill] sm:$0xff]  ;;  %v1179_v31 = vpop.f32.mrf.mxu1  ;;  %v3497_v36 = vrot.slane %v5335_v1, 7  ;;  %v10241_v63 = vrot.slane %v10240_v16, 1 }
 0x2dc   : > { %v4203_v21 = vmin.f32 %v4137_v28, 6.0  ;;  %v3065_v6 = vmul.f32 %v7659_v24, %v10238_v52  ;;  %v7897_v5 = vadd.f32 %v2527_v20, %v2453_v56  ;;  %v3067_v42 = vmul.f32 %v7682_v59, %v10238_v52  ;;  %v10239_v49 = vld [vmem:[#allocation62_spill] sm:$0xff] }
 0x2dd   : > { %v3209_v35 = vmul.f32 %v7845_v26, %v10239_v49  ;;  %v3211_v28 = vmul.f32 %v7879_v18, %v10239_v49  ;;  %v2743_v41 = vrot.slane %v2589_v45, 1  ;;  %v9929_v20 = vrot.slane %v7895_v34, 7  ;;  %v1181_v45 = vpop.f32.mrf.mxu1 }
 0x2de   : > { %v4255_v13 = vpack.c.bf16 %v4205_v29, %v4203_v21  ;;  %v3131_v55 = vadd.f32 %v3065_v6, %v2987_v47  ;;  %v9928_v14 = vrot.slane %v7897_v5, 1  ;;  %v3133_v19 = vadd.f32 %v3067_v42, %v2989_v53 }
 0x2df   : > { %v1178_v56 = vadd.f32 %v1177_v3, %v10177_v4  ;;  %v2744_v46 = vsel %vm1954_vm4, %v10241_v63, %v2743_v41  ;;  %v10242_v29 = vrot.slane %v7702_v0, 7  ;;  %v3502_v16 = vsel %vm3442_vm5, %v3497_v36, %v9929_v20  ;;  %v1185_v20 = vpop.f32.mrf.mxu1 }
 0x2e0   : > { %v4440_v57 = vshrl.u32 %v4255_v13, 16  ;;  %v4443_v52 = vshll.u32 %v4255_v13, 16  ;;  %v3275_v62 = vadd.f32 %v3209_v35, %v3131_v55  ;;  %v2748_v21 = vsel %vm1954_vm4, %v2743_v41, %v9928_v14 }
 0x2e1   : > { %v2909_v47 = vadd.f32 %v2744_v46, %v2175_v10  ;;  %v3277_v1 = vadd.f32 %v3211_v28, %v3133_v19  ;;  %v3498_v53 = vsel %vm3442_vm5, %v10242_v29, %v3497_v36  ;;  %v2911_v42 = vadd.f32 %v2748_v21, %v2177_v48  ;;  %v7946_v21 = vld [vmem:[%s10056_s1 + $0x118] sm:$0xff] }
 0x2e2   : > { %v4442_v6 = vrot.slane %v4440_v57, 3  ;;  %v4445_v3 = vrot.slane %v4443_v52, 4  ;;  %v3663_v63 = vmul.f32 %v3498_v53, %v3275_v62  ;;  %v1251_v35 = vmax.f32 %v1178_v56, 0.0  ;;  %v7931_v52 = vld [vmem:[#allocation2 + $0x158] sm:$0xff]  ;;  %v1859_v56 = vld [vmem:[%s10056_s1 + $0x108] sm:$0xff] }
 0x2e3   : > { %v7920_v55 = vmul.f32 %v3502_v16, %v3277_v1  ;;  %v1180_v13 = vadd.f32 %v1179_v31, %v6169_v8  ;;  %v1182_v0 = vadd.f32 %v1181_v45, %v10177_v4  ;;  %v1497_v19 = vmul.f32 %v10137_v51, %v7369_v50 }
 0x2e4   : > { %v7923_v46 = vor.u32 %v4445_v3, %v4442_v6  ;;  %v1499_v57 = vmul.f32 %v10137_v51, %v7537_v37  ;;  %v3822_v10 = vrot.slane %v3663_v63, 2  ;;  %v1315_v36 = vmin.f32 %v1251_v35, 6.0 }
 0x2e5   : > { %v9927_v48 = vrot.slane %v7920_v55, 2  ;;  %v1252_v62 = vmax.f32 %v1180_v13, 0.0  ;;  %v1253_v31 = vmax.f32 %v1182_v0, 0.0  ;;  %v1579_v41 = vmul.f32 %v10141_v2, %v7567_v54 }
 0x2e6   : > { %v4447_v28 = vsel %vm4305_vm7, %v7724_v7, %v7923_v46  ;;  %v1581_v50 = vmul.f32 %v10141_v2, %v7733_v43  ;;  %v10243_v7 = vrot.slane %v7726_v61, 2  ;;  %1379 = vst.msk [vmem:[#allocation2 + $0x1f8] sm:$0xff] %vm442_vm3, %v1315_v36  ;;  %v1727_v45 = vmul.f32 %v6204_v40, %v7768_v27 }
 0x2e7   : > { %5390 = vmatprep.mubr.msk.bf16.mxu0 %vm442_vm3, %v4447_v28  ;;  %v3827_v29 = vsel %vm3767_vm6, %v3822_v10, %v9927_v48  ;;  %v1316_v53 = vmin.f32 %v1252_v62, 6.0  ;;  %v1317_v16 = vmin.f32 %v1253_v31, 6.0  ;;  %v1645_v63 = vadd.f32 %v1579_v41, %v1497_v19  ;;  %v7961_v28 = vld [vmem:[#allocation2 + $0x168] sm:$0xff] }
 0x2e8   : > { %v3823_v1 = vsel %vm3767_vm6, %v10243_v7, %v3822_v10  ;;  %v3994_v3 = vadd.f32 %v3827_v29, %v2911_v42  ;;  %v1647_v35 = vadd.f32 %v1581_v50, %v1499_v57  ;;  %v1729_v61 = vmul.f32 %v6204_v40, %v7931_v52 }
 0x2e9   : > { %v3992_v6 = vadd.f32 %v3823_v1, %v2909_v47  ;;  %1380 = vst [vmem:[#allocation2 + $0x200] sm:$0xff] %v1316_v53  ;;  %v2019_v13 = vrot.slane %v1859_v56, 1  ;;  %v9926_v0 = vrot.slane %v7946_v21, 1  ;;  %1381 = vst.msk [vmem:[#allocation2 + $0x208] sm:$0xff] %vm442_vm3, %v1317_v16  ;;  %v1793_v47 = vadd.f32 %v1727_v45, %v1645_v63 }
 0x2ea   : > { %v4072_v36 = vadd.f32 %v10142_v30, %v3994_v3  ;;  %v2320_v42 = vmul.f32 %v10143_v23, %v7537_v37  ;;  %v1795_v19 = vadd.f32 %v1729_v61, %v1647_v35  ;;  %v10244_v57 = vrot.slane %v7753_v11, 1  ;;  %v5340_v35 = vld [vmem:[%s10056_s1 + $0x308] sm:$0xff] }
 0x2eb   : > { %v4070_v10 = vadd.f32 %v10142_v30, %v3992_v6  ;;  %v2024_v31 = vsel %vm1954_vm4, %v2019_v13, %v9926_v0  ;;  %v2322_v41 = vmul.f32 %v10143_v23, %v7567_v54  ;;  %v2392_v1 = vmul.f32 %v6201_v38, %v7733_v43 }
 0x2ec   : > { %v2020_v62 = vsel %vm1954_vm4, %v10244_v57, %v2019_v13  ;;  %v4138_v56 = vmax.f32 %v4072_v36, 0.0  ;;  %v2182_v29 = vmul.f32 %v2024_v31, %v1795_v19  ;;  %v2394_v53 = vmul.f32 %v6201_v38, %v7768_v27  ;;  %v8003_v19 = vld [vmem:[%s9769_s7 + $0x18] ss:$0 sm:$0xff] }
 0x2ed   : > { %v4136_v50 = vmax.f32 %v4070_v10, 0.0  ;;  %v2180_v7 = vmul.f32 %v2020_v62, %v1793_v47  ;;  %v2530_v11 = vmul.f32 %v6265_v17, %v7931_v52  ;;  %v2532_v45 = vmul.f32 %v6265_v17, %v7961_v28  ;;  %v7998_v47 = vld [vmem:[%s10056_s1 + $0x318] sm:$0xff]  ;;  %10245 = vst [vmem:[#allocation82_spill] sm:$0xff] %v8003_v19 }
 0x2ee   : > { %v4204_v3 = vmin.f32 %v4138_v56, 6.0  ;;  %v2456_v16 = vadd.f32 %v2392_v1, %v2320_v42  ;;  %v2992_v63 = vmul.f32 %v10194_v9, %v7537_v37  ;;  %v2458_v61 = vadd.f32 %v2394_v53, %v2322_v41 }
 0x2ef   : > { %v4202_v6 = vmin.f32 %v4136_v50, 6.0  ;;  %v2994_v13 = vmul.f32 %v10194_v9, %v7567_v54  ;;  %v3070_v10 = vmul.f32 %v10195_v32, %v7733_v43  ;;  %v3072_v36 = vmul.f32 %v10195_v32, %v7768_v27 }
 0x2f0   : > { %v2594_v42 = vadd.f32 %v2530_v11, %v2456_v16  ;;  %v3214_v57 = vmul.f32 %v8003_v19, %v7931_v52  ;;  %v3216_v62 = vmul.f32 %v8003_v19, %v7961_v28  ;;  %v8009_v31 = vadd.f32 %v2532_v45, %v2458_v61 }
 0x2f1   : > { %v4254_v37 = vpack.c.bf16 %v4204_v3, %v4202_v6  ;;  %v3136_v41 = vadd.f32 %v3070_v10, %v2992_v63  ;;  %v3138_v50 = vadd.f32 %v3072_v36, %v2994_v13  ;;  %v3507_v56 = vrot.slane %v5340_v35, 7 }
 0x2f2   : > { %v2753_v6 = vrot.slane %v2594_v42, 1  ;;  %v9935_v11 = vrot.slane %v7998_v47, 7  ;;  %v9934_v3 = vrot.slane %v8009_v31, 1  ;;  %v10246_v48 = vrot.slane %v7797_v44, 7 }
 0x2f3   : > { %v4431_v1 = vshrl.u32 %v4254_v37, 16  ;;  %v4434_v53 = vshll.u32 %v4254_v37, 16  ;;  %v3280_v16 = vadd.f32 %v3214_v57, %v3136_v41  ;;  %v3282_v0 = vadd.f32 %v3216_v62, %v3138_v50 }
 0x2f4   : > { %v3508_v14 = vsel %vm3442_vm5, %v10246_v48, %v3507_v56  ;;  %v10247_v63 = vrot.slane %v7805_v33, 1  ;;  %v3512_v61 = vsel %vm3442_vm5, %v3507_v56, %v9935_v11  ;;  %v2758_v13 = vsel %vm1954_vm4, %v2753_v6, %v9934_v3 }
 0x2f5   : > { %v4433_v19 = vrot.slane %v4431_v1, 3  ;;  %v4436_v45 = vrot.slane %v4434_v53, 4  ;;  %v3668_v36 = vmul.f32 %v3508_v14, %v3280_v16  ;;  %v8025_v44 = vmul.f32 %v3512_v61, %v3282_v0  ;;  %v8058_v53 = vld [vmem:[#allocation2 + $0x150] sm:$0xff] }
 0x2f6   : > { %v2754_v35 = vsel %vm1954_vm4, %v10247_v63, %v2753_v6  ;;  %v2916_v37 = vadd.f32 %v2758_v13, %v2182_v29  ;;  %v1186_v42 = vadd.f32 %v1185_v20, %v6169_v8  ;;  %v1496_v33 = vmul.f32 %v7480_v22, %v10148_v25  ;;  %v1858_v29 = vld [vmem:[%s10056_s1 + $0x100] sm:$0xff] }
 0x2f7   : > { %v2914_v10 = vadd.f32 %v2754_v35, %v2180_v7  ;;  %v8027_v48 = vor.u32 %v4436_v45, %v4433_v19  ;;  %v3832_v57 = vrot.slane %v3668_v36, 2  ;;  %v9933_v62 = vrot.slane %v8025_v44, 2  ;;  %v8050_v19 = vld [vmem:[%s10056_s1 + $0x110] sm:$0xff] }
 0x2f8   : > { %v1498_v41 = vmul.f32 %v7659_v24, %v10148_v25  ;;  %v1578_v7 = vmul.f32 %v7682_v59, %v10149_v15  ;;  %v1254_v0 = vmax.f32 %v1186_v42, 0.0  ;;  %v1580_v20 = vmul.f32 %v7845_v26, %v10149_v15  ;;  %v10249_v42 = vld [vmem:[#allocation54_spill] sm:$0xff] }
 0x2f9   : > { %v4438_v14 = vsel %vm4305_vm7, %v7826_v60, %v8027_v48  ;;  %v1726_v22 = vmul.f32 %v7879_v18, %v6284_v12  ;;  %v10248_v50 = vrot.slane %v7823_v39, 2  ;;  %v3837_v56 = vsel %vm3767_vm6, %v3832_v57, %v9933_v62 }
 0x2fa   : > { %4827 = vmatmul.mubr.bf16.gmra.mxu0 %v4438_v14  ;;  %v1644_v1 = vadd.f32 %v1578_v7, %v1496_v33  ;;  %v1728_v6 = vmul.f32 %v8058_v53, %v6284_v12  ;;  %v3999_v45 = vadd.f32 %v3837_v56, %v2916_v37  ;;  %v1318_v63 = vmin.f32 %v1254_v0, 6.0 }
 0x2fb   : > { %v3833_v60 = vsel %vm3767_vm6, %v10248_v50, %v3832_v57  ;;  %v1646_v35 = vadd.f32 %v1580_v20, %v1498_v41  ;;  %v2017_v13 = vrot.slane %v1858_v29, 1  ;;  %v9932_v39 = vrot.slane %v8050_v19, 1  ;;  %v10252_v20 = vld [vmem:[#allocation50_spill] sm:$0xff]  ;;  %v1187_v50 = vpop.f32.mrf.mxu1 }
 0x2fc   : > { %v3997_v16 = vadd.f32 %v3833_v60, %v2914_v10  ;;  %v1792_v61 = vadd.f32 %v1726_v22, %v1644_v1  ;;  %v2319_v36 = vmul.f32 %v7659_v24, %v10215_v58  ;;  %v4077_v33 = vadd.f32 %v10249_v42, %v3999_v45  ;;  %1382 = vst [vmem:[#allocation2 + $0x210] sm:$0xff] %v1318_v63  ;;  %v10250_v10 = vld [vmem:[#allocation81_spill] sm:$0xff] }
 0x2fd   : > { %v1794_v57 = vadd.f32 %v1728_v6, %v1646_v35  ;;  %v2321_v7 = vmul.f32 %v7682_v59, %v10215_v58  ;;  %v10251_v37 = vrot.slane %v10250_v10, 1  ;;  %v2022_v0 = vsel %vm1954_vm4, %v2017_v13, %v9932_v39  ;;  %v10253_v63 = vld [vmem:[#allocation57_spill] sm:$0xff] }
 0x2fe   : > { %v4075_v14 = vadd.f32 %v10249_v42, %v3997_v16  ;;  %v2391_v22 = vmul.f32 %v7845_v26, %v10252_v20  ;;  %v2393_v29 = vmul.f32 %v7879_v18, %v10252_v20  ;;  %v4143_v56 = vmax.f32 %v4077_v33, 0.0  ;;  %v8081_v10 = vld [vmem:[#allocation2 + $0x160] sm:$0xff] }
 0x2ff   : > { %v2018_v41 = vsel %vm1954_vm4, %v10251_v37, %v2017_v13  ;;  %v2181_v6 = vmul.f32 %v2022_v0, %v1794_v57  ;;  %v2529_v35 = vmul.f32 %v8058_v53, %v10253_v63  ;;  %v2531_v13 = vmul.f32 %v8081_v10, %v10253_v63  ;;  %v5339_v37 = vld [vmem:[%s10056_s1 + $0x300] sm:$0xff] }
 0x300   : > { %v4141_v60 = vmax.f32 %v4075_v14, 0.0  ;;  %v2179_v1 = vmul.f32 %v2018_v41, %v1792_v61  ;;  %v2455_v16 = vadd.f32 %v2391_v22, %v2319_v36  ;;  %v2457_v45 = vadd.f32 %v2393_v29, %v2321_v7  ;;  %v10254_v14 = vld [vmem:[#allocation55_spill] sm:$0xff]  ;;  %v10256_v7 = vld [vmem:[#allocation58_spill] sm:$0xff]  ;;  %v1189_v29 = vpop.f32.mrf.mxu1 }
 0x301   : > { %v4209_v62 = vmin.f32 %v4143_v56, 6.0  ;;  %v2991_v61 = vmul.f32 %v7659_v24, %v10254_v14  ;;  %v2993_v36 = vmul.f32 %v7682_v59, %v10254_v14  ;;  %v3069_v41 = vmul.f32 %v7845_v26, %v10256_v7  ;;  %v8101_v22 = vld [vmem:[%s10056_s1 + $0x310] sm:$0xff] }
 0x302   : > { %v4207_v39 = vmin.f32 %v4141_v60, 6.0  ;;  %v2593_v33 = vadd.f32 %v2529_v35, %v2455_v16  ;;  %v8092_v57 = vadd.f32 %v2531_v13, %v2457_v45  ;;  %v3071_v0 = vmul.f32 %v7879_v18, %v10256_v7 }
 0x303   : > { %v3213_v24 = vmul.f32 %v8058_v53, %v10239_v49  ;;  %v3215_v56 = vmul.f32 %v8081_v10, %v10239_v49  ;;  %v3505_v16 = vrot.slane %v5339_v37, 7  ;;  %v3135_v13 = vadd.f32 %v3069_v41, %v2991_v61  ;;  %v1191_v61 = vpop.f32.mrf.mxu1 }
 0x304   : > { %10255 = vst [vmem:[#allocation51_spill] sm:$0xff] %v8092_v57  ;;  %v4257_v60 = vpack.c.bf16 %v4209_v62, %v4207_v39  ;;  %v2751_v45 = vrot.slane %v2593_v33, 1  ;;  %v2755_v35 = vrot.slane %v8092_v57, 1  ;;  %v3137_v3 = vadd.f32 %v3071_v0, %v2993_v36 }
 0x305   : > { %v10257_v14 = vrot.slane %v7895_v34, 7  ;;  %v9948_v62 = vrot.slane %v8101_v22, 7  ;;  %v10258_v39 = vrot.slane %v7897_v5, 1  ;;  %v3279_v37 = vadd.f32 %v3213_v24, %v3135_v13  ;;  %v8152_v13 = vld [vmem:[%s10056_s1 + $0x138] sm:$0xff] }
 0x306   : > { %v4458_v11 = vshrl.u32 %v4257_v60, 16  ;;  %v4461_v7 = vshll.u32 %v4257_v60, 16  ;;  %v2756_v49 = vsel %vm1954_vm4, %v2751_v45, %v2755_v35  ;;  %v3281_v33 = vadd.f32 %v3215_v56, %v3137_v3 }
 0x307   : > { %v3506_v63 = vsel %vm3442_vm5, %v10257_v14, %v3505_v16  ;;  %v2752_v42 = vsel %vm1954_vm4, %v10258_v39, %v2751_v45  ;;  %v2915_v60 = vadd.f32 %v2756_v49, %v2181_v6  ;;  %v3510_v34 = vsel %vm3442_vm5, %v3505_v16, %v9948_v62 }
 0x308   : > { %v4460_v36 = vrot.slane %v4458_v11, 3  ;;  %v4463_v41 = vrot.slane %v4461_v7, 4  ;;  %v2913_v0 = vadd.f32 %v2752_v42, %v2179_v1  ;;  %v3667_v14 = vmul.f32 %v3506_v63, %v3279_v37  ;;  %v8132_v63 = vld [vmem:[#allocation2 + $0x178] sm:$0xff] }
 0x309   : > { %v1188_v5 = vadd.f32 %v1187_v50, %v10177_v4  ;;  %v1190_v39 = vadd.f32 %v1189_v29, %v6169_v8  ;;  %v8125_v57 = vmul.f32 %v3510_v34, %v3281_v33  ;;  %v1192_v3 = vadd.f32 %v1191_v61, %v10177_v4 }
 0x30a   : > { %v8123_v20 = vor.u32 %v4463_v41, %v4460_v36  ;;  %v1501_v11 = vmul.f32 %v10137_v51, %v7567_v54  ;;  %v3830_v42 = vrot.slane %v3667_v14, 2  ;;  %v1503_v7 = vmul.f32 %v10137_v51, %v7733_v43 }
 0x30b   : > { %v1255_v1 = vmax.f32 %v1188_v5, 0.0  ;;  %v1256_v6 = vmax.f32 %v1190_v39, 0.0  ;;  %v9947_v50 = vrot.slane %v8125_v57, 2  ;;  %v1257_v29 = vmax.f32 %v1192_v3, 0.0  ;;  %v8167_v39 = vld [vmem:[#allocation2 + $0x188] sm:$0xff] }
 0x30c   : > { %v4465_v8 = vsel %vm4305_vm7, %v7923_v46, %v8123_v20  ;;  %v1583_v4 = vmul.f32 %v10141_v2, %v7768_v27  ;;  %v10259_v54 = vrot.slane %v7920_v55, 2  ;;  %v1585_v45 = vmul.f32 %v10141_v2, %v7931_v52  ;;  %v1863_v46 = vld [vmem:[%s10056_s1 + $0x128] sm:$0xff] }
 0x30d   : > { %5391 = vmatprep.mubr.msk.bf16.mxu0 %vm442_vm3, %v4465_v8  ;;  %v1319_v56 = vmin.f32 %v1255_v1, 6.0  ;;  %v1320_v16 = vmin.f32 %v1256_v6, 6.0  ;;  %v3835_v55 = vsel %vm3767_vm6, %v3830_v42, %v9947_v50  ;;  %v1321_v37 = vmin.f32 %v1257_v29, 6.0 }
 0x30e   : > { %v3831_v24 = vsel %vm3767_vm6, %v10259_v54, %v3830_v42  ;;  %v1649_v33 = vadd.f32 %v1583_v4, %v1501_v11  ;;  %v3998_v61 = vadd.f32 %v3835_v55, %v2915_v60  ;;  %v1651_v36 = vadd.f32 %v1585_v45, %v1503_v7 }
 0x30f   : > { %v3996_v49 = vadd.f32 %v3831_v24, %v2913_v0  ;;  %1383 = vst.msk [vmem:[#allocation2 + $0x218] sm:$0xff] %vm442_vm3, %v1319_v56  ;;  %1384 = vst [vmem:[#allocation2 + $0x220] sm:$0xff] %v1320_v16  ;;  %v1731_v41 = vmul.f32 %v6204_v40, %v7961_v28  ;;  %v1733_v34 = vmul.f32 %v6204_v40, %v8132_v63  ;;  %v2027_v5 = vrot.slane %v1863_v46, 1 }
 0x310   : > { %1385 = vst.msk [vmem:[#allocation2 + $0x228] sm:$0xff] %vm442_vm3, %v1321_v37  ;;  %v9946_v0 = vrot.slane %v8152_v13, 1  ;;  %v2324_v60 = vmul.f32 %v10143_v23, %v7733_v43  ;;  %v4076_v3 = vadd.f32 %v10142_v30, %v3998_v61  ;;  %v2326_v1 = vmul.f32 %v10143_v23, %v7768_v27 }
 0x311   : > { %v4074_v14 = vadd.f32 %v10142_v30, %v3996_v49  ;;  %v1797_v11 = vadd.f32 %v1731_v41, %v1649_v33  ;;  %v1799_v42 = vadd.f32 %v1733_v34, %v1651_v36  ;;  %v10260_v7 = vrot.slane %v7946_v21, 1  ;;  %v5344_v49 = vld [vmem:[%s10056_s1 + $0x328] sm:$0xff]  ;;  %v8196_v41 = vld [vmem:[%s10056_s1 + $0x338] sm:$0xff] }
 0x312   : > { %v2032_v29 = vsel %vm1954_vm4, %v2027_v5, %v9946_v0  ;;  %v2396_v4 = vmul.f32 %v6201_v38, %v7931_v52  ;;  %v4142_v54 = vmax.f32 %v4076_v3, 0.0  ;;  %v2398_v16 = vmul.f32 %v6201_v38, %v7961_v28 }
 0x313   : > { %v4140_v6 = vmax.f32 %v4074_v14, 0.0  ;;  %v2028_v8 = vsel %vm1954_vm4, %v10260_v7, %v2027_v5  ;;  %v2186_v56 = vmul.f32 %v2032_v29, %v1799_v42  ;;  %v2534_v21 = vmul.f32 %v6265_v17, %v8132_v63 }
 0x314   : > { %v2184_v24 = vmul.f32 %v2028_v8, %v1797_v11  ;;  %v2460_v46 = vadd.f32 %v2396_v4, %v2324_v60  ;;  %v2536_v55 = vmul.f32 %v6265_v17, %v8167_v39  ;;  %v4208_v37 = vmin.f32 %v4142_v54, 6.0  ;;  %v10261_v60 = vld [vmem:[#allocation82_spill] sm:$0xff] }
 0x315   : > { %v4206_v45 = vmin.f32 %v4140_v6, 6.0  ;;  %v2462_v33 = vadd.f32 %v2398_v16, %v2326_v1  ;;  %v2996_v61 = vmul.f32 %v10194_v9, %v7733_v43  ;;  %v2998_v36 = vmul.f32 %v10194_v9, %v7768_v27 }
 0x316   : > { %v2598_v34 = vadd.f32 %v2534_v21, %v2460_v46  ;;  %v3074_v14 = vmul.f32 %v10195_v32, %v7931_v52  ;;  %v3076_v5 = vmul.f32 %v10195_v32, %v7961_v28  ;;  %v3218_v3 = vmul.f32 %v10261_v60, %v8132_v63 }
 0x317   : > { %v4256_v11 = vpack.c.bf16 %v4208_v37, %v4206_v45  ;;  %v8204_v43 = vadd.f32 %v2536_v55, %v2462_v33  ;;  %v3220_v42 = vmul.f32 %v10261_v60, %v8167_v39  ;;  %v3515_v1 = vrot.slane %v5344_v49, 7 }
 0x318   : > { %v2761_v6 = vrot.slane %v2598_v34, 1  ;;  %v3140_v7 = vadd.f32 %v3074_v14, %v2996_v61  ;;  %v3142_v8 = vadd.f32 %v3076_v5, %v2998_v36  ;;  %v9944_v29 = vrot.slane %v8196_v41, 7 }
 0x319   : > { %v4449_v4 = vshrl.u32 %v4256_v11, 16  ;;  %v4452_v54 = vshll.u32 %v4256_v11, 16  ;;  %v9945_v16 = vrot.slane %v8204_v43, 1  ;;  %v10262_v46 = vrot.slane %v7998_v47, 7 }
 0x31a   : > { %v10263_v45 = vrot.slane %v8009_v31, 1  ;;  %v3284_v37 = vadd.f32 %v3218_v3, %v3140_v7  ;;  %v3286_v33 = vadd.f32 %v3220_v42, %v3142_v8  ;;  %v3520_v49 = vsel %vm3442_vm5, %v3515_v1, %v9944_v29  ;;  %v1862_v3 = vld [vmem:[%s10056_s1 + $0x120] sm:$0xff] }
 0x31b   : > { %v3516_v21 = vsel %vm3442_vm5, %v10262_v46, %v3515_v1  ;;  %v4451_v61 = vrot.slane %v4449_v4, 3  ;;  %v4454_v36 = vrot.slane %v4452_v54, 4  ;;  %v2766_v34 = vsel %vm1954_vm4, %v2761_v6, %v9945_v16  ;;  %v8245_v4 = vld [vmem:[#allocation2 + $0x170] sm:$0xff] }
 0x31c   : > { %v2762_v55 = vsel %vm1954_vm4, %v10263_v45, %v2761_v6  ;;  %v2920_v47 = vadd.f32 %v2766_v34, %v2186_v56  ;;  %v3672_v5 = vmul.f32 %v3516_v21, %v3284_v37  ;;  %v8222_v11 = vmul.f32 %v3520_v49, %v3286_v33  ;;  %v8240_v56 = vld [vmem:[%s10056_s1 + $0x130] sm:$0xff] }
 0x31d   : > { %v2918_v14 = vadd.f32 %v2762_v55, %v2184_v24  ;;  %v1500_v31 = vmul.f32 %v7682_v59, %v10148_v25  ;;  %v8229_v42 = vor.u32 %v4454_v36, %v4451_v61  ;;  %v1502_v1 = vmul.f32 %v7845_v26, %v10148_v25 }
 0x31e   : > { %v1582_v6 = vmul.f32 %v7879_v18, %v10149_v15  ;;  %v1584_v24 = vmul.f32 %v8058_v53, %v10149_v15  ;;  %v3840_v59 = vrot.slane %v3672_v5, 2  ;;  %v9943_v7 = vrot.slane %v8222_v11, 2 }
 0x31f   : > { %v1730_v8 = vmul.f32 %v8081_v10, %v6284_v12  ;;  %v1732_v54 = vmul.f32 %v8245_v4, %v6284_v12  ;;  %v4456_v46 = vsel %vm4305_vm7, %v8027_v48, %v8229_v42  ;;  %v2025_v55 = vrot.slane %v1862_v3, 1 }
 0x320   : > { %v1648_v21 = vadd.f32 %v1582_v6, %v1500_v31  ;;  %v1650_v45 = vadd.f32 %v1584_v24, %v1502_v1  ;;  %4835 = vmatmul.mubr.bf16.gmra.mxu0 %v4456_v46  ;;  %v10264_v37 = vrot.slane %v8025_v44, 2  ;;  %v3845_v49 = vsel %vm3767_vm6, %v3840_v59, %v9943_v7  ;;  %v10266_v24 = vld [vmem:[#allocation50_spill] sm:$0xff] }
 0x321   : > { %v9942_v61 = vrot.slane %v8240_v56, 1  ;;  %v2323_v36 = vmul.f32 %v7845_v26, %v10215_v58  ;;  %v4003_v5 = vadd.f32 %v3845_v49, %v2920_v47  ;;  %v10265_v3 = vrot.slane %v8050_v19, 1  ;;  %v10267_v46 = vld [vmem:[#allocation54_spill] sm:$0xff] }
 0x322   : > { %v3841_v33 = vsel %vm3767_vm6, %v10264_v37, %v3840_v59  ;;  %v1796_v48 = vadd.f32 %v1730_v8, %v1648_v21  ;;  %v1798_v31 = vadd.f32 %v1732_v54, %v1650_v45  ;;  %v2325_v6 = vmul.f32 %v7879_v18, %v10215_v58  ;;  %v10268_v21 = vld [vmem:[#allocation57_spill] sm:$0xff] }
 0x323   : > { %v4001_v34 = vadd.f32 %v3841_v33, %v2918_v14  ;;  %v2026_v1 = vsel %vm1954_vm4, %v10265_v3, %v2025_v55  ;;  %v2030_v44 = vsel %vm1954_vm4, %v2025_v55, %v9942_v61  ;;  %v2395_v59 = vmul.f32 %v8058_v53, %v10266_v24  ;;  %v8277_v55 = vld [vmem:[#allocation2 + $0x180] sm:$0xff]  ;;  %v10269_v61 = vld [vmem:[#allocation55_spill] sm:$0xff] }
 0x324   : > { %v4081_v14 = vadd.f32 %v10267_v46, %v4003_v5  ;;  %v2183_v47 = vmul.f32 %v2026_v1, %v1796_v48  ;;  %v2185_v8 = vmul.f32 %v2030_v44, %v1798_v31  ;;  %v2397_v19 = vmul.f32 %v8081_v10, %v10266_v24  ;;  %v10270_v1 = vld [vmem:[#allocation58_spill] sm:$0xff] }
 0x325   : > { %v4079_v37 = vadd.f32 %v10267_v46, %v4001_v34  ;;  %v2459_v54 = vadd.f32 %v2395_v59, %v2323_v36  ;;  %v2533_v45 = vmul.f32 %v8245_v4, %v10268_v21  ;;  %v2535_v33 = vmul.f32 %v8277_v55, %v10268_v21  ;;  %v5343_v59 = vld [vmem:[%s10056_s1 + $0x320] sm:$0xff] }
 0x326   : > { %v4147_v3 = vmax.f32 %v4081_v14, 0.0  ;;  %v2995_v34 = vmul.f32 %v7845_v26, %v10269_v61  ;;  %v2997_v5 = vmul.f32 %v7879_v18, %v10269_v61  ;;  %v2461_v48 = vadd.f32 %v2397_v19, %v2325_v6  ;;  %v8300_v6 = vld [vmem:[%s9769_s7 + $0x10] ss:$0 sm:$0xff] }
 0x327   : > { %v4145_v49 = vmax.f32 %v4079_v37, 0.0  ;;  %v2597_v31 = vadd.f32 %v2533_v45, %v2459_v54  ;;  %v3073_v36 = vmul.f32 %v8058_v53, %v10270_v1  ;;  %v3075_v44 = vmul.f32 %v8081_v10, %v10270_v1  ;;  %v8295_v37 = vld [vmem:[%s10056_s1 + $0x330] sm:$0xff]  ;;  %10271 = vst [vmem:[#allocation85_spill] sm:$0xff] %v8300_v6 }
 0x328   : > { %v4213_v14 = vmin.f32 %v4147_v3, 6.0  ;;  %v3217_v19 = vmul.f32 %v8300_v6, %v8245_v4  ;;  %v3219_v54 = vmul.f32 %v8300_v6, %v8277_v55  ;;  %v8306_v45 = vadd.f32 %v2535_v33, %v2461_v48 }
 0x329   : > { %v4211_v26 = vmin.f32 %v4145_v49, 6.0  ;;  %v2759_v7 = vrot.slane %v2597_v31, 1  ;;  %v3139_v29 = vadd.f32 %v3073_v36, %v2995_v34  ;;  %v3141_v16 = vadd.f32 %v3075_v44, %v2997_v5  ;;  %v8318_v36 = vld [vmem:[#allocation2 + $0x198] sm:$0xff] }
 0x32a   : > { %v3513_v50 = vrot.slane %v5343_v59, 7  ;;  %v9956_v49 = vrot.slane %v8295_v37, 7  ;;  %v1505_v3 = vmul.f32 %v10137_v51, %v7768_v27  ;;  %v9961_v61 = vrot.slane %v8306_v45, 1 }
 0x32b   : > { %v4259_v0 = vpack.c.bf16 %v4213_v14, %v4211_v26  ;;  %v2760_v1 = vsel %vm1954_vm4, %v2755_v35, %v2759_v7  ;;  %v3283_v21 = vadd.f32 %v3217_v19, %v3139_v29  ;;  %v3285_v6 = vadd.f32 %v3219_v54, %v3141_v16 }
 0x32c   : > { %v2917_v31 = vadd.f32 %v2760_v1, %v2183_v47  ;;  %v10273_v34 = vrot.slane %v8101_v22, 7  ;;  %v2764_v27 = vsel %vm1954_vm4, %v2759_v7, %v9961_v61  ;;  %v3518_v35 = vsel %vm3442_vm5, %v3513_v50, %v9956_v49  ;;  %v1867_v22 = vld [vmem:[%s10056_s1 + $0x148] sm:$0xff]  ;;  %v8336_v7 = vld [vmem:[%s10056_s1 + $0x158] sm:$0xff] }
 0x32d   : > { %v4476_v33 = vshrl.u32 %v4259_v0, 16  ;;  %v4479_v48 = vshll.u32 %v4259_v0, 16  ;;  %v1507_v29 = vmul.f32 %v10137_v51, %v7931_v52  ;;  %v2919_v47 = vadd.f32 %v2764_v27, %v2185_v8 }
 0x32e   : > { %v3514_v5 = vsel %vm3442_vm5, %v10273_v34, %v3513_v50  ;;  %v8331_v1 = vmul.f32 %v3518_v35, %v3285_v6  ;;  %v1587_v50 = vmul.f32 %v10141_v2, %v7961_v28  ;;  %v1735_v59 = vmul.f32 %v6204_v40, %v8167_v39 }
 0x32f   : > { %v3671_v62 = vmul.f32 %v3514_v5, %v3283_v21  ;;  %v4478_v0 = vrot.slane %v4476_v33, 3  ;;  %v4481_v16 = vrot.slane %v4479_v48, 4  ;;  %v1589_v21 = vmul.f32 %v10141_v2, %v8132_v63 }
 0x330   : > { %v9955_v8 = vrot.slane %v8331_v1, 2  ;;  %v1737_v14 = vmul.f32 %v6204_v40, %v8318_v36  ;;  %v2035_v6 = vrot.slane %v1867_v22, 1  ;;  %v10274_v19 = vrot.slane %v8125_v57, 2  ;;  %v8362_v57 = vld [vmem:[#allocation2 + $0x1a8] sm:$0xff] }
 0x331   : > { %v3838_v44 = vrot.slane %v3671_v62, 2  ;;  %v8344_v26 = vor.u32 %v4481_v16, %v4478_v0  ;;  %v1653_v33 = vadd.f32 %v1587_v50, %v1505_v3  ;;  %v1655_v48 = vadd.f32 %v1589_v21, %v1507_v29 }
 0x332   : > { %v9954_v34 = vrot.slane %v8336_v7, 1  ;;  %v10275_v62 = vrot.slane %v8152_v13, 1  ;;  %v2330_v13 = vmul.f32 %v10143_v23, %v7961_v28  ;;  %v10277_v49 = vrot.slane %v8196_v41, 7  ;;  %v1866_v41 = vld [vmem:[%s10056_s1 + $0x140] sm:$0xff] }
 0x333   : > { %v3839_v54 = vsel %vm3767_vm6, %v10274_v19, %v3838_v44  ;;  %v4483_v5 = vsel %vm4305_vm7, %v8123_v20, %v8344_v26  ;;  %v3843_v27 = vsel %vm3767_vm6, %v3838_v44, %v9955_v8  ;;  %v1801_v29 = vadd.f32 %v1735_v59, %v1653_v33 }
 0x334   : > { %v4000_v35 = vadd.f32 %v3839_v54, %v2917_v31  ;;  %v2036_v22 = vsel %vm1954_vm4, %v10275_v62, %v2035_v6  ;;  %5392 = vmatprep.mubr.msk.bf16.mxu0 %vm442_vm3, %v4483_v5  ;;  %v4002_v3 = vadd.f32 %v3843_v27, %v2919_v47  ;;  %v1803_v0 = vadd.f32 %v1737_v14, %v1655_v48 }
 0x335   : > { %v2040_v20 = vsel %vm1954_vm4, %v2035_v6, %v9954_v34  ;;  %v2328_v31 = vmul.f32 %v10143_v23, %v7931_v52  ;;  %v2400_v44 = vmul.f32 %v6201_v38, %v8132_v63  ;;  %v2188_v47 = vmul.f32 %v2036_v22, %v1801_v29 }
 0x336   : > { %v4078_v16 = vadd.f32 %v10142_v30, %v4000_v35  ;;  %v4080_v50 = vadd.f32 %v10142_v30, %v4002_v3  ;;  %v2190_v21 = vmul.f32 %v2040_v20, %v1803_v0  ;;  %v2402_v59 = vmul.f32 %v6201_v38, %v8167_v39  ;;  %v5348_v35 = vld [vmem:[%s10056_s1 + $0x348] sm:$0xff]  ;;  %v8396_v0 = vld [vmem:[%s10056_s1 + $0x358] sm:$0xff] }
 0x337   : > { %v2464_v6 = vadd.f32 %v2400_v44, %v2328_v31  ;;  %v2538_v19 = vmul.f32 %v6265_v17, %v8318_v36  ;;  %v2540_v54 = vmul.f32 %v6265_v17, %v8362_v57  ;;  %v3000_v5 = vmul.f32 %v10194_v9, %v7931_v52 }
 0x338   : > { %v4144_v14 = vmax.f32 %v4078_v16, 0.0  ;;  %v4146_v33 = vmax.f32 %v4080_v50, 0.0  ;;  %v2466_v48 = vadd.f32 %v2402_v59, %v2330_v13  ;;  %v3002_v27 = vmul.f32 %v10194_v9, %v7961_v28 }
 0x339   : > { %v2602_v22 = vadd.f32 %v2538_v19, %v2464_v6  ;;  %v3078_v3 = vmul.f32 %v10195_v32, %v8132_v63  ;;  %v3080_v29 = vmul.f32 %v10195_v32, %v8167_v39  ;;  %v3222_v16 = vmul.f32 %v10261_v60, %v8318_v36 }
 0x33a   : > { %v4210_v62 = vmin.f32 %v4144_v14, 6.0  ;;  %v4212_v52 = vmin.f32 %v4146_v33, 6.0  ;;  %v8398_v20 = vadd.f32 %v2540_v54, %v2466_v48  ;;  %v3224_v31 = vmul.f32 %v10261_v60, %v8362_v57 }
 0x33b   : > { %v2769_v13 = vrot.slane %v2602_v22, 1  ;;  %v3144_v44 = vadd.f32 %v3078_v3, %v3000_v5  ;;  %v3146_v50 = vadd.f32 %v3080_v29, %v3002_v27  ;;  %v3523_v59 = vrot.slane %v5348_v35, 7 }
 0x33c   : > { %v4258_v14 = vpack.c.bf16 %v4212_v52, %v4210_v62  ;;  %v9960_v6 = vrot.slane %v8398_v20, 1  ;;  %v9959_v19 = vrot.slane %v8396_v0, 7  ;;  %v1504_v33 = vmul.f32 %v7879_v18, %v10148_v25 }
 0x33d   : > { %v10276_v54 = vrot.slane %v8204_v43, 1  ;;  %v3288_v34 = vadd.f32 %v3222_v16, %v3144_v44  ;;  %v3290_v8 = vadd.f32 %v3224_v31, %v3146_v50  ;;  %v3524_v5 = vsel %vm3442_vm5, %v10277_v49, %v3523_v59  ;;  %v8438_v44 = vld [vmem:[#allocation2 + $0x190] sm:$0xff] }
 0x33e   : > { %v4467_v27 = vshrl.u32 %v4258_v14, 16  ;;  %v4470_v35 = vshll.u32 %v4258_v14, 16  ;;  %v2774_v62 = vsel %vm1954_vm4, %v2769_v13, %v9960_v6  ;;  %v3528_v18 = vsel %vm3442_vm5, %v3523_v59, %v9959_v19 }
 0x33f   : > { %v2770_v48 = vsel %vm1954_vm4, %v10276_v54, %v2769_v13  ;;  %v2924_v3 = vadd.f32 %v2774_v62, %v2190_v21  ;;  %v3676_v43 = vmul.f32 %v3524_v5, %v3288_v34  ;;  %v1506_v29 = vmul.f32 %v8058_v53, %v10148_v25  ;;  %v8432_v21 = vld [vmem:[%s10056_s1 + $0x150] sm:$0xff] }
 0x340   : > { %v2922_v22 = vadd.f32 %v2770_v48, %v2188_v47  ;;  %v4469_v49 = vrot.slane %v4467_v27, 3  ;;  %v4472_v52 = vrot.slane %v4470_v35, 4  ;;  %v8425_v16 = vmul.f32 %v3528_v18, %v3290_v8 }
 0x341   : > { %v1586_v47 = vmul.f32 %v8081_v10, %v10149_v15  ;;  %v3848_v34 = vrot.slane %v3676_v43, 2  ;;  %v1588_v31 = vmul.f32 %v8245_v4, %v10149_v15  ;;  %v1734_v13 = vmul.f32 %v8277_v55, %v6284_v12 }
 0x342   : > { %v1736_v8 = vmul.f32 %v8438_v44, %v6284_v12  ;;  %v8442_v50 = vor.u32 %v4472_v52, %v4469_v49  ;;  %v9958_v59 = vrot.slane %v8425_v16, 2  ;;  %v2033_v54 = vrot.slane %v1866_v41, 1 }
 0x343   : > { %v1652_v14 = vadd.f32 %v1586_v47, %v1504_v33  ;;  %v10278_v48 = vrot.slane %v8222_v11, 2  ;;  %v1654_v27 = vadd.f32 %v1588_v31, %v1506_v29  ;;  %v9957_v35 = vrot.slane %v8432_v21, 1 }
 0x344   : > { %v2327_v62 = vmul.f32 %v8058_v53, %v10215_v58  ;;  %v4474_v18 = vsel %vm4305_vm7, %v8229_v42, %v8442_v50  ;;  %v3853_v43 = vsel %vm3767_vm6, %v3848_v34, %v9958_v59  ;;  %v10279_v29 = vrot.slane %v8240_v56, 1 }
 0x345   : > { %v3849_v5 = vsel %vm3767_vm6, %v10278_v48, %v3848_v34  ;;  %v1800_v41 = vadd.f32 %v1734_v13, %v1652_v14  ;;  %4843 = vmatmul.mubr.bf16.gmra.mxu0 %v4474_v18  ;;  %v4007_v11 = vadd.f32 %v3853_v43, %v2924_v3  ;;  %v1802_v49 = vadd.f32 %v1736_v8, %v1654_v27  ;;  %v10280_v13 = vld [vmem:[#allocation57_spill] sm:$0xff]  ;;  %v10281_v18 = vld [vmem:[#allocation55_spill] sm:$0xff] }
 0x346   : > { %v4005_v33 = vadd.f32 %v3849_v5, %v2922_v22  ;;  %v2034_v52 = vsel %vm1954_vm4, %v10279_v29, %v2033_v54  ;;  %v2038_v47 = vsel %vm1954_vm4, %v2033_v54, %v9957_v35  ;;  %v2329_v48 = vmul.f32 %v8081_v10, %v10215_v58  ;;  %v8473_v5 = vld [vmem:[#allocation2 + $0x1a0] sm:$0xff] }
 0x347   : > { %v2187_v42 = vmul.f32 %v2034_v52, %v1800_v41  ;;  %v2399_v22 = vmul.f32 %v8245_v4, %v10266_v24  ;;  %v4085_v3 = vadd.f32 %v10267_v46, %v4007_v11  ;;  %v2189_v34 = vmul.f32 %v2038_v47, %v1802_v49  ;;  %v10282_v49 = vld [vmem:[#allocation58_spill] sm:$0xff]  ;;  %v8489_v52 = vld [vmem:[%s10056_s1 + $0x350] sm:$0xff] }
 0x348   : > { %v4083_v31 = vadd.f32 %v10267_v46, %v4005_v33  ;;  %v2401_v56 = vmul.f32 %v8277_v55, %v10266_v24  ;;  %v2537_v8 = vmul.f32 %v8438_v44, %v10280_v13  ;;  %v2539_v27 = vmul.f32 %v8473_v5, %v10280_v13 }
 0x349   : > { %v2463_v54 = vadd.f32 %v2399_v22, %v2327_v62  ;;  %v2999_v43 = vmul.f32 %v8058_v53, %v10281_v18  ;;  %v4151_v33 = vmax.f32 %v4085_v3, 0.0  ;;  %v3001_v11 = vmul.f32 %v8081_v10, %v10281_v18  ;;  %v5347_v62 = vld [vmem:[%s10056_s1 + $0x340] sm:$0xff] }
 0x34a   : > { %v4149_v14 = vmax.f32 %v4083_v31, 0.0  ;;  %v2465_v41 = vadd.f32 %v2401_v56, %v2329_v48  ;;  %v3077_v29 = vmul.f32 %v8245_v4, %v10282_v49  ;;  %v3079_v53 = vmul.f32 %v8277_v55, %v10282_v49  ;;  %v10283_v48 = vld [vmem:[#allocation85_spill] sm:$0xff] }
 0x34b   : > { %v2601_v31 = vadd.f32 %v2537_v8, %v2463_v54  ;;  %v3221_v22 = vmul.f32 %v8438_v44, %v10283_v48  ;;  %v4217_v3 = vmin.f32 %v4151_v33, 6.0  ;;  %v3223_v59 = vmul.f32 %v8473_v5, %v10283_v48 }
 0x34c   : > { %v4215_v47 = vmin.f32 %v4149_v14, 6.0  ;;  %v8495_v56 = vadd.f32 %v2539_v27, %v2465_v41  ;;  %v3143_v35 = vadd.f32 %v3077_v29, %v2999_v43  ;;  %v3145_v6 = vadd.f32 %v3079_v53, %v3001_v11 }
 0x34d   : > { %v2767_v19 = vrot.slane %v2601_v31, 1  ;;  %v3521_v61 = vrot.slane %v5347_v62, 7  ;;  %v9967_v18 = vrot.slane %v8489_v52, 7  ;;  %v1509_v49 = vmul.f32 %v10137_v51, %v7961_v28  ;;  %v8512_v62 = vld [vmem:[#allocation2 + $0x1b8] sm:$0xff] }
 0x34e   : > { %v4261_v14 = vpack.c.bf16 %v4217_v3, %v4215_v47  ;;  %v9964_v8 = vrot.slane %v8495_v56, 1  ;;  %v3287_v54 = vadd.f32 %v3221_v22, %v3143_v35  ;;  %v10284_v33 = vrot.slane %v8306_v45, 1 }
 0x34f   : > { %v3289_v43 = vadd.f32 %v3223_v59, %v3145_v6  ;;  %v10285_v41 = vrot.slane %v8295_v37, 7  ;;  %v3526_v11 = vsel %vm3442_vm5, %v3521_v61, %v9967_v18  ;;  %v1511_v37 = vmul.f32 %v10137_v51, %v8132_v63 }
 0x350   : > { %v2768_v27 = vsel %vm1954_vm4, %v10284_v33, %v2767_v19  ;;  %v4494_v47 = vshrl.u32 %v4261_v14, 16  ;;  %v4497_v35 = vshll.u32 %v4261_v14, 16  ;;  %v2772_v28 = vsel %vm1954_vm4, %v2767_v19, %v9964_v8  ;;  %v8549_v8 = vld [vmem:[#allocation2 + $0x1c8] sm:$0xff] }
 0x351   : > { %v3522_v29 = vsel %vm3442_vm5, %v10285_v41, %v3521_v61  ;;  %v2921_v45 = vadd.f32 %v2768_v27, %v2187_v42  ;;  %v2923_v31 = vadd.f32 %v2772_v28, %v2189_v34  ;;  %v8517_v6 = vmul.f32 %v3526_v11, %v3289_v43  ;;  %v1871_v61 = vld [vmem:[%s10056_s1 + $0x168] sm:$0xff]  ;;  %v8531_v42 = vld [vmem:[%s10056_s1 + $0x178] sm:$0xff] }
 0x352   : > { %v3675_v53 = vmul.f32 %v3522_v29, %v3287_v54  ;;  %v4496_v59 = vrot.slane %v4494_v47, 3  ;;  %v4499_v22 = vrot.slane %v4497_v35, 4  ;;  %v1591_v3 = vmul.f32 %v10141_v2, %v8167_v39 }
 0x353   : > { %v1593_v19 = vmul.f32 %v10141_v2, %v8318_v36  ;;  %v9966_v14 = vrot.slane %v8517_v6, 2  ;;  %v1739_v54 = vmul.f32 %v6204_v40, %v8362_v57  ;;  %v1741_v33 = vmul.f32 %v6204_v40, %v8512_v62 }
 0x354   : > { %v3846_v34 = vrot.slane %v3675_v53, 2  ;;  %v8538_v27 = vor.u32 %v4499_v22, %v4496_v59  ;;  %v1657_v43 = vadd.f32 %v1591_v3, %v1509_v49  ;;  %v2043_v29 = vrot.slane %v1871_v61, 1 }
 0x355   : > { %v1659_v41 = vadd.f32 %v1593_v19, %v1511_v37  ;;  %v10286_v11 = vrot.slane %v8331_v1, 2  ;;  %v9965_v28 = vrot.slane %v8531_v42, 1  ;;  %v2332_v53 = vmul.f32 %v10143_v23, %v8132_v63 }
 0x356   : > { %v3851_v35 = vsel %vm3767_vm6, %v3846_v34, %v9966_v14  ;;  %v4501_v49 = vsel %vm4305_vm7, %v8344_v26, %v8538_v27  ;;  %v1805_v1 = vadd.f32 %v1739_v54, %v1657_v43  ;;  %v10287_v22 = vrot.slane %v8336_v7, 1 }
 0x357   : > { %v3847_v47 = vsel %vm3767_vm6, %v10286_v11, %v3846_v34  ;;  %v4006_v61 = vadd.f32 %v3851_v35, %v2923_v31  ;;  %5393 = vmatprep.mubr.msk.bf16.mxu0 %vm442_vm3, %v4501_v49  ;;  %v1807_v59 = vadd.f32 %v1741_v33, %v1659_v41  ;;  %v2048_v19 = vsel %vm1954_vm4, %v2043_v29, %v9965_v28 }
 0x358   : > { %v4004_v37 = vadd.f32 %v3847_v47, %v2921_v45  ;;  %v2044_v3 = vsel %vm1954_vm4, %v10287_v22, %v2043_v29  ;;  %v2334_v34 = vmul.f32 %v10143_v23, %v8167_v39  ;;  %v2404_v31 = vmul.f32 %v6201_v38, %v8318_v36 }
 0x359   : > { %v4084_v26 = vadd.f32 %v10142_v30, %v4006_v61  ;;  %v2192_v45 = vmul.f32 %v2044_v3, %v1805_v1  ;;  %v2194_v54 = vmul.f32 %v2048_v19, %v1807_v59  ;;  %v2406_v7 = vmul.f32 %v6201_v38, %v8362_v57  ;;  %v5352_v59 = vld [vmem:[%s10056_s1 + $0x368] sm:$0xff] }
 0x35a   : > { %v4082_v11 = vadd.f32 %v10142_v30, %v4004_v37  ;;  %v2542_v33 = vmul.f32 %v6265_v17, %v8512_v62  ;;  %v2544_v43 = vmul.f32 %v6265_v17, %v8549_v8  ;;  %v2468_v47 = vadd.f32 %v2404_v31, %v2332_v53  ;;  %v8587_v53 = vld [vmem:[%s10056_s1 + $0x378] sm:$0xff] }
 0x35b   : > { %v4150_v29 = vmax.f32 %v4084_v26, 0.0  ;;  %v3004_v35 = vmul.f32 %v10194_v9, %v8132_v63  ;;  %v2470_v49 = vadd.f32 %v2406_v7, %v2334_v34  ;;  %v3006_v37 = vmul.f32 %v10194_v9, %v8167_v39 }
 0x35c   : > { %v4148_v41 = vmax.f32 %v4082_v11, 0.0  ;;  %v3082_v61 = vmul.f32 %v10195_v32, %v8318_v36  ;;  %v3084_v1 = vmul.f32 %v10195_v32, %v8362_v57  ;;  %v2606_v3 = vadd.f32 %v2542_v33, %v2468_v47 }
 0x35d   : > { %v4216_v22 = vmin.f32 %v4150_v29, 6.0  ;;  %v3226_v19 = vmul.f32 %v10261_v60, %v8512_v62  ;;  %v8591_v34 = vadd.f32 %v2544_v43, %v2470_v49  ;;  %v3228_v31 = vmul.f32 %v10261_v60, %v8549_v8 }
 0x35e   : > { %v4214_v63 = vmin.f32 %v4148_v41, 6.0  ;;  %v3148_v11 = vadd.f32 %v3082_v61, %v3004_v35  ;;  %v3150_v26 = vadd.f32 %v3084_v1, %v3006_v37  ;;  %v2777_v28 = vrot.slane %v2606_v3, 1 }
 0x35f   : > { %v3531_v14 = vrot.slane %v5352_v59, 7  ;;  %v9971_v18 = vrot.slane %v8587_v53, 7  ;;  %v9972_v32 = vrot.slane %v8591_v34, 1  ;;  %v1508_v33 = vmul.f32 %v8081_v10, %v10148_v25 }
 0x360   : > { %v4260_v7 = vpack.c.bf16 %v4216_v22, %v4214_v63  ;;  %v3292_v41 = vadd.f32 %v3226_v19, %v3148_v11  ;;  %v3294_v29 = vadd.f32 %v3228_v31, %v3150_v26  ;;  %v10288_v35 = vrot.slane %v8398_v20, 1 }
 0x361   : > { %v10289_v60 = vrot.slane %v8396_v0, 7  ;;  %v2782_v61 = vsel %vm1954_vm4, %v2777_v28, %v9972_v32  ;;  %v3536_v59 = vsel %vm3442_vm5, %v3531_v14, %v9971_v18  ;;  %v1870_v0 = vld [vmem:[%s10056_s1 + $0x160] sm:$0xff]  ;;  %v1510_v11 = vmul.f32 %v8245_v4, %v10148_v25 }
 0x362   : > { %v4485_v47 = vshrl.u32 %v4260_v7, 16  ;;  %v4488_v43 = vshll.u32 %v4260_v7, 16  ;;  %v2778_v49 = vsel %vm1954_vm4, %v10288_v35, %v2777_v28  ;;  %v2928_v3 = vadd.f32 %v2782_v61, %v2194_v54  ;;  %v8632_v7 = vld [vmem:[#allocation2 + $0x1b0] sm:$0xff] }
 0x363   : > { %v3532_v37 = vsel %vm3442_vm5, %v10289_v60, %v3531_v14  ;;  %v2926_v1 = vadd.f32 %v2778_v49, %v2192_v45  ;;  %v8611_v20 = vmul.f32 %v3536_v59, %v3294_v29  ;;  %v1590_v28 = vmul.f32 %v8277_v55, %v10149_v15  ;;  %v8625_v45 = vld [vmem:[%s10056_s1 + $0x170] sm:$0xff] }
 0x364   : > { %v3680_v10 = vmul.f32 %v3532_v37, %v3292_v41  ;;  %v4487_v63 = vrot.slane %v4485_v47, 3  ;;  %v4490_v22 = vrot.slane %v4488_v43, 4  ;;  %v1592_v14 = vmul.f32 %v8438_v44, %v10149_v15 }
 0x365   : > { %v9970_v26 = vrot.slane %v8611_v20, 2  ;;  %v1738_v31 = vmul.f32 %v8473_v5, %v6284_v12  ;;  %v1740_v41 = vmul.f32 %v8632_v7, %v6284_v12  ;;  %v10290_v29 = vrot.slane %v8425_v16, 2 }
 0x366   : > { %v3856_v19 = vrot.slane %v3680_v10, 2  ;;  %v8627_v54 = vor.u32 %v4490_v22, %v4487_v63  ;;  %v1656_v43 = vadd.f32 %v1590_v28, %v1508_v33  ;;  %v1658_v35 = vadd.f32 %v1592_v14, %v1510_v11 }
 0x367   : > { %v2041_v49 = vrot.slane %v1870_v0, 1  ;;  %v9969_v59 = vrot.slane %v8625_v45, 1  ;;  %v10291_v22 = vrot.slane %v8432_v21, 1  ;;  %v2403_v21 = vmul.f32 %v8438_v44, %v10266_v24 }
 0x368   : > { %v3857_v47 = vsel %vm3767_vm6, %v10290_v29, %v3856_v19  ;;  %v4492_v60 = vsel %vm4305_vm7, %v8442_v50, %v8627_v54  ;;  %v3861_v37 = vsel %vm3767_vm6, %v3856_v19, %v9970_v26  ;;  %v1804_v63 = vadd.f32 %v1738_v31, %v1656_v43  ;;  %v8664_v29 = vld [vmem:[#allocation2 + $0x1c0] sm:$0xff] }
 0x369   : > { %v4009_v61 = vadd.f32 %v3857_v47, %v2926_v1  ;;  %4851 = vmatmul.mubr.bf16.gmra.mxu0 %v4492_v60  ;;  %v4011_v10 = vadd.f32 %v3861_v37, %v2928_v3  ;;  %v1806_v16 = vadd.f32 %v1740_v41, %v1658_v35  ;;  %v2042_v33 = vsel %vm1954_vm4, %v10291_v22, %v2041_v49 }
 0x36a   : > { %v2046_v50 = vsel %vm1954_vm4, %v2041_v49, %v9969_v59  ;;  %v2331_v19 = vmul.f32 %v8245_v4, %v10215_v58  ;;  %v2333_v1 = vmul.f32 %v8277_v55, %v10215_v58  ;;  %v2191_v11 = vmul.f32 %v2042_v33, %v1804_v63  ;;  %v10292_v49 = vld [vmem:[#allocation55_spill] sm:$0xff] }
 0x36b   : > { %v4087_v0 = vadd.f32 %v10267_v46, %v4009_v61  ;;  %v4089_v3 = vadd.f32 %v10267_v46, %v4011_v10  ;;  %v2193_v28 = vmul.f32 %v2046_v50, %v1806_v16  ;;  %v2405_v31 = vmul.f32 %v8473_v5, %v10266_v24  ;;  %v5351_v61 = vld [vmem:[%s10056_s1 + $0x360] sm:$0xff] }
 0x36c   : > { %v2541_v41 = vmul.f32 %v8632_v7, %v10280_v13  ;;  %v2543_v47 = vmul.f32 %v8664_v29, %v10280_v13  ;;  %v2467_v35 = vadd.f32 %v2403_v21, %v2331_v19  ;;  %v3003_v60 = vmul.f32 %v8245_v4, %v10292_v49  ;;  %v10293_v16 = vld [vmem:[#allocation58_spill] sm:$0xff] }
 0x36d   : > { %v4153_v14 = vmax.f32 %v4087_v0, 0.0  ;;  %v4155_v43 = vmax.f32 %v4089_v3, 0.0  ;;  %v3005_v37 = vmul.f32 %v8277_v55, %v10292_v49  ;;  %v2469_v63 = vadd.f32 %v2405_v31, %v2333_v1  ;;  %v8682_v0 = vld [vmem:[%s10056_s1 + $0x370] sm:$0xff] }
 0x36e   : > { %v3081_v22 = vmul.f32 %v8438_v44, %v10293_v16  ;;  %v3083_v33 = vmul.f32 %v8473_v5, %v10293_v16  ;;  %v2605_v50 = vadd.f32 %v2541_v41, %v2467_v35  ;;  %v3225_v19 = vmul.f32 %v8632_v7, %v10283_v48 }
 0x36f   : > { %v4219_v10 = vmin.f32 %v4153_v14, 6.0  ;;  %v4221_v4 = vmin.f32 %v4155_v43, 6.0  ;;  %v3227_v3 = vmul.f32 %v8664_v29, %v10283_v48  ;;  %v8688_v1 = vadd.f32 %v2543_v47, %v2469_v63 }
 0x370   : > { %v3147_v21 = vadd.f32 %v3081_v22, %v3003_v60  ;;  %v3149_v14 = vadd.f32 %v3083_v33, %v3005_v37  ;;  %v3529_v31 = vrot.slane %v5351_v61, 7  ;;  %v2775_v26 = vrot.slane %v2605_v50, 1 }
 0x371   : > { %v4263_v59 = vpack.c.bf16 %v4221_v4, %v4219_v10  ;;  %v9977_v18 = vrot.slane %v8682_v0, 7  ;;  %v1513_v32 = vmul.f32 %v10137_v51, %v8167_v39  ;;  %v9978_v41 = vrot.slane %v8688_v1, 1  ;;  %v8703_v10 = vld [vmem:[#allocation2 + $0x1d8] sm:$0xff] }
 0x372   : > { %v3291_v43 = vadd.f32 %v3225_v19, %v3147_v21  ;;  %v3293_v35 = vadd.f32 %v3227_v3, %v3149_v14  ;;  %v10294_v16 = vrot.slane %v8489_v52, 7  ;;  %v10295_v60 = vrot.slane %v8495_v56, 1  ;;  %v1875_v56 = vld [vmem:[%s10056_s1 + $0x188] sm:$0xff]  ;;  %v8729_v14 = vld [vmem:[%s10056_s1 + $0x198] sm:$0xff] }
 0x373   : > { %v4512_v47 = vshrl.u32 %v4263_v59, 16  ;;  %v4515_v63 = vshll.u32 %v4263_v59, 16  ;;  %v3534_v61 = vsel %vm3442_vm5, %v3529_v31, %v9977_v18  ;;  %v2780_v39 = vsel %vm1954_vm4, %v2775_v26, %v9978_v41 }
 0x374   : > { %v3530_v48 = vsel %vm3442_vm5, %v10294_v16, %v3529_v31  ;;  %v2776_v37 = vsel %vm1954_vm4, %v10295_v60, %v2775_v26  ;;  %v8708_v33 = vmul.f32 %v3534_v61, %v3293_v35  ;;  %v2927_v4 = vadd.f32 %v2780_v39, %v2193_v28 }
 0x375   : > { %v2925_v22 = vadd.f32 %v2776_v37, %v2191_v11  ;;  %v3679_v52 = vmul.f32 %v3530_v48, %v3291_v43  ;;  %v4514_v59 = vrot.slane %v4512_v47, 3  ;;  %v4517_v16 = vrot.slane %v4515_v63, 4 }
 0x376   : > { %v1515_v50 = vmul.f32 %v10137_v51, %v8318_v36  ;;  %v9976_v3 = vrot.slane %v8708_v33, 2  ;;  %v1595_v26 = vmul.f32 %v10141_v2, %v8362_v57  ;;  %v1597_v48 = vmul.f32 %v10141_v2, %v8512_v62 }
 0x377   : > { %v3854_v19 = vrot.slane %v3679_v52, 2  ;;  %v8720_v11 = vor.u32 %v4517_v16, %v4514_v59  ;;  %v1743_v21 = vmul.f32 %v6204_v40, %v8549_v8  ;;  %v1745_v28 = vmul.f32 %v6204_v40, %v8703_v10 }
 0x378   : > { %v2051_v31 = vrot.slane %v1875_v56, 1  ;;  %v10296_v43 = vrot.slane %v8517_v6, 2  ;;  %v1661_v63 = vadd.f32 %v1595_v26, %v1513_v32  ;;  %v1663_v60 = vadd.f32 %v1597_v48, %v1515_v50  ;;  %v8747_v50 = vld [vmem:[#allocation2 + $0x1e8] sm:$0xff] }
 0x379   : > { %v3859_v47 = vsel %vm3767_vm6, %v3854_v19, %v9976_v3  ;;  %v4519_v37 = vsel %vm4305_vm7, %v8538_v27, %v8720_v11  ;;  %v10297_v52 = vrot.slane %v8531_v42, 1  ;;  %v9975_v16 = vrot.slane %v8729_v14, 1 }
 0x37a   : > { %v3855_v35 = vsel %vm3767_vm6, %v10296_v43, %v3854_v19  ;;  %v4010_v39 = vadd.f32 %v3859_v47, %v2927_v4  ;;  %5394 = vmatprep.mubr.msk.bf16.mxu0 %vm442_vm3, %v4519_v37  ;;  %v1809_v6 = vadd.f32 %v1743_v21, %v1661_v63  ;;  %v1811_v59 = vadd.f32 %v1745_v28, %v1663_v60 }
 0x37b   : > { %v4008_v61 = vadd.f32 %v3855_v35, %v2925_v22  ;;  %v2052_v56 = vsel %vm1954_vm4, %v10297_v52, %v2051_v31  ;;  %v2336_v32 = vmul.f32 %v10143_v23, %v8318_v36  ;;  %v2338_v42 = vmul.f32 %v10143_v23, %v8362_v57 }
 0x37c   : > { %v4088_v27 = vadd.f32 %v10142_v30, %v4010_v39  ;;  %v2408_v22 = vmul.f32 %v6201_v38, %v8512_v62  ;;  %v2056_v4 = vsel %vm1954_vm4, %v2051_v31, %v9975_v16  ;;  %v2196_v26 = vmul.f32 %v2052_v56, %v1809_v6  ;;  %v10298_v6 = vld [vmem:[#allocation45_spill] sm:$0xff] }
 0x37d   : > { %v4086_v19 = vadd.f32 %v10142_v30, %v4008_v61  ;;  %v2410_v48 = vmul.f32 %v6201_v38, %v8549_v8  ;;  %v2546_v21 = vmul.f32 %v6265_v17, %v8703_v10  ;;  %v2198_v35 = vmul.f32 %v2056_v4, %v1811_v59  ;;  %v5356_v61 = vld [vmem:[%s10056_s1 + $0x388] sm:$0xff] }
 0x37e   : > { %v4154_v43 = vmax.f32 %v4088_v27, 0.0  ;;  %v2472_v47 = vadd.f32 %v2408_v22, %v2336_v32  ;;  %v2548_v60 = vmul.f32 %v6265_v17, %v8747_v50  ;;  %v3008_v37 = vmul.f32 %v10194_v9, %v8318_v36  ;;  %v8776_v32 = vld [vmem:[%s10056_s1 + $0x398] sm:$0xff] }
 0x37f   : > { %v4152_v28 = vmax.f32 %v4086_v19, 0.0  ;;  %v2474_v63 = vadd.f32 %v2410_v48, %v2338_v42  ;;  %v3010_v31 = vmul.f32 %v10194_v9, %v8362_v57  ;;  %v3086_v59 = vmul.f32 %v10298_v6, %v8512_v62  ;;  %v8785_v27 = vld [vmem:[%s9769_s7 + $0x18] ss:$0 sm:$0xff] }
 0x380   : > { %v4220_v52 = vmin.f32 %v4154_v43, 6.0  ;;  %v2610_v56 = vadd.f32 %v2546_v21, %v2472_v47  ;;  %v3088_v36 = vmul.f32 %v10298_v6, %v8549_v8  ;;  %10299 = vst [vmem:[#allocation39_spill] sm:$0xff] %v8785_v27  ;;  %v3230_v42 = vmul.f32 %v8785_v27, %v8703_v10 }
 0x381   : > { %v4218_v39 = vmin.f32 %v4152_v28, 6.0  ;;  %v8778_v19 = vadd.f32 %v2548_v60, %v2474_v63  ;;  %v3232_v22 = vmul.f32 %v8785_v27, %v8747_v50  ;;  %v3152_v21 = vadd.f32 %v3086_v59, %v3008_v37 }
 0x382   : > { %v2785_v48 = vrot.slane %v2610_v56, 1  ;;  %v3539_v28 = vrot.slane %v5356_v61, 7  ;;  %v3154_v47 = vadd.f32 %v3088_v36, %v3010_v31  ;;  %v9982_v63 = vrot.slane %v8776_v32, 7 }
 0x383   : > { %v4262_v4 = vpack.c.bf16 %v4220_v52, %v4218_v39  ;;  %v9983_v43 = vrot.slane %v8778_v19, 1  ;;  %v1512_v60 = vmul.f32 %v8277_v55, %v10148_v25  ;;  %v10300_v18 = vrot.slane %v8591_v34, 1 }
 0x384   : > { %v3296_v6 = vadd.f32 %v3230_v42, %v3152_v21  ;;  %v3298_v39 = vadd.f32 %v3232_v22, %v3154_v47  ;;  %v10301_v31 = vrot.slane %v8587_v53, 7  ;;  %v3544_v34 = vsel %vm3442_vm5, %v3539_v28, %v9982_v63 }
 0x385   : > { %v4503_v16 = vshrl.u32 %v4262_v4, 16  ;;  %v4506_v3 = vshll.u32 %v4262_v4, 16  ;;  %v2786_v41 = vsel %vm1954_vm4, %v10300_v18, %v2785_v48  ;;  %v2790_v37 = vsel %vm1954_vm4, %v2785_v48, %v9983_v43  ;;  %v1874_v18 = vld [vmem:[%s10056_s1 + $0x180] sm:$0xff] }
 0x386   : > { %v2930_v61 = vadd.f32 %v2786_v41, %v2196_v26  ;;  %v3540_v52 = vsel %vm3442_vm5, %v10301_v31, %v3539_v28  ;;  %v2932_v55 = vadd.f32 %v2790_v37, %v2198_v35  ;;  %v8810_v42 = vmul.f32 %v3544_v34, %v3298_v39 }
 0x387   : > { %v4505_v56 = vrot.slane %v4503_v16, 3  ;;  %v4508_v59 = vrot.slane %v4506_v3, 4  ;;  %v3684_v36 = vmul.f32 %v3540_v52, %v3296_v6  ;;  %v1514_v41 = vmul.f32 %v8438_v44, %v10148_v25  ;;  %v8819_v3 = vld [vmem:[%s10056_s1 + $0x190] sm:$0xff] }
 0x388   : > { %v1594_v53 = vmul.f32 %v8473_v5, %v10149_v15  ;;  %v1596_v26 = vmul.f32 %v8632_v7, %v10149_v15  ;;  %v1742_v35 = vmul.f32 %v8664_v29, %v6284_v12  ;;  %v8827_v6 = vld [vmem:[#allocation2 + $0x1d0] sm:$0xff]  ;;  %v9981_v48 = vrot.slane %v8810_v42, 2 }
 0x389   : > { %v8821_v16 = vor.u32 %v4508_v59, %v4505_v56  ;;  %v1744_v22 = vmul.f32 %v8827_v6, %v6284_v12  ;;  %v3864_v4 = vrot.slane %v3684_v36, 2  ;;  %v2049_v28 = vrot.slane %v1874_v18, 1 }
 0x38a   : > { %v1660_v21 = vadd.f32 %v1594_v53, %v1512_v60  ;;  %v1662_v37 = vadd.f32 %v1596_v26, %v1514_v41  ;;  %v9980_v39 = vrot.slane %v8819_v3, 1  ;;  %v2335_v31 = vmul.f32 %v8438_v44, %v10215_v58 }
 0x38b   : > { %v4510_v47 = vsel %vm4305_vm7, %v8627_v54, %v8821_v16  ;;  %v10302_v52 = vrot.slane %v8611_v20, 2  ;;  %v3869_v60 = vsel %vm3767_vm6, %v3864_v4, %v9981_v48  ;;  %v10303_v34 = vrot.slane %v8625_v45, 1 }
 0x38c   : > { %4859 = vmatmul.mubr.bf16.gmra.mxu0 %v4510_v47  ;;  %v1808_v59 = vadd.f32 %v1742_v35, %v1660_v21  ;;  %v4015_v36 = vadd.f32 %v3869_v60, %v2932_v55  ;;  %v1810_v41 = vadd.f32 %v1744_v22, %v1662_v37  ;;  %v2054_v53 = vsel %vm1954_vm4, %v2049_v28, %v9980_v39 }
 0x38d   : > { %v3865_v56 = vsel %vm3767_vm6, %v10302_v52, %v3864_v4  ;;  %v2050_v54 = vsel %vm1954_vm4, %v10303_v34, %v2049_v28  ;;  %v2337_v20 = vmul.f32 %v8473_v5, %v10215_v58  ;;  %v2407_v47 = vmul.f32 %v8632_v7, %v10266_v24  ;;  %v8860_v28 = vld [vmem:[#allocation2 + $0x1e0] sm:$0xff] }
 0x38e   : > { %v4013_v18 = vadd.f32 %v3865_v56, %v2930_v61  ;;  %v2195_v26 = vmul.f32 %v2050_v54, %v1808_v59  ;;  %v2409_v35 = vmul.f32 %v8664_v29, %v10266_v24  ;;  %v4093_v61 = vadd.f32 %v10267_v46, %v4015_v36  ;;  %v10304_v34 = vld [vmem:[#allocation58_spill] sm:$0xff] }
 0x38f   : > { %v2197_v55 = vmul.f32 %v2054_v53, %v1810_v41  ;;  %v2545_v22 = vmul.f32 %v8827_v6, %v10280_v13  ;;  %v2471_v4 = vadd.f32 %v2407_v47, %v2335_v31  ;;  %v2547_v37 = vmul.f32 %v8860_v28, %v10280_v13  ;;  %v5355_v31 = vld [vmem:[%s10056_s1 + $0x380] sm:$0xff] }
 0x390   : > { %v4091_v45 = vadd.f32 %v10267_v46, %v4013_v18  ;;  %v2473_v21 = vadd.f32 %v2409_v35, %v2337_v20  ;;  %v3007_v52 = vmul.f32 %v8438_v44, %v10292_v49  ;;  %v4159_v60 = vmax.f32 %v4093_v61, 0.0  ;;  %v10305_v53 = vld [vmem:[#allocation85_spill] sm:$0xff]  ;;  %v8882_v20 = vld [vmem:[%s10056_s1 + $0x390] sm:$0xff] }
 0x391   : > { %v3009_v59 = vmul.f32 %v8473_v5, %v10292_v49  ;;  %v3085_v54 = vmul.f32 %v8632_v7, %v10304_v34  ;;  %v2609_v18 = vadd.f32 %v2545_v22, %v2471_v4  ;;  %v3087_v41 = vmul.f32 %v8664_v29, %v10304_v34 }
 0x392   : > { %v4157_v56 = vmax.f32 %v4091_v45, 0.0  ;;  %v8873_v36 = vadd.f32 %v2547_v37, %v2473_v21  ;;  %v3229_v44 = vmul.f32 %v8827_v6, %v10305_v53  ;;  %v4225_v35 = vmin.f32 %v4159_v60, 6.0 }
 0x393   : > { %v3151_v45 = vadd.f32 %v3085_v54, %v3007_v52  ;;  %v3231_v61 = vmul.f32 %v8860_v28, %v10305_v53  ;;  %v2783_v22 = vrot.slane %v2609_v18, 1  ;;  %v3153_v21 = vadd.f32 %v3087_v41, %v3009_v59 }
 0x394   : > { %v4223_v47 = vmin.f32 %v4157_v56, 6.0  ;;  %v9988_v4 = vrot.slane %v8873_v36, 1  ;;  %v3537_v37 = vrot.slane %v5355_v31, 7  ;;  %v9987_v63 = vrot.slane %v8882_v20, 7  ;;  %v8899_v31 = vld [vmem:[#allocation2 + $0x1f8] sm:$0xff] }
 0x395   : > { %v3295_v48 = vadd.f32 %v3229_v44, %v3151_v45  ;;  %v1517_v43 = vmul.f32 %v10137_v51, %v8362_v57  ;;  %v10306_v34 = vrot.slane %v8688_v1, 1  ;;  %v3297_v60 = vadd.f32 %v3231_v61, %v3153_v21 }
 0x396   : > { %v4265_v39 = vpack.c.bf16 %v4225_v35, %v4223_v47  ;;  %v2788_v52 = vsel %vm1954_vm4, %v2783_v22, %v9988_v4  ;;  %v10307_v54 = vrot.slane %v8682_v0, 7  ;;  %v3542_v57 = vsel %vm3442_vm5, %v3537_v37, %v9987_v63  ;;  %v1879_v0 = vld [vmem:[%s10056_s1 + $0x1a8] sm:$0xff] }
 0x397   : > { %v2784_v56 = vsel %vm1954_vm4, %v10306_v34, %v2783_v22  ;;  %v2931_v44 = vadd.f32 %v2788_v52, %v2197_v55  ;;  %v1519_v34 = vmul.f32 %v10137_v51, %v8512_v62  ;;  %v1599_v47 = vmul.f32 %v10141_v2, %v8549_v8 }
 0x398   : > { %v3538_v59 = vsel %vm3442_vm5, %v10307_v54, %v3537_v37  ;;  %v4530_v18 = vshrl.u32 %v4265_v39, 16  ;;  %v4533_v41 = vshll.u32 %v4265_v39, 16  ;;  %v2929_v53 = vadd.f32 %v2784_v56, %v2195_v26 }
 0x399   : > { %v3683_v1 = vmul.f32 %v3538_v59, %v3295_v48  ;;  %v8911_v39 = vmul.f32 %v3542_v57, %v3297_v60  ;;  %v1601_v26 = vmul.f32 %v10141_v2, %v8703_v10  ;;  %v8918_v48 = vld [vmem:[%s10056_s1 + $0x1b8] sm:$0xff]  ;;  %v1665_v61 = vadd.f32 %v1599_v47, %v1517_v43  ;;  %v8933_v57 = vld [vmem:[#allocation2 + $0x208] sm:$0xff] }
 0x39a   : > { %v4532_v35 = vrot.slane %v4530_v18, 3  ;;  %v4535_v45 = vrot.slane %v4533_v41, 4  ;;  %v1747_v22 = vmul.f32 %v6204_v40, %v8747_v50  ;;  %v1749_v21 = vmul.f32 %v6204_v40, %v8899_v31 }
 0x39b   : > { %v3862_v55 = vrot.slane %v3683_v1, 2  ;;  %v9986_v56 = vrot.slane %v8911_v39, 2  ;;  %v1667_v52 = vadd.f32 %v1601_v26, %v1519_v34  ;;  %v2059_v60 = vrot.slane %v1879_v0, 1 }
 0x39c   : > { %v8924_v37 = vor.u32 %v4535_v45, %v4532_v35  ;;  %v10308_v54 = vrot.slane %v8708_v33, 2  ;;  %v1813_v18 = vadd.f32 %v1747_v22, %v1665_v61  ;;  %v9985_v41 = vrot.slane %v8918_v48, 1 }
 0x39d   : > { %v2340_v43 = vmul.f32 %v10143_v23, %v8512_v62  ;;  %v3867_v34 = vsel %vm3767_vm6, %v3862_v55, %v9986_v56  ;;  %v1815_v33 = vadd.f32 %v1749_v21, %v1667_v52  ;;  %v10309_v35 = vrot.slane %v8729_v14, 1  ;;  %v8953_v21 = vpop.f32.mrf.mxu0 }
 0x39e   : > { %v3863_v59 = vsel %vm3767_vm6, %v10308_v54, %v3862_v55  ;;  %v4537_v1 = vsel %vm4305_vm7, %v8720_v11, %v8924_v37  ;;  %v4014_v0 = vadd.f32 %v3867_v34, %v2931_v44  ;;  %v2064_v26 = vsel %vm1954_vm4, %v2059_v60, %v9985_v41  ;;  %10310 = vst [vmem:[#allocation63_spill] sm:$0xff] %v8953_v21 }
 0x39f   : > { %v4012_v47 = vadd.f32 %v3863_v59, %v2929_v53  ;;  %5395 = vmatprep.mubr.msk.bf16.mxu0 %vm442_vm3, %v4537_v1  ;;  %v2060_v45 = vsel %vm1954_vm4, %v10309_v35, %v2059_v60  ;;  %v2342_v11 = vmul.f32 %v10143_v23, %v8549_v8  ;;  %v2202_v55 = vmul.f32 %v2064_v26, %v1815_v33  ;;  %v4782_v34 = vpop.f32.mrf.mxu0  ;;  %v5360_v26 = vld [vmem:[%s10056_s1 + $0x3a8] sm:$0xff] }
 0x3a0   : > { %v2200_v22 = vmul.f32 %v2060_v45, %v1813_v18  ;;  %v2412_v53 = vmul.f32 %v6201_v38, %v8703_v10  ;;  %v4092_v14 = vadd.f32 %v10142_v30, %v4014_v0  ;;  %v2414_v44 = vmul.f32 %v6201_v38, %v8747_v50  ;;  %v10311_v0 = vld [vmem:[#allocation45_spill] sm:$0xff] }
 0x3a1   : > { %v4090_v61 = vadd.f32 %v10142_v30, %v4012_v47  ;;  %v2550_v52 = vmul.f32 %v6265_v17, %v8899_v31  ;;  %v2552_v60 = vmul.f32 %v6265_v17, %v8933_v57  ;;  %v3012_v18 = vmul.f32 %v10194_v9, %v8512_v62  ;;  %v8976_v62 = vld [vmem:[%s10056_s1 + $0x3b8] sm:$0xff] }
 0x3a2   : > { %v2476_v59 = vadd.f32 %v2412_v53, %v2340_v43  ;;  %v3014_v1 = vmul.f32 %v10194_v9, %v8549_v8  ;;  %v4158_v47 = vmax.f32 %v4092_v14, 0.0  ;;  %v2478_v33 = vadd.f32 %v2414_v44, %v2342_v11  ;;  %v8982_v14 = vpop.f32.mrf.mxu0 }
 0x3a3   : > { %v4156_v54 = vmax.f32 %v4090_v61, 0.0  ;;  %v3090_v35 = vmul.f32 %v10311_v0, %v8703_v10  ;;  %v3092_v45 = vmul.f32 %v10311_v0, %v8747_v50  ;;  %v3234_v11 = vmul.f32 %v8785_v27, %v8899_v31  ;;  %10312 = vst [vmem:[#allocation64_spill] sm:$0xff] %v8982_v14 }
 0x3a4   : > { %v2614_v61 = vadd.f32 %v2550_v52, %v2476_v59  ;;  %v3236_v53 = vmul.f32 %v8785_v27, %v8933_v57  ;;  %v4224_v44 = vmin.f32 %v4158_v47, 6.0  ;;  %v8984_v34 = vadd.f32 %v2552_v60, %v2478_v33 }
 0x3a5   : > { %v4222_v43 = vmin.f32 %v4156_v54, 6.0  ;;  %v3156_v41 = vadd.f32 %v3090_v35, %v3012_v18  ;;  %v3158_v56 = vadd.f32 %v3092_v45, %v3014_v1  ;;  %v3547_v4 = vrot.slane %v5360_v26, 7  ;;  %v4785_v54 = vpop.f32.mrf.mxu0 }
 0x3a6   : > { %v2793_v63 = vrot.slane %v2614_v61, 1  ;;  %v9995_v21 = vrot.slane %v8976_v62, 7  ;;  %v1516_v52 = vmul.f32 %v8473_v5, %v10148_v25  ;;  %v9996_v0 = vrot.slane %v8984_v34, 1  ;;  %v9016_v61 = vld [vmem:[%s10056_s1 + $0x1b0] sm:$0xff] }
 0x3a7   : > { %v4264_v59 = vpack.c.bf16 %v4224_v44, %v4222_v43  ;;  %v3300_v9 = vadd.f32 %v3234_v11, %v3156_v41  ;;  %v3302_v27 = vadd.f32 %v3236_v53, %v3158_v56  ;;  %v10313_v14 = vrot.slane %v8778_v19, 1  ;;  %v9001_v33 = vpop.f32.mrf.mxu0  ;;  %v9023_v44 = vld [vmem:[#allocation2 + $0x1f0] sm:$0xff] }
 0x3a8   : > { %v10314_v18 = vrot.slane %v8776_v32, 7  ;;  %v3552_v47 = vsel %vm3442_vm5, %v3547_v4, %v9995_v21  ;;  %v1518_v5 = vmul.f32 %v8632_v7, %v10148_v25  ;;  %10315 = vst [vmem:[#allocation65_spill] sm:$0xff] %v9001_v33  ;;  %v2798_v19 = vsel %vm1954_vm4, %v2793_v63, %v9996_v0 }
 0x3a9   : > { %v2794_v60 = vsel %vm1954_vm4, %v10313_v14, %v2793_v63  ;;  %v4521_v35 = vshrl.u32 %v4264_v59, 16  ;;  %v4524_v41 = vshll.u32 %v4264_v59, 16  ;;  %v2936_v45 = vadd.f32 %v2798_v19, %v2202_v55  ;;  %v4790_v11 = vpop.f32.mrf.mxu0 }
 0x3aa   : > { %v3548_v1 = vsel %vm3442_vm5, %v10314_v18, %v3547_v4  ;;  %v2934_v56 = vadd.f32 %v2794_v60, %v2200_v22  ;;  %v9006_v26 = vmul.f32 %v3552_v47, %v3302_v27  ;;  %v1598_v43 = vmul.f32 %v8664_v29, %v10149_v15  ;;  %v1878_v4 = vld [vmem:[%s10056_s1 + $0x1a0] sm:$0xff] }
 0x3ab   : > { %v3688_v32 = vmul.f32 %v3548_v1, %v3300_v9  ;;  %v4523_v53 = vrot.slane %v4521_v35, 3  ;;  %v4526_v63 = vrot.slane %v4524_v41, 4  ;;  %v1600_v9 = vmul.f32 %v8827_v6, %v10149_v15  ;;  %v9027_v59 = vpop.f32.mrf.mxu0 }
 0x3ac   : > { %v1746_v27 = vmul.f32 %v8860_v28, %v6284_v12  ;;  %v9994_v55 = vrot.slane %v9006_v26, 2  ;;  %v1664_v14 = vadd.f32 %v1598_v43, %v1516_v52  ;;  %v1748_v54 = vmul.f32 %v9023_v44, %v6284_v12  ;;  %10316 = vst [vmem:[#allocation40_spill] sm:$0xff] %v9027_v59 }
 0x3ad   : > { %v3872_v22 = vrot.slane %v3688_v32, 2  ;;  %v9029_v60 = vor.u32 %v4526_v63, %v4523_v53  ;;  %v1666_v18 = vadd.f32 %v1600_v9, %v1518_v5  ;;  %v2057_v1 = vrot.slane %v1878_v4, 1  ;;  %v4793_v43 = vpop.f32.mrf.mxu0 }
 0x3ae   : > { %v9993_v47 = vrot.slane %v9016_v61, 1  ;;  %v10317_v35 = vrot.slane %v8810_v42, 2  ;;  %v1812_v19 = vadd.f32 %v1746_v27, %v1664_v14  ;;  %v2339_v32 = vmul.f32 %v8632_v7, %v10215_v58 }
 0x3af   : > { %v3877_v52 = vsel %vm3767_vm6, %v3872_v22, %v9994_v55  ;;  %v4528_v5 = vsel %vm4305_vm7, %v8821_v16, %v9029_v60  ;;  %v1814_v53 = vadd.f32 %v1748_v54, %v1666_v18  ;;  %v10318_v42 = vrot.slane %v8819_v3, 1  ;;  %v9053_v14 = vpop.f32.mrf.mxu0 }
 0x3b0   : > { %v3873_v41 = vsel %vm3767_vm6, %v10317_v35, %v3872_v22  ;;  %v4019_v11 = vadd.f32 %v3877_v52, %v2936_v45  ;;  %4867 = vmatmul.mubr.bf16.gmra.mxu0 %v4528_v5  ;;  %v2062_v9 = vsel %vm1954_vm4, %v2057_v1, %v9993_v47  ;;  %v2341_v27 = vmul.f32 %v8664_v29, %v10215_v58  ;;  %v9061_v35 = vld [vmem:[#allocation2 + $0x200] sm:$0xff] }
 0x3b1   : > { %v4017_v4 = vadd.f32 %v3873_v41, %v2934_v56  ;;  %v2058_v63 = vsel %vm1954_vm4, %v10318_v42, %v2057_v1  ;;  %v2411_v22 = vmul.f32 %v8827_v6, %v10266_v24  ;;  %10319 = vst [vmem:[#allocation52_spill] sm:$0xff] %v9053_v14  ;;  %v2201_v3 = vmul.f32 %v2062_v9, %v1814_v53  ;;  %v4798_v52 = vpop.f32.mrf.mxu0  ;;  %v5359_v9 = vld [vmem:[%s10056_s1 + $0x3a0] sm:$0xff] }
 0x3b2   : > { %v4097_v56 = vadd.f32 %v10267_v46, %v4019_v11  ;;  %v2199_v45 = vmul.f32 %v2058_v63, %v1812_v19  ;;  %v2413_v54 = vmul.f32 %v8860_v28, %v10266_v24  ;;  %v2549_v1 = vmul.f32 %v9023_v44, %v10280_v13 }
 0x3b3   : > { %v4095_v16 = vadd.f32 %v10267_v46, %v4017_v4  ;;  %v2475_v18 = vadd.f32 %v2411_v22, %v2339_v32  ;;  %v2551_v41 = vmul.f32 %v9061_v35, %v10280_v13  ;;  %v3011_v4 = vmul.f32 %v8632_v7, %v10292_v49  ;;  %v10320_v32 = vld [vmem:[#allocation58_spill] sm:$0xff]  ;;  %v9079_v22 = vld [vmem:[%s10056_s1 + $0x3b0] sm:$0xff]  ;;  %v9081_v7 = vpop.f32.mrf.mxu0 }
 0x3b4   : > { %v4163_v5 = vmax.f32 %v4097_v56, 0.0  ;;  %v3013_v19 = vmul.f32 %v8664_v29, %v10292_v49  ;;  %v2477_v11 = vadd.f32 %v2413_v54, %v2341_v27  ;;  %v3089_v42 = vmul.f32 %v8827_v6, %v10320_v32  ;;  %10321 = vst [vmem:[#allocation41_spill] sm:$0xff] %v9081_v7  ;;  %v9086_v56 = vld [vmem:[%s9769_s7 + $0x10] ss:$0 sm:$0xff] }
 0x3b5   : > { %v4161_v43 = vmax.f32 %v4095_v16, 0.0  ;;  %v2613_v53 = vadd.f32 %v2549_v1, %v2475_v18  ;;  %v3091_v63 = vmul.f32 %v8860_v28, %v10320_v32  ;;  %10322 = vst [vmem:[#allocation66_spill] sm:$0xff] %v9086_v56  ;;  %v3233_v54 = vmul.f32 %v9086_v56, %v9023_v44  ;;  %v4801_v21 = vpop.f32.mrf.mxu0 }
 0x3b6   : > { %v4229_v27 = vmin.f32 %v4163_v5, 6.0  ;;  %v3235_v18 = vmul.f32 %v9086_v56, %v9061_v35  ;;  %v9092_v1 = vadd.f32 %v2551_v41, %v2477_v11  ;;  %v3155_v47 = vadd.f32 %v3089_v42, %v3011_v4 }
 0x3b7   : > { %v4227_v16 = vmin.f32 %v4161_v43, 6.0  ;;  %v2791_v52 = vrot.slane %v2613_v53, 1  ;;  %v3157_v55 = vadd.f32 %v3091_v63, %v3013_v19  ;;  %v3545_v43 = vrot.slane %v5359_v9, 7  ;;  %v9101_v11 = vpop.f32.mrf.mxu0 }
 0x3b8   : > { %v10001_v5 = vrot.slane %v9079_v22, 7  ;;  %v1521_v33 = vmul.f32 %v10137_v51, %v8549_v8  ;;  %v10323_v59 = vrot.slane %v8873_v36, 1  ;;  %v10002_v7 = vrot.slane %v9092_v1, 1  ;;  %10324 = vst [vmem:[#allocation67_spill] sm:$0xff] %v9101_v11 }
 0x3b9   : > { %v4267_v0 = vpack.c.bf16 %v4229_v27, %v4227_v16  ;;  %v3299_v56 = vadd.f32 %v3233_v54, %v3155_v47  ;;  %v3301_v41 = vadd.f32 %v3235_v18, %v3157_v55  ;;  %v10325_v53 = vrot.slane %v8882_v20, 7  ;;  %v9114_v47 = vld [vmem:[#allocation2 + $0x218] sm:$0xff]  ;;  %v1883_v20 = vld [vmem:[%s10056_s1 + $0x1c8] sm:$0xff] }
 0x3ba   : > { %v2792_v14 = vsel %vm1954_vm4, %v10323_v59, %v2791_v52  ;;  %v2796_v8 = vsel %vm1954_vm4, %v2791_v52, %v10002_v7  ;;  %v3550_v36 = vsel %vm3442_vm5, %v3545_v43, %v10001_v5  ;;  %v1523_v55 = vmul.f32 %v10137_v51, %v8703_v10  ;;  %v9124_v16 = vld [vmem:[%s10056_s1 + $0x1d8] sm:$0xff] }
 0x3bb   : > { %v4548_v4 = vshrl.u32 %v4267_v0, 16  ;;  %v4551_v19 = vshll.u32 %v4267_v0, 16  ;;  %v2933_v21 = vadd.f32 %v2792_v14, %v2199_v45  ;;  %v3546_v42 = vsel %vm3442_vm5, %v10325_v53, %v3545_v43  ;;  %v4806_v0 = vpop.f32.mrf.mxu0 }
 0x3bc   : > { %v3687_v59 = vmul.f32 %v3546_v42, %v3299_v56  ;;  %v2935_v63 = vadd.f32 %v2796_v8, %v2201_v3  ;;  %v9119_v9 = vmul.f32 %v3550_v36, %v3301_v41  ;;  %v1603_v56 = vmul.f32 %v10141_v2, %v8747_v50 }
 0x3bd   : > { %v4550_v14 = vrot.slane %v4548_v4, 3  ;;  %v4553_v45 = vrot.slane %v4551_v19, 4  ;;  %v1605_v54 = vmul.f32 %v10141_v2, %v8899_v31  ;;  %v1751_v18 = vmul.f32 %v6204_v40, %v8933_v57  ;;  %v9132_v52 = vpop.f32.mrf.mxu0 }
 0x3be   : > { %v3870_v27 = vrot.slane %v3687_v59, 2  ;;  %10326 = vst [vmem:[#allocation68_spill] sm:$0xff] %v9132_v52  ;;  %v10000_v43 = vrot.slane %v9119_v9, 2  ;;  %v1753_v41 = vmul.f32 %v6204_v40, %v9114_v47  ;;  %v2067_v4 = vrot.slane %v1883_v20, 1 }
 0x3bf   : > { %v9134_v3 = vor.u32 %v4553_v45, %v4550_v14  ;;  %v10327_v19 = vrot.slane %v8911_v39, 2  ;;  %v1669_v42 = vadd.f32 %v1603_v56, %v1521_v33  ;;  %v1671_v8 = vadd.f32 %v1605_v54, %v1523_v55  ;;  %v4809_v59 = vpop.f32.mrf.mxu0  ;;  %v9153_v55 = vld [vmem:[#allocation2 + $0x228] sm:$0xff] }
 0x3c0   : > { %v9999_v36 = vrot.slane %v9124_v16, 1  ;;  %v3875_v14 = vsel %vm3767_vm6, %v3870_v27, %v10000_v43  ;;  %v10328_v20 = vrot.slane %v8918_v48, 1  ;;  %v2344_v48 = vmul.f32 %v10143_v23, %v8703_v10 }
 0x3c1   : > { %v3871_v53 = vsel %vm3767_vm6, %v10327_v19, %v3870_v27  ;;  %v4555_v0 = vsel %vm4305_vm7, %v8924_v37, %v9134_v3  ;;  %v4018_v33 = vadd.f32 %v3875_v14, %v2935_v63  ;;  %v1817_v56 = vadd.f32 %v1751_v18, %v1669_v42  ;;  %v9158_v19 = vpop.f32.mrf.mxu0 }
 0x3c2   : > { %v4016_v45 = vadd.f32 %v3871_v53, %v2933_v21  ;;  %v2068_v39 = vsel %vm1954_vm4, %v10328_v20, %v2067_v4  ;;  %5396 = vmatprep.mubr.msk.bf16.mxu0 %vm442_vm3, %v4555_v0  ;;  %v1819_v54 = vadd.f32 %v1753_v41, %v1671_v8  ;;  %v2072_v37 = vsel %vm1954_vm4, %v2067_v4, %v9999_v36  ;;  %v10330_v36 = vld [vmem:[#allocation42_spill] sm:$0xff] }
 0x3c3   : > { %10329 = vst [vmem:[#allocation43_spill] sm:$0xff] %v9158_v19  ;;  %v2346_v21 = vmul.f32 %v10143_v23, %v8747_v50  ;;  %v2416_v63 = vmul.f32 %v6201_v38, %v8899_v31  ;;  %v4096_v18 = vadd.f32 %v10142_v30, %v4018_v33  ;;  %v2204_v41 = vmul.f32 %v2068_v39, %v1817_v56  ;;  %v4814_v42 = vpop.f32.mrf.mxu0  ;;  %v5364_v33 = vld [vmem:[%s10056_s1 + $0x3c8] sm:$0xff] }
 0x3c4   : > { %v4094_v27 = vadd.f32 %v10142_v30, %v4016_v45  ;;  %v2206_v53 = vmul.f32 %v2072_v37, %v1819_v54  ;;  %v2418_v4 = vmul.f32 %v6201_v38, %v8933_v57  ;;  %v2554_v0 = vmul.f32 %v6265_v17, %v9114_v47 }
 0x3c5   : > { %v2480_v59 = vadd.f32 %v2416_v63, %v2344_v48  ;;  %v2556_v14 = vmul.f32 %v6265_v17, %v9153_v55  ;;  %v4162_v45 = vmax.f32 %v4096_v18, 0.0  ;;  %v3016_v43 = vmul.f32 %v10330_v36, %v8703_v10  ;;  %v9181_v56 = vpop.f32.mrf.mxu0  ;;  %v9190_v10 = vld [vmem:[%s10056_s1 + $0x3d8] sm:$0xff] }
 0x3c6   : > { %v4160_v8 = vmax.f32 %v4094_v27, 0.0  ;;  %v2482_v20 = vadd.f32 %v2418_v4, %v2346_v21  ;;  %v3018_v39 = vmul.f32 %v10330_v36, %v8747_v50  ;;  %10331 = vst [vmem:[#allocation46_spill] sm:$0xff] %v9181_v56  ;;  %v10332_v27 = vld [vmem:[#allocation45_spill] sm:$0xff]  ;;  %v10333_v4 = vld [vmem:[#allocation39_spill] sm:$0xff]  ;;  %v3555_v11 = vrot.slane %v5364_v33, 7 }
 0x3c7   : > { %v2618_v37 = vadd.f32 %v2554_v0, %v2480_v59  ;;  %v3094_v48 = vmul.f32 %v10332_v27, %v8899_v31  ;;  %v3096_v21 = vmul.f32 %v10332_v27, %v8933_v57  ;;  %v4228_v63 = vmin.f32 %v4162_v45, 6.0  ;;  %v4817_v59 = vpop.f32.mrf.mxu0 }
 0x3c8   : > { %v4226_v54 = vmin.f32 %v4160_v8, 6.0  ;;  %v9192_v18 = vadd.f32 %v2556_v14, %v2482_v20  ;;  %v3238_v42 = vmul.f32 %v10333_v4, %v9114_v47  ;;  %v3240_v8 = vmul.f32 %v10333_v4, %v9153_v55 }
 0x3c9   : > { %v2801_v0 = vrot.slane %v2618_v37, 1  ;;  %v3160_v5 = vadd.f32 %v3094_v48, %v3016_v43  ;;  %v3162_v7 = vadd.f32 %v3096_v21, %v3018_v39  ;;  %v10005_v56 = vrot.slane %v9190_v10, 7  ;;  %v9202_v45 = vpop.f32.mrf.mxu0 }
 0x3ca   : > { %v4266_v52 = vpack.c.bf16 %v4228_v63, %v4226_v54  ;;  %v10006_v19 = vrot.slane %v9192_v18, 1  ;;  %v1520_v14 = vmul.f32 %v8664_v29, %v10148_v25  ;;  %10334 = vst [vmem:[#allocation69_spill] sm:$0xff] %v9202_v45  ;;  %v10335_v20 = vrot.slane %v8984_v34, 1  ;;  %v9213_v29 = vld [vmem:[#allocation2 + $0x210] sm:$0xff] }
 0x3cb   : > { %v3304_v4 = vadd.f32 %v3238_v42, %v3160_v5  ;;  %v3306_v59 = vadd.f32 %v3240_v8, %v3162_v7  ;;  %v10336_v43 = vrot.slane %v8976_v62, 7  ;;  %v4822_v21 = vpop.f32.mrf.mxu0  ;;  %v3560_v34 = vsel %vm3442_vm5, %v3555_v11, %v10005_v56  ;;  %v1882_v5 = vld [vmem:[%s10056_s1 + $0x1c0] sm:$0xff] }
 0x3cc   : > { %v2802_v27 = vsel %vm1954_vm4, %v10335_v20, %v2801_v0  ;;  %v4539_v33 = vshrl.u32 %v4266_v52, 16  ;;  %v4542_v54 = vshll.u32 %v4266_v52, 16  ;;  %v2806_v37 = vsel %vm1954_vm4, %v2801_v0, %v10006_v19 }
 0x3cd   : > { %v3556_v39 = vsel %vm3442_vm5, %v10336_v43, %v3555_v11  ;;  %v2938_v48 = vadd.f32 %v2802_v27, %v2204_v41  ;;  %v2940_v63 = vadd.f32 %v2806_v37, %v2206_v53  ;;  %v1522_v62 = vmul.f32 %v8827_v6, %v10148_v25  ;;  %v9230_v53 = vld [vmem:[%s10056_s1 + $0x1d0] sm:$0xff]  ;;  %v9232_v11 = vpop.f32.mrf.mxu0 }
 0x3ce   : > { %v3692_v7 = vmul.f32 %v3556_v39, %v3304_v4  ;;  %v4541_v52 = vrot.slane %v4539_v33, 3  ;;  %v4544_v42 = vrot.slane %v4542_v54, 4  ;;  %v9223_v8 = vmul.f32 %v3560_v34, %v3306_v59  ;;  %10337 = vst [vmem:[#allocation83_spill] sm:$0xff] %v9232_v11 }
 0x3cf   : > { %v1602_v41 = vmul.f32 %v8860_v28, %v10149_v15  ;;  %v1604_v4 = vmul.f32 %v9023_v44, %v10149_v15  ;;  %v1750_v0 = vmul.f32 %v9061_v35, %v6284_v12  ;;  %v1752_v20 = vmul.f32 %v6284_v12, %v9213_v29  ;;  %v4825_v54 = vpop.f32.mrf.mxu0 }
 0x3d0   : > { %v3880_v27 = vrot.slane %v3692_v7, 2  ;;  %v9240_v59 = vor.u32 %v4544_v42, %v4541_v52  ;;  %v10008_v43 = vrot.slane %v9223_v8, 2  ;;  %v2065_v33 = vrot.slane %v1882_v5, 1 }
 0x3d1   : > { %v1668_v39 = vadd.f32 %v1602_v41, %v1520_v14  ;;  %v10338_v37 = vrot.slane %v9006_v26, 2  ;;  %v1670_v34 = vadd.f32 %v1604_v4, %v1522_v62  ;;  %v10007_v7 = vrot.slane %v9230_v53, 1  ;;  %v9255_v41 = vpop.f32.mrf.mxu0  ;;  %v9257_v62 = vld [vmem:[#allocation2 + $0x220] sm:$0xff] }
 0x3d2   : > { %v2343_v56 = vmul.f32 %v8827_v6, %v10215_v58  ;;  %v4546_v52 = vsel %vm4305_vm7, %v9029_v60, %v9240_v59  ;;  %v3885_v14 = vsel %vm3767_vm6, %v3880_v27, %v10008_v43  ;;  %10339 = vst [vmem:[#allocation86_spill] sm:$0xff] %v9255_v41  ;;  %v10340_v54 = vrot.slane %v9016_v61, 1 }
 0x3d3   : > { %v3881_v21 = vsel %vm3767_vm6, %v10338_v37, %v3880_v27  ;;  %v1816_v42 = vadd.f32 %v1750_v0, %v1668_v39  ;;  %4875 = vmatmul.mubr.bf16.gmra.mxu0 %v4546_v52  ;;  %v4023_v26 = vadd.f32 %v3885_v14, %v2940_v63  ;;  %v1818_v4 = vadd.f32 %v1752_v20, %v1670_v34  ;;  %v4830_v0 = vpop.f32.mrf.mxu0 }
 0x3d4   : > { %v4021_v5 = vadd.f32 %v3881_v21, %v2938_v48  ;;  %v2066_v37 = vsel %vm1954_vm4, %v10340_v54, %v2065_v33  ;;  %v2070_v60 = vsel %vm1954_vm4, %v2065_v33, %v10007_v7  ;;  %v2345_v48 = vmul.f32 %v8860_v28, %v10215_v58 }
 0x3d5   : > { %v2203_v27 = vmul.f32 %v2066_v37, %v1816_v42  ;;  %v2415_v63 = vmul.f32 %v9023_v44, %v10266_v24  ;;  %v4101_v20 = vadd.f32 %v10267_v46, %v4023_v26  ;;  %v2205_v39 = vmul.f32 %v2070_v60, %v1818_v4 }
 0x3d6   : > { %v4099_v19 = vadd.f32 %v10267_v46, %v4021_v5  ;;  %v2417_v61 = vmul.f32 %v9061_v35, %v10266_v24  ;;  %v2553_v21 = vmul.f32 %v10280_v13, %v9213_v29  ;;  %v2555_v52 = vmul.f32 %v10280_v13, %v9257_v62  ;;  %v9279_v5 = vpop.f32.mrf.mxu0 }
 0x3d7   : > { %v2479_v34 = vadd.f32 %v2415_v63, %v2343_v56  ;;  %v3015_v14 = vmul.f32 %v8827_v6, %v10292_v49  ;;  %10341 = vst [vmem:[#allocation70_spill] sm:$0xff] %v9279_v5  ;;  %v4167_v42 = vmax.f32 %v4101_v20, 0.0  ;;  %v3017_v26 = vmul.f32 %v8860_v28, %v10292_v49  ;;  %v9291_v56 = vld [vmem:[%s10056_s1 + $0x3d0] sm:$0xff] }
 0x3d8   : > { %v4165_v33 = vmax.f32 %v4099_v19, 0.0  ;;  %v2481_v54 = vadd.f32 %v2417_v61, %v2345_v48  ;;  %v3093_v4 = vmul.f32 %v9023_v44, %v10320_v32  ;;  %v5363_v19 = vld [vmem:[%s10056_s1 + $0x3c0] sm:$0xff]  ;;  %v3095_v60 = vmul.f32 %v9061_v35, %v10320_v32  ;;  %v4833_v0 = vpop.f32.mrf.mxu0 }
 0x3d9   : > { %v2617_v37 = vadd.f32 %v2553_v21, %v2479_v34  ;;  %v10342_v48 = vld [vmem:[#allocation66_spill] sm:$0xff]  ;;  %v4233_v20 = vmin.f32 %v4167_v42, 6.0  ;;  %v3553_v41 = vrot.slane %v5363_v19, 7  ;;  %v1525_v32 = vmul.f32 %v10137_v51, %v8747_v50 }
 0x3da   : > { %v4231_v6 = vmin.f32 %v4165_v33, 6.0  ;;  %v3237_v63 = vmul.f32 %v10342_v48, %v9213_v29  ;;  %v9297_v61 = vadd.f32 %v2555_v52, %v2481_v54  ;;  %v3159_v7 = vadd.f32 %v3093_v4, %v3015_v14 }
 0x3db   : > { %v3239_v43 = vmul.f32 %v10342_v48, %v9257_v62  ;;  %v2799_v45 = vrot.slane %v2617_v37, 1  ;;  %v3161_v11 = vadd.f32 %v3095_v60, %v3017_v26  ;;  %v3557_v33 = vrot.slane %v9291_v56, 7  ;;  %v1683_v37 = vld [vmem:[#allocation2 + $0x238] sm:$0xff]  ;;  %v1685_v56 = vld [vmem:[#allocation2 + $0x248] sm:$0x7f] }
 0x3dc   : > { %v4269_v21 = vpack.c.bf16 %v4233_v20, %v4231_v6  ;;  %v2803_v34 = vrot.slane %v9297_v61, 1  ;;  %v3303_v5 = vadd.f32 %v3237_v63, %v3159_v7  ;;  %v10343_v42 = vrot.slane %v9092_v1, 1 }
 0x3dd   : > { %v3305_v14 = vadd.f32 %v3239_v43, %v3161_v11  ;;  %v10344_v54 = vrot.slane %v9079_v22, 7  ;;  %v3558_v26 = vsel %vm3442_vm5, %v3553_v41, %v3557_v33  ;;  %v1527_v22 = vmul.f32 %v10137_v51, %v8899_v31  ;;  %v1887_v11 = vld [vmem:[%s10056_s1 + $0x1e8] sm:$0xff] }
 0x3de   : > { %v2800_v52 = vsel %vm1954_vm4, %v10343_v42, %v2799_v45  ;;  %v4566_v19 = vshrl.u32 %v4269_v21, 16  ;;  %v4569_v6 = vshll.u32 %v4269_v21, 16  ;;  %v2804_v7 = vsel %vm1954_vm4, %v2799_v45, %v2803_v34 }
 0x3df   : > { %v3554_v4 = vsel %vm3442_vm5, %v10344_v54, %v3553_v41  ;;  %v2937_v50 = vadd.f32 %v2800_v52, %v2203_v27  ;;  %v2939_v1 = vadd.f32 %v2804_v7, %v2205_v39  ;;  %v9317_v63 = vmul.f32 %v3558_v26, %v3305_v14  ;;  %v9331_v27 = vld [vmem:[%s10056_s1 + $0x1f8] sm:$0xff] }
 0x3e0   : > { %v3691_v60 = vmul.f32 %v3554_v4, %v3303_v5  ;;  %v4568_v43 = vrot.slane %v4566_v19, 3  ;;  %v4571_v41 = vrot.slane %v4569_v6, 4  ;;  %v1607_v0 = vmul.f32 %v10141_v2, %v8933_v57 }
 0x3e1   : > { %v1609_v45 = vmul.f32 %v10141_v2, %v9114_v47  ;;  %v3882_v5 = vrot.slane %v9317_v63, 2  ;;  %v1755_v20 = vmul.f32 %v6204_v40, %v9153_v55  ;;  %v1757_v21 = vmul.f32 %v6204_v40, %v1683_v37 }
 0x3e2   : > { %v3878_v39 = vrot.slane %v3691_v60, 2  ;;  %v9337_v42 = vor.u32 %v4571_v41, %v4568_v43  ;;  %v1673_v52 = vadd.f32 %v1607_v0, %v1525_v32  ;;  %v2075_v54 = vrot.slane %v1887_v11, 1  ;;  %v2488_v43 = vld [vmem:[#allocation2 + $0x248] sm:$0xff] }
 0x3e3   : > { %v1675_v14 = vadd.f32 %v1609_v45, %v1527_v22  ;;  %v10345_v4 = vrot.slane %v9119_v9, 2  ;;  %v10010_v6 = vrot.slane %v9331_v27, 1  ;;  %v2348_v7 = vmul.f32 %v10143_v23, %v8899_v31 }
 0x3e4   : > { %v3883_v19 = vsel %vm3767_vm6, %v3878_v39, %v3882_v5  ;;  %v4573_v60 = vsel %vm4305_vm7, %v9134_v3, %v9337_v42  ;;  %v1821_v11 = vadd.f32 %v1755_v20, %v1673_v52  ;;  %v10346_v41 = vrot.slane %v9124_v16, 1 }
 0x3e5   : > { %v3879_v26 = vsel %vm3767_vm6, %v10345_v4, %v3878_v39  ;;  %v4022_v22 = vadd.f32 %v3883_v19, %v2939_v1  ;;  %5397 = vmatprep.mubr.msk.bf16.mxu0 %vm442_vm3, %v4573_v60  ;;  %v1823_v9 = vadd.f32 %v1757_v21, %v1675_v14  ;;  %v2080_v45 = vsel %vm1954_vm4, %v2075_v54, %v10010_v6 }
 0x3e6   : > { %v4020_v32 = vadd.f32 %v3879_v26, %v2937_v50  ;;  %v2076_v0 = vsel %vm1954_vm4, %v10346_v41, %v2075_v54  ;;  %v2350_v39 = vmul.f32 %v10143_v23, %v8933_v57  ;;  %v2420_v20 = vmul.f32 %v6201_v38, %v9114_v47  ;;  %v10348_v41 = vld [vmem:[#allocation39_spill] sm:$0xff] }
 0x3e7   : > { %v4100_v50 = vadd.f32 %v10142_v30, %v4022_v22  ;;  %v2208_v1 = vmul.f32 %v2076_v0, %v1821_v11  ;;  %v2210_v21 = vmul.f32 %v2080_v45, %v1823_v9  ;;  %v2422_v16 = vmul.f32 %v6201_v38, %v9153_v55 }
 0x3e8   : > { %v4098_v3 = vadd.f32 %v10142_v30, %v4020_v32  ;;  %v2558_v52 = vmul.f32 %v6265_v17, %v1683_v37  ;;  %v2560_v14 = vmul.f32 %v6265_v17, %v2488_v43  ;;  %v2484_v26 = vadd.f32 %v2420_v20, %v2348_v7  ;;  %v10347_v32 = vld [vmem:[#allocation45_spill] sm:$0xff]  ;;  %v5368_v17 = vld [vmem:[%s10056_s1 + $0x3e8] sm:$0xff] }
 0x3e9   : > { %v4166_v4 = vmax.f32 %v4100_v50, 0.0  ;;  %v3020_v23 = vmul.f32 %v10330_v36, %v8899_v31  ;;  %v2486_v19 = vadd.f32 %v2422_v16, %v2350_v39  ;;  %v3022_v60 = vmul.f32 %v10330_v36, %v8933_v57  ;;  %v9382_v7 = vld [vmem:[%s10056_s1 + $0x3f8] sm:$0xff]  ;;  %v9388_v39 = vpop.f32.mrf.mxu0 }
 0x3ea   : > { %v4164_v54 = vmax.f32 %v4098_v3, 0.0  ;;  %v3098_v22 = vmul.f32 %v10347_v32, %v9114_v47  ;;  %v3100_v38 = vmul.f32 %v10347_v32, %v9153_v55  ;;  %v2622_v9 = vadd.f32 %v2558_v52, %v2484_v26 }
 0x3eb   : > { %v4232_v11 = vmin.f32 %v4166_v4, 6.0  ;;  %v3242_v57 = vmul.f32 %v10348_v41, %v1683_v37  ;;  %v9385_v0 = vadd.f32 %v2560_v14, %v2486_v19  ;;  %v3244_v55 = vmul.f32 %v10348_v41, %v2488_v43  ;;  %v4838_v52 = vpop.f32.mrf.mxu0 }
 0x3ec   : > { %v4230_v31 = vmin.f32 %v4164_v54, 6.0  ;;  %v3164_v47 = vadd.f32 %v3098_v22, %v3020_v23  ;;  %v3166_v45 = vadd.f32 %v3100_v38, %v3022_v60  ;;  %v2809_v50 = vrot.slane %v2622_v9, 1 }
 0x3ed   : > { %v3563_v20 = vrot.slane %v5368_v17, 7  ;;  %v3567_v16 = vrot.slane %v9382_v7, 7  ;;  %v2813_v6 = vrot.slane %v9385_v0, 1  ;;  %v1524_v37 = vmul.f32 %v8860_v28, %v10148_v25 }
 0x3ee   : > { %v4268_v3 = vpack.c.bf16 %v4232_v11, %v4230_v31  ;;  %v3308_v54 = vadd.f32 %v3242_v57, %v3164_v47  ;;  %v3310_v4 = vadd.f32 %v3244_v55, %v3166_v45  ;;  %v10349_v23 = vrot.slane %v9192_v18, 1  ;;  %v9406_v31 = vpop.f32.mrf.mxu0 }
 0x3ef   : > { %v10350_v19 = vrot.slane %v9190_v10, 7  ;;  %v2814_v22 = vsel %vm1954_vm4, %v2809_v50, %v2813_v6  ;;  %v3568_v28 = vsel %vm3442_vm5, %v3563_v20, %v3567_v16  ;;  %v1886_v10 = vld [vmem:[%s10056_s1 + $0x1e0] sm:$0xff]  ;;  %v1606_v47 = vmul.f32 %v9061_v35, %v10149_v15 }
 0x3f0   : > { %v4557_v14 = vshrl.u32 %v4268_v3, 16  ;;  %v4560_v26 = vshll.u32 %v4268_v3, 16  ;;  %v2810_v43 = vsel %vm1954_vm4, %v10349_v23, %v2809_v50  ;;  %v2944_v9 = vadd.f32 %v2814_v22, %v2210_v21  ;;  %v9422_v21 = vld [vmem:[%s10056_s1 + $0x1f0] sm:$0xff]  ;;  %v4841_v55 = vpop.f32.mrf.mxu0 }
 0x3f1   : > { %v3564_v60 = vsel %vm3442_vm5, %v10350_v19, %v3563_v20  ;;  %v2942_v38 = vadd.f32 %v2810_v43, %v2208_v1  ;;  %v9408_v41 = vmul.f32 %v3568_v28, %v3310_v4  ;;  %v1526_v1 = vmul.f32 %v9023_v44, %v10148_v25 }
 0x3f2   : > { %v3696_v17 = vmul.f32 %v3564_v60, %v3308_v54  ;;  %v4559_v11 = vrot.slane %v4557_v14, 3  ;;  %v4562_v18 = vrot.slane %v4560_v26, 4  ;;  %v1608_v45 = vmul.f32 %v10149_v15, %v9213_v29  ;;  %v9429_v54 = vld [vmem:[#allocation2] sm:$0xff] }
 0x3f3   : > { %v3892_v50 = vrot.slane %v9408_v41, 2  ;;  %v1754_v20 = vmul.f32 %v6284_v12, %v9257_v62  ;;  %v1756_v4 = vmul.f32 %v9429_v54, %v6284_v12  ;;  %v10351_v52 = vrot.slane %v9223_v8, 2 }
 0x3f4   : > { %v3888_v57 = vrot.slane %v3696_v17, 2  ;;  %v9424_v3 = vor.u32 %v4562_v18, %v4559_v11  ;;  %v1672_v26 = vadd.f32 %v1606_v47, %v1524_v37  ;;  %v1674_v23 = vadd.f32 %v1608_v45, %v1526_v1 }
 0x3f5   : > { %v2073_v43 = vrot.slane %v1886_v10, 1  ;;  %v2077_v28 = vrot.slane %v9422_v21, 1  ;;  %v10352_v18 = vrot.slane %v9230_v53, 1  ;;  %v2419_v53 = vmul.f32 %v10266_v24, %v9213_v29 }
 0x3f6   : > { %v3889_v14 = vsel %vm3767_vm6, %v10351_v52, %v3888_v57  ;;  %v4564_v19 = vsel %vm4305_vm7, %v9240_v59, %v9424_v3  ;;  %v3893_v60 = vsel %vm3767_vm6, %v3888_v57, %v3892_v50  ;;  %v1820_v11 = vadd.f32 %v1754_v20, %v1672_v26 }
 0x3f7   : > { %v4025_v22 = vadd.f32 %v3889_v14, %v2942_v38  ;;  %4883 = vmatmul.mubr.bf16.gmra.mxu0 %v4564_v19  ;;  %v4027_v17 = vadd.f32 %v3893_v60, %v2944_v9  ;;  %v1822_v8 = vadd.f32 %v1756_v4, %v1674_v23  ;;  %v2074_v37 = vsel %vm1954_vm4, %v10352_v18, %v2073_v43  ;;  %v10353_v23 = vld [vmem:[#allocation58_spill] sm:$0xff] }
 0x3f8   : > { %v2078_v59 = vsel %vm1954_vm4, %v2073_v43, %v2077_v28  ;;  %v2347_v57 = vmul.f32 %v9023_v44, %v10215_v58  ;;  %v2349_v38 = vmul.f32 %v9061_v35, %v10215_v58  ;;  %v2207_v1 = vmul.f32 %v2074_v37, %v1820_v11  ;;  %v5367_v58 = vld [vmem:[%s10056_s1 + $0x3e0] sm:$0xff]  ;;  %v1537_v18 = vld [vmem:[#allocation2 + $0x228] sm:$0x7f] }
 0x3f9   : > { %v4103_v10 = vadd.f32 %v10267_v46, %v4025_v22  ;;  %v4105_v9 = vadd.f32 %v10267_v46, %v4027_v17  ;;  %v2209_v47 = vmul.f32 %v2078_v59, %v1822_v8  ;;  %v2421_v55 = vmul.f32 %v10266_v24, %v9257_v62  ;;  %v9473_v24 = vld [vmem:[%s10056_s1 + $0x3f0] sm:$0xff] }
 0x3fa   : > { %v2557_v20 = vmul.f32 %v9429_v54, %v10280_v13  ;;  %v3019_v4 = vmul.f32 %v9023_v44, %v10292_v49  ;;  %v2483_v14 = vadd.f32 %v2419_v53, %v2347_v57  ;;  %v3021_v26 = vmul.f32 %v9061_v35, %v10292_v49  ;;  %v1455_v13 = vld [vmem:[#allocation2 + $0x208] sm:$0x7f] }
 0x3fb   : > { %v4169_v45 = vmax.f32 %v4103_v10, 0.0  ;;  %v4171_v52 = vmax.f32 %v4105_v9, 0.0  ;;  %v3097_v43 = vmul.f32 %v10353_v23, %v9213_v29  ;;  %v2485_v44 = vadd.f32 %v2421_v55, %v2349_v38 }
 0x3fc   : > { %v3099_v60 = vmul.f32 %v10353_v23, %v9257_v62  ;;  %v3241_v22 = vmul.f32 %v9429_v54, %v10342_v48  ;;  %v2621_v11 = vadd.f32 %v2557_v20, %v2483_v14  ;;  %v3561_v8 = vrot.slane %v5367_v58, 7 }
 0x3fd   : > { %v4235_v19 = vmin.f32 %v4169_v45, 6.0  ;;  %v4237_v17 = vmin.f32 %v4171_v52, 6.0  ;;  %v3163_v35 = vadd.f32 %v3097_v43, %v3019_v4  ;;  %v9479_v29 = vadd.f32 %v2557_v20, %v2485_v44  ;;  %v2950_v4 = vld [vmem:[#allocation2 + $0x218] sm:$0x1] }
 0x3fe   : > { %v3165_v37 = vadd.f32 %v3099_v60, %v3021_v26  ;;  %v3565_v10 = vrot.slane %v9473_v24, 7  ;;  %v1529_v59 = vmul.f32 %v10137_v51, %v1455_v13  ;;  %v2807_v38 = vrot.slane %v2621_v11, 1  ;;  %v3028_v26 = vld [vmem:[#allocation2 + $0x238] sm:$0x1] }
 0x3ff   : > { %v4271_v57 = vpack.c.bf16 %v4237_v17, %v4235_v19  ;;  %v3307_v9 = vadd.f32 %v3241_v22, %v3163_v35  ;;  %v3562_v62 = vsel %vm3442_vm5, %v3557_v33, %v3561_v8  ;;  %v2811_v53 = vrot.slane %v9479_v29, 1  ;;  %v3172_v44 = vld [vmem:[#allocation2 + $0x258] sm:$0x1] }
 0x400   : > { %v3309_v45 = vadd.f32 %v3241_v22, %v3165_v37  ;;  %v3566_v55 = vsel %vm3442_vm5, %v3561_v8, %v3565_v10  ;;  %v1611_v20 = vmul.f32 %v10141_v2, %v1537_v18  ;;  %v2808_v51 = vsel %vm1954_vm4, %v2803_v34, %v2807_v38  ;;  %v1454_v2 = vld [vmem:[#allocation2 + $0x200] sm:$0x7f] }
 0x401   : > { %v4584_v58 = vshrl.u32 %v4271_v57, 16  ;;  %v4587_v52 = vshll.u32 %v4271_v57, 16  ;;  %v3695_v14 = vmul.f32 %v3562_v62, %v3307_v9  ;;  %v2812_v33 = vsel %vm1954_vm4, %v2807_v38, %v2811_v53  ;;  %v1536_v18 = vld [vmem:[#allocation2 + $0x220] sm:$0x7f] }
 0x402   : > { %v2941_v43 = vadd.f32 %v2808_v51, %v2207_v1  ;;  %v9497_v13 = vmul.f32 %v3566_v55, %v3309_v45  ;;  %v1677_v19 = vadd.f32 %v1611_v20, %v1529_v59  ;;  %v2943_v17 = vadd.f32 %v2812_v33, %v2209_v47  ;;  %v1684_v37 = vld [vmem:[#allocation2 + $0x240] sm:$0x7f]  ;;  %v5655_v47 = vld [vmem:[%s9769_s7 + $0x18] ss:$0 sm:$0xff]  ;;  %v3027_v45 = vld [vmem:[#allocation2 + $0x230] sm:$0x1] }
 0x403   : > { %v4586_v60 = vrot.slane %v4584_v58, 3  ;;  %v4589_v22 = vrot.slane %v4587_v52, 4  ;;  %v3886_v11 = vrot.slane %v3695_v14, 2  ;;  %v1759_v34 = vmul.f32 %v6204_v40, %v1685_v56  ;;  %v2949_v40 = vld [vmem:[#allocation2 + $0x210] sm:$0x1] }
 0x404   : > { %v3890_v61 = vrot.slane %v9497_v13, 2  ;;  %v3024_v35 = vmul.f32 %v10330_v36, %v2950_v4  ;;  %v3102_v8 = vmul.f32 %v10347_v32, %v3028_v26  ;;  %v3246_v57 = vmul.f32 %v5655_v47, %v3172_v44  ;;  %v3171_v55 = vld [vmem:[#allocation2 + $0x250] sm:$0x1] }
 0x405   : > { %v9503_v1 = vor.u32 %v4589_v22, %v4586_v60  ;;  %v3887_v59 = vsel %vm3767_vm6, %v3882_v5, %v3886_v11  ;;  %v1528_v38 = vmul.f32 %v10148_v25, %v1454_v2  ;;  %v1825_v32 = vadd.f32 %v1759_v34, %v1677_v19  ;;  %v4844_v0 = vpop.f32.mrf.mxu0 }
 0x406   : > { %v3891_v36 = vsel %vm3767_vm6, %v3886_v11, %v3890_v61  ;;  %v4024_v9 = vadd.f32 %v3887_v59, %v2941_v43  ;;  %v3168_v62 = vadd.f32 %v3102_v8, %v3024_v35  ;;  %v1610_v20 = vmul.f32 %v10149_v15, %v1536_v18 }
 0x407   : > { %v4591_v63 = vsel %vm4305_vm7, %v9337_v42, %v9503_v1  ;;  %v4026_v5 = vadd.f32 %v3891_v36, %v2943_v17  ;;  %v1758_v4 = vmul.f32 %v6284_v12, %v1684_v37  ;;  %v10354_v58 = vrot.slane %v9331_v27, 1 }
 0x408   : > { %5398 = vmatprep.mubr.msk.bf16.mxu0 %vm442_vm3, %v4591_v63  ;;  %v4102_v25 = vadd.f32 %v10142_v30, %v4024_v9  ;;  %v3312_v51 = vadd.f32 %v3246_v57, %v3168_v62  ;;  %v3023_v14 = vmul.f32 %v10292_v49, %v2949_v40  ;;  %v1676_v26 = vadd.f32 %v1610_v20, %v1528_v38  ;;  %v9547_v40 = vld [vmem:[%s9772_s10] ss:$0 sm:$0xff] }
 0x409   : > { %v2212_v52 = vmul.f32 %v10354_v58, %v1825_v32  ;;  %v4104_v56 = vadd.f32 %v10142_v30, %v4026_v5  ;;  %v3101_v42 = vmul.f32 %v10353_v23, %v3027_v45  ;;  %v3245_v33 = vmul.f32 %v10342_v48, %v3171_v55  ;;  %v10355_v45 = vld [vmem:[#allocation20_spill] sm:$0xff]  ;;  %v10356_v63 = vld [vmem:[#allocation21_spill] sm:$0xff] }
 0x40a   : > { %v4168_v15 = vmax.f32 %v4102_v25, 0.0  ;;  %v3700_v12 = vmul.f32 %v3567_v16, %v3312_v51  ;;  %v1824_v27 = vadd.f32 %v1758_v4, %v1676_v26  ;;  %v4837_v36 = vadd.f32 %v9547_v40, %v9388_v39 }
 0x40b   : > { %v4170_v43 = vmax.f32 %v4104_v56, 0.0  ;;  %v2946_v13 = vadd.f32 %v2813_v6, %v2212_v52  ;;  %v3167_v19 = vadd.f32 %v3101_v42, %v3023_v14  ;;  %v4840_v32 = vadd.f32 %v9547_v40, %v9406_v31 }
 0x40c   : > { %v3896_v44 = vrot.slane %v3700_v12, 2  ;;  %v4234_v2 = vmin.f32 %v4168_v15, 6.0  ;;  %v2211_v60 = vmul.f32 %v2077_v28, %v1824_v27  ;;  %v4846_v28 = vpop.f32.mrf.mxu0  ;;  %v9554_v55 = vadd.f32 %v4837_v36, %v10355_v45 }
 0x40d   : > { %v4236_v49 = vmin.f32 %v4170_v43, 6.0  ;;  %v3311_v22 = vadd.f32 %v3245_v33, %v3167_v19  ;;  %v9557_v5 = vadd.f32 %v4840_v32, %v10356_v63  ;;  %v4845_v15 = vadd.f32 %v9547_v40, %v4844_v0  ;;  %v10358_v43 = vld [vmem:[#allocation22_spill] sm:$0xff] }
 0x40e   : > { %v3897_v48 = vsel %vm3767_vm6, %v3892_v50, %v3896_v44  ;;  %v2945_v6 = vadd.f32 %v2811_v53, %v2211_v60  ;;  %v4847_v37 = vpop.f32.mrf.mxu0  ;;  %v10360_v60 = vld [vmem:[#allocation24_spill] sm:$0xff] }
 0x40f   : > { %v4270_v23 = vpack.c.bf16 %v4236_v49, %v4234_v2  ;;  %v4029_v7 = vadd.f32 %v3897_v48, %v2946_v13  ;;  %v3699_v16 = vmul.f32 %v3565_v10, %v3311_v22  ;;  %v4947_v39 = vpack.c.bf16 %v9557_v5, %v9554_v55  ;;  %v10359_v2 = vld [vmem:[#allocation25_spill] sm:$0xff]  ;;  %v10386_v5 = vld [vmem:[#allocation15_spill] sm:$0xff] }
 0x410   : > { %v4849_v29 = vpop.f32.mrf.mxu0  ;;  %v4848_v33 = vadd.f32 %v9547_v40, %v4847_v37  ;;  %v9571_v13 = vadd.f32 %v4845_v15, %v10358_v43 }
 0x411   : > { %v4575_v17 = vshrl.u32 %v4270_v23, 16  ;;  %v4578_v11 = vshll.u32 %v4270_v23, 16  ;;  %v4107_v34 = vadd.f32 %v10267_v46, %v4029_v7  ;;  %v3894_v21 = vrot.slane %v3699_v16, 2  ;;  %v10364_v29 = vld [vmem:[#allocation29_spill] sm:$0xff] }
 0x413   : > { %v4577_v35 = vrot.slane %v4575_v17, 3  ;;  %v4580_v8 = vrot.slane %v4578_v11, 4  ;;  %v4173_v41 = vmax.f32 %v4107_v34, 0.0  ;;  %v3895_v50 = vsel %vm3767_vm6, %v3890_v61, %v3894_v21  ;;  %v10361_v11 = vld [vmem:[#allocation27_spill] sm:$0xff]  ;;  %v10362_v21 = vld [vmem:[#allocation26_spill] sm:$0xff] }
 0x414   : > { %v4028_v18 = vadd.f32 %v3895_v50, %v2945_v6 }
 0x415   : > { %v4581_v59 = vor.u32 %v4580_v8, %v4577_v35  ;;  %v4239_v24 = vmin.f32 %v4173_v41, 6.0 }
 0x416   : > { %v4106_v10 = vadd.f32 %v10142_v30, %v4028_v18 }
 0x417   : > { %v4582_v53 = vsel %vm4305_vm7, %v9424_v3, %v4581_v59  ;;  %v4273_v47 = vpack.c.bf16 %v4239_v24, %v4239_v24  ;;  %v10363_v24 = vld [vmem:[#allocation28_spill] sm:$0xff] }
 0x418   : > { %4891 = vmatmul.mubr.bf16.gmra.mxu0 %v4582_v53  ;;  %v4172_v46 = vmax.f32 %v4106_v10, 0.0 }
 0x419   : > { %v4602_v57 = vshrl.u32 %v4273_v47, 16  ;;  %v4605_v38 = vshll.u32 %v4273_v47, 16 }
 0x41a   : > { %v4238_v61 = vmin.f32 %v4172_v46, 6.0  ;;  %v9608_v46 = vld.sshfl [vmem:[%s10365_s2] sm:$0x11 pattern:$0x75316420] }
 0x41b   : > { %v4604_v9 = vrot.slane %v4602_v57, 3  ;;  %v4607_v30 = vrot.slane %v4605_v38, 4  ;;  %v5720_v57 = vmov 1966171168  }
 0x41c   : > { %v4272_v3 = vpack.c.bf16 %v4238_v61, %v4238_v61  ;;  %v4966_v38 = vunpack.c.l.s4 %v5720_v57  ;;  %v4964_v61 = vcombine.high %v9608_v46, %v9608_v46 }
 0x41d   : > { %v4608_v62 = vor.u32 %v4607_v30, %v4604_v9  ;;  %v10366_v9 = vld [vmem:[#allocation38_spill] sm:$0xff] }
 0x41e   : > { %v4593_v20 = vshrl.u32 %v4272_v3, 16  ;;  %v4596_v4 = vshll.u32 %v4272_v3, 16  ;;  %v4967_v36 = vunpack.c.0.s8 %v4966_v38  ;;  %v10374_v38 = vld [vmem:[#allocation34_spill] sm:$0xff] }
 0x41f   : > { %v4609_v25 = vsel %vm4305_vm7, %v9503_v1, %v4608_v62  ;;  %v10357_v1 = vld [vmem:[#allocation23_spill] sm:$0xff] }
 0x420   : > { %5399 = vmatprep.mubr.msk.bf16.mxu0 %vm442_vm3, %v4609_v25  ;;  %v4595_v58 = vrot.slane %v4593_v20, 3  ;;  %v4598_v31 = vrot.slane %v4596_v4, 4  ;;  %v9568_v12 = vadd.f32 %v4848_v33, %v10357_v1  ;;  %v9613_v30 = vsub.s32 %v4967_v36, %v10366_v9  ;;  %v10375_v9 = vld [vmem:[#allocation83_spill] sm:$0xff] }
 0x422   : > { %v4599_v52 = vor.u32 %v4598_v31, %v4595_v58  ;;  %v4948_v19 = vpack.c.bf16 %v9568_v12, %v9571_v13  ;;  %v4971_v32 = vrot.slane %v9608_v46, %v9613_v30  ;;  %v4978_v3 = vrot.slane %v4964_v61, %v9613_v30  ;;  %v10367_v58 = vld [vmem:[#allocation30_spill] sm:$0xff]  ;;  %v5604_v12 = vld [vmem:[%s9773_s11 + $0x18] sm:$0xff]   ;;  %v5605_v13 = vld [vmem:[%s9773_s11 + $0x10] sm:$0xff]  }
 0x424   : > { %v4600_v51 = vsel %vm4305_vm7, %v4581_v59, %v4599_v52  ;;  %5013 = vmatprep.mubr.bf16.mxu1 %v4978_v3  ;;  %v10368_v52 = vld [vmem:[#allocation31_spill] sm:$0xff]  ;;  %v4824_v3 = vadd.f32 %v9547_v40, %v10375_v9 }
 0x425   : > { %4899 = vmatmul.mubr.bf16.gmra.mxu0 %v4600_v51 }
 0x429   : > { %v4852_v14 = vpop.f32.mrf.mxu0 }
 0x42a   : > { %v4853_v44 = vadd.f32 %v9547_v40, %v4852_v14 }
 0x42b   : > { %v4854_v56 = vpop.f32.mrf.mxu0 }
 0x42c   : > { %v9581_v22 = vadd.f32 %v4853_v44, %v10360_v60 }
 0x42d   : > { %v4855_v26 = vpop.f32.mrf.mxu0 }
 0x42e   : > { %v4856_v27 = vadd.f32 %v9547_v40, %v4855_v26 }
 0x42f   : > { %v4857_v42 = vpop.f32.mrf.mxu0 }
 0x430   : > { %v9578_v49 = vadd.f32 %v4856_v27, %v10359_v2 }
 0x432   : > { %v4949_v7 = vpack.c.bf16 %v9578_v49, %v9581_v22  ;;  %v5603_v49 = vld [vmem:[%s9773_s11 + $0x20] sm:$0xff]  }
 0x433   : > { %v5607_v22 = vld [vmem:[%s9773_s11] sm:$0xff]  }
 0x44c   : > { %v4860_v48 = vpop.f32.mrf.mxu0 }
 0x44d   : > { %v4861_v16 = vadd.f32 %v9547_v40, %v4860_v48 }
 0x44e   : > { %v4862_v23 = vpop.f32.mrf.mxu0 }
 0x44f   : > { %v9591_v28 = vadd.f32 %v4861_v16, %v10362_v21 }
 0x450   : > { %v4863_v6 = vpop.f32.mrf.mxu0 }
 0x451   : > { %v4864_v0 = vadd.f32 %v9547_v40, %v4863_v6 }
 0x452   : > { %v4865_v17 = vpop.f32.mrf.mxu0 }
 0x453   : > { %v9588_v34 = vadd.f32 %v4864_v0, %v10361_v11  ;;  %v10369_v0 = vld [vmem:[#allocation70_spill] sm:$0xff] }
 0x454   : > { %v4832_v17 = vadd.f32 %v9547_v40, %v10369_v0  ;;  %v10388_v0 = vld [vmem:[#allocation14_spill] sm:$0xff] }
 0x455   : > { %v4950_v35 = vpack.c.bf16 %v9588_v34, %v9591_v28  ;;  %v10402_v28 = vld [vmem:[#allocation6_spill] sm:$0xff] }
 0x470   : > { %v4868_v8 = vpop.f32.mrf.mxu0 }
 0x471   : > { %v4869_v50 = vadd.f32 %v9547_v40, %v4868_v8  ;;  %v10370_v8 = vld [vmem:[#allocation35_spill] sm:$0xff] }
 0x472   : > { %v4870_v41 = vpop.f32.mrf.mxu0 }
 0x473   : > { %v9598_v10 = vadd.f32 %v4869_v50, %v10363_v24  ;;  %v10371_v50 = vld [vmem:[#allocation36_spill] sm:$0xff]  ;;  %v10373_v24 = vld [vmem:[#allocation86_spill] sm:$0xff] }
 0x474   : > { %v4871_v18 = vpop.f32.mrf.mxu0 }
 0x475   : > { %v4872_v37 = vadd.f32 %v9547_v40, %v4871_v18 }
 0x476   : > { %v4873_v59 = vpop.f32.mrf.mxu0 }
 0x477   : > { %v9601_v53 = vadd.f32 %v4872_v37, %v10364_v29  ;;  %v10372_v37 = vld [vmem:[#allocation37_spill] sm:$0xff]  ;;  %v4829_v29 = vadd.f32 %v9547_v40, %v10373_v24 }
 0x479   : > { %v4951_v47 = vpack.c.bf16 %v9601_v53, %v9598_v10  ;;  %v10398_v53 = vld [vmem:[#allocation8_spill] sm:$0xff] }
 0x493   : > { %v4876_v62 = vpop.f32.mrf.mxu0 }
 0x494   : > { %v4877_v63 = vadd.f32 %v9547_v40, %v4876_v62  ;;  %v10376_v62 = vld [vmem:[#allocation19_spill] sm:$0xff] }
 0x495   : > { %v4878_v45 = vpop.f32.mrf.mxu0 }
 0x496   : > { %v4931_v31 = vadd.f32 %v4877_v63, %v10367_v58  ;;  %v4920_v45 = vadd.f32 %v4832_v17, %v10376_v62  ;;  %v10377_v63 = vld [vmem:[#allocation33_spill] sm:$0xff] }
 0x497   : > { %v4879_v20 = vpop.f32.mrf.mxu0 }
 0x498   : > { %v4880_v4 = vadd.f32 %v9547_v40, %v4879_v20 }
 0x499   : > { %v4881_v25 = vpop.f32.mrf.mxu0 }
 0x49a   : > { %v4932_v51 = vadd.f32 %v4880_v4, %v10368_v52  ;;  %v10378_v25 = vld [vmem:[#allocation69_spill] sm:$0xff] }
 0x49b   : > { %v4821_v58 = vadd.f32 %v9547_v40, %v10378_v25  ;;  %v10400_v25 = vld [vmem:[#allocation9_spill] sm:$0xff] }
 0x49c   : > { %v4952_v14 = vpack.c.bf16 %v4932_v51, %v4931_v31  ;;  %v10379_v31 = vld [vmem:[#allocation18_spill] sm:$0xff]  ;;  %v10380_v51 = vld [vmem:[#allocation32_spill] sm:$0xff] }
 0x49d   : > { %v4919_v52 = vadd.f32 %v4829_v29, %v10379_v31  ;;  %v10393_v29 = vld [vmem:[#allocation40_spill] sm:$0xff]  ;;  %v10401_v31 = vld [vmem:[#allocation7_spill] sm:$0xff] }
 0x4b7   : > { %v4884_v56 = vpop.f32.mrf.mxu0 }
 0x4b8   : > { %v4885_v57 = vadd.f32 %v9547_v40, %v4884_v56 }
 0x4b9   : > { %v4886_v26 = vpop.f32.mrf.mxu0 }
 0x4ba   : > { %v4933_v56 = vadd.f32 %v4885_v57, %v10380_v51  ;;  %v10381_v26 = vld [vmem:[#allocation46_spill] sm:$0xff]  ;;  %v4792_v57 = vadd.f32 %v9547_v40, %v10393_v29 }
 0x4bb   : > { %v4887_v42 = vpop.f32.mrf.mxu0 }
 0x4bc   : > { %v4888_v21 = vadd.f32 %v9547_v40, %v4887_v42  ;;  %v4816_v42 = vadd.f32 %v9547_v40, %v10381_v26 }
 0x4bd   : > { %v4889_v33 = vpop.f32.mrf.mxu0 }
 0x4be   : > { %v4934_v20 = vadd.f32 %v4888_v21, %v10377_v63  ;;  %v10382_v33 = vld [vmem:[#allocation17_spill] sm:$0xff] }
 0x4d8   : > { %v4892_v15 = vpop.f32.mrf.mxu0 }
 0x4d9   : > { %v4893_v16 = vadd.f32 %v9547_v40, %v4892_v15  ;;  %v4918_v15 = vadd.f32 %v4824_v3, %v10382_v33  ;;  %v10396_v3 = vld [vmem:[#allocation10_spill] sm:$0xff] }
 0x4da   : > { %v4894_v1 = vpop.f32.mrf.mxu0 }
 0x4db   : > { %v4935_v61 = vadd.f32 %v4893_v16, %v10374_v38  ;;  %v4946_v1 = vpack.c.bf16 %v4920_v45, %v4919_v52  ;;  %v10387_v16 = vld [vmem:[#allocation67_spill] sm:$0xff]  ;;  %v10397_v45 = vld [vmem:[#allocation64_spill] sm:$0xff] }
 0x4dc   : > { %v4895_v43 = vpop.f32.mrf.mxu0  ;;  %v4784_v10 = vadd.f32 %v9547_v40, %v10397_v45 }
 0x4dd   : > { %v4896_v60 = vadd.f32 %v9547_v40, %v4895_v43  ;;  %v4953_v43 = vpack.c.bf16 %v4934_v20, %v4933_v56  ;;  %v10399_v20 = vld [vmem:[#allocation63_spill] sm:$0xff] }
 0x4de   : > { %v4897_v27 = vpop.f32.mrf.mxu0  ;;  %v4908_v52 = vadd.f32 %v4784_v10, %v10401_v31 }
 0x4df   : > { %v4936_v41 = vadd.f32 %v4896_v60, %v10370_v8  ;;  %v10383_v27 = vld [vmem:[#allocation43_spill] sm:$0xff]  ;;  %v10390_v8 = vld [vmem:[#allocation13_spill] sm:$0xff] }
 0x4e1   : > { %v4954_v4 = vpack.c.bf16 %v4936_v41, %v4935_v61 }
 0x4e5   : > { %v4900_v44 = vpop.f32.mrf.mxu0 }
 0x4e6   : > { %v4901_v48 = vadd.f32 %v9547_v40, %v4900_v44  ;;  %v4813_v44 = vadd.f32 %v9547_v40, %v10383_v27 }
 0x4e7   : > { %v4902_v2 = vpop.f32.mrf.mxu0 }
 0x4e8   : > { %v4937_v18 = vadd.f32 %v4901_v48, %v10371_v50  ;;  %v10384_v2 = vld [vmem:[#allocation16_spill] sm:$0xff]  ;;  %v4915_v17 = vadd.f32 %v4813_v44, %v10388_v0 }
 0x4e9   : > { %v4903_v23 = vpop.f32.mrf.mxu0  ;;  %v4917_v60 = vadd.f32 %v4821_v58, %v10384_v2  ;;  %v10385_v48 = vld [vmem:[#allocation68_spill] sm:$0xff] }
 0x4ea   : > { %v4904_v6 = vadd.f32 %v9547_v40, %v4903_v23  ;;  %v4808_v55 = vadd.f32 %v9547_v40, %v10385_v48 }
 0x4eb   : > { %v4905_v11 = vpop.f32.mrf.mxu0  ;;  %v4945_v23 = vpack.c.bf16 %v4918_v15, %v4917_v60 }
 0x4ec   : > { %v4938_v59 = vadd.f32 %v4904_v6, %v10372_v37  ;;  %v4805_v6 = vadd.f32 %v9547_v40, %v10387_v16  ;;  %v10389_v11 = vld [vmem:[#allocation41_spill] sm:$0xff]  ;;  %v4914_v41 = vadd.f32 %v4808_v55, %v10390_v8 }
 0x4ed   : > { %v4800_v21 = vadd.f32 %v9547_v40, %v10389_v11 }
 0x4ee   : > { %v4955_v36 = vpack.c.bf16 %v4938_v59, %v4937_v18  ;;  %v10391_v18 = vld [vmem:[#allocation52_spill] sm:$0xff] }
 0x4ef   : > { %v4797_v37 = vadd.f32 %v9547_v40, %v10391_v18  ;;  %v10392_v59 = vld [vmem:[#allocation12_spill] sm:$0xff] }
 0x4f0   : > { %5428 = vmatprep.subr.bf16.mxu1 %v4955_v36  ;;  %v4913_v24 = vadd.f32 %v4805_v6, %v10392_v59  ;;  %v10395_v36 = vld [vmem:[#allocation65_spill] sm:$0xff] }
 0x4f1   : > { %5429 = vmatpush3.bf16.msra.mxu1 %v4947_v39  ;;  %v4916_v39 = vadd.f32 %v4816_v42, %v10386_v5  ;;  %v4789_v9 = vadd.f32 %v9547_v40, %v10395_v36  ;;  %v4911_v62 = vadd.f32 %v4797_v37, %v10396_v3  ;;  %v5034_v42 = vld [vmem:[%s9774_s12] sm:$0x1] }
 0x4f2   : > { %5430 = vmatprep.subr.bf16.mxu1 %v4954_v4  ;;  %v4943_v61 = vpack.c.bf16 %v4914_v41, %v4913_v24  ;;  %v4781_v4 = vadd.f32 %v9547_v40, %v10399_v20  ;;  %v5602_v40 = vld [vmem:[%s9773_s11 + $0x28] sm:$0xff]  }
 0x4f3   : > { %v4944_v50 = vpack.c.bf16 %v4916_v39, %v4915_v17  ;;  %v4909_v58 = vadd.f32 %v4789_v9, %v10400_v25 }
 0x4f5   : > { %5431 = vmatpush3.bf16.msra.mxu1 %v4946_v1 }
 0x4f6   : > { %5432 = vmatprep.subr.bf16.mxu1 %v4953_v43 }
 0x4f9   : > { %5433 = vmatpush3.bf16.msra.mxu1 %v4945_v23 }
 0x4fa   : > { %5434 = vmatprep.subr.bf16.mxu1 %v4952_v14  ;;  %v10394_v14 = vld [vmem:[#allocation11_spill] sm:$0xff] }
 0x4fb   : > { %v4912_v38 = vadd.f32 %v4800_v21, %v10394_v14 }
 0x4fd   : > { %5435 = vmatpush3.bf16.msra.mxu1 %v4944_v50  ;;  %v4942_v63 = vpack.c.bf16 %v4912_v38, %v4911_v62 }
 0x4fe   : > { %5436 = vmatprep.subr.bf16.mxu1 %v4951_v47  ;;  %v4910_v47 = vadd.f32 %v4792_v57, %v10398_v53 }
 0x500   : > { %v4941_v34 = vpack.c.bf16 %v4910_v47, %v4909_v58 }
 0x501   : > { %5437 = vmatpush3.bf16.msra.mxu1 %v4943_v61 }
 0x502   : > { %5438 = vmatprep.subr.bf16.mxu1 %v4950_v35  ;;  %v4907_v35 = vadd.f32 %v4781_v4, %v10402_v28 }
 0x504   : > { %v4940_v51 = vpack.c.bf16 %v4908_v52, %v4907_v35 }
 0x505   : > { %5439 = vmatpush3.bf16.msra.mxu1 %v4942_v63 }
 0x506   : > { %5440 = vmatprep.subr.bf16.mxu1 %v4949_v7 }
 0x509   : > { %5441 = vmatpush3.bf16.msra.mxu1 %v4941_v34 }
 0x50a   : > { %5442 = vmatprep.subr.bf16.mxu1 %v4948_v19  ;;  %v5606_v19 = vld [vmem:[%s9773_s11 + $0x8] sm:$0xff]  }
 0x50d   : > { %5443 = vmatpush3.bf16.msra.mxu1 %v4940_v51 }
 0x50e   : > { %5491 = vmatprep.subr.bf16.mxu1 %v9429_v54 }
 0x510   : > { %5014 = vmatmul.mubr.bf16.vlgmr.msra.gmra.mxu1 %v4971_v32 }
 0x511   : > { %5492 = vmatpush3.bf16.msra.mxu1 %v5602_v40  ;;  %5503 = vmatprep.mubr.msk.bf16.mxu1 %vm5721_vm8, %v9429_v54 }
 0x512   : > { %5493 = vmatprep.subr.bf16.mxu1 %v9429_v54 }
 0x515   : > { %5494 = vmatpush3.bf16.msra.mxu1 %v5603_v49 }
 0x516   : > { %5495 = vmatprep.subr.bf16.mxu1 %v9429_v54 }
 0x519   : > { %5496 = vmatpush3.bf16.msra.mxu1 %v5604_v12 }
 0x51a   : > { %5497 = vmatprep.subr.bf16.mxu1 %v9429_v54 }
 0x51d   : > { %5498 = vmatpush3.bf16.msra.mxu1 %v5605_v13 }
 0x51e   : > { %5499 = vmatprep.subr.bf16.mxu1 %v9429_v54 }
 0x521   : > { %5500 = vmatpush3.bf16.msra.mxu1 %v5606_v19 }
 0x522   : > { %5501 = vmatprep.subr.bf16.mxu1 %v9429_v54 }
 0x525   : > { %5502 = vmatpush3.bf16.msra.mxu1 %v5607_v22 }
 0x5d0   : > { %v5444_v7 = vpop.f32.mrf.mxu1 }
 0x5d2   : > { %v5445_v46 = vpop.f32.mrf.mxu1 }
 0x5d3   : > { %v5446_v30 = vadd.f32 %v5445_v46, %v5444_v7 }
 0x5d4   : > { %v5447_v32 = vpop.f32.mrf.mxu1 }
 0x5d5   : > { %v5021_v56 = vpack.c.bf16 %v5446_v30, %v5446_v30 }
 0x5d6   : > { %v5448_v26 = vpop.f32.mrf.mxu1 }
 0x5d7   : > { %5504 = vmatmul.mubr.msk.bf16.vlgmr.msra.gmra.mxu1 %vm952_vm2, %v5021_v56 }
 0x697   : > { %v5108_v33 = vpop.f32.mrf.mxu1 }
 0x698   : > { %v5109_v15 = vadd.f32 %v5108_v33, %v5034_v42 }
 0x699   : > { %v5505_v1 = vpop.f32.mrf.mxu1 }
 0x69a   : > { %v5128_v43 = vsel %vm5127_vm9, %v5109_v15, -inf  ;;  %v5149_v44 = vsel %vm5148_vm10, %v5109_v15, -inf  ;;  %v5115_v2 = vsel %vm5114_vm11, %v5109_v15, -inf }
 0x69b   : > { %5129 = vmax.xlane.f32.xlu0 %v5128_v43  ;;  %v5111_v54 = vpop.f32.mrf.mxu1 }
 0x69d   : > { %v5506_v27 = vpop.f32.mrf.mxu1 }
 0x69f   : > { %5150 = vmax.xlane.f32.xlu0 %v5149_v44 }
 0x6a3   : > { %5116 = vmax.xlane.f32.xlu0 %v5115_v2 }
 0x724   : > { %v5130_v60 = vpop.xlane.xlu0 %5129 }
 0x725   : > { %v5131_v48 = vsub.f32 %v5109_v15, %v5130_v60 }
 0x727   : > { %v5132_v55 = vmul.f32 1.442695, %v5131_v48 }
 0x728   : > { %v5151_v5 = vpop.xlane.xlu0 %5150 }
 0x729   : > { %5608 = vpow2.f32 %v5132_v55  ;;  %v5152_v39 = vsub.f32 %v5109_v15, %v5151_v5 }
 0x72b   : > { %v5153_v23 = vmul.f32 1.442695, %v5152_v39 }
 0x72c   : > { %v5117_v0 = vpop.xlane.xlu0 %5116 }
 0x72d   : > { %5610 = vpow2.f32 %v5153_v23  ;;  %v5118_v17 = vsub.f32 %v5109_v15, %v5117_v0 }
 0x72f   : > { %v5119_v11 = vmul.f32 1.442695, %v5118_v17 }
 0x731   : > { %5612 = vpow2.f32 %v5119_v11 }
 0x736   : > { %v5609_v16 = vpop.eup %5608 }
 0x737   : > { %5135 = vrot.lane.b32.xlu1 %v5609_v16, %s5722_s23 }
 0x73a   : > { %v5611_v6 = vpop.eup %5610 }
 0x73b   : > { %5156 = vrot.lane.b32.xlu1 %v5611_v6, %s5723_s20 }
 0x73e   : > { %v5613_v18 = vpop.eup %5612 }
 0x73f   : > { %v5121_v37 = vsel %vm5114_vm11, %v5613_v18, 0.0 }
 0x7a9   : > { %v5136_v21 = vpop.permute.xlu1 %5135 }
 0x7aa   : > { %v5138_v8 = vsel %vm5114_vm11, %v5136_v21, 0.0 }
 0x7ab   : > { %5139 = vadd.xlane.f32.xlu1 %v5138_v8 }
 0x7ad   : > { %v5157_v41 = vpop.permute.xlu1 %5156 }
 0x7ae   : > { %v5159_v50 = vsel %vm5114_vm11, %v5157_v41, 0.0 }
 0x7af   : > { %5160 = vadd.xlane.f32.xlu0 %v5159_v50 }
 0x7b3   : > { %5122 = vadd.xlane.f32.xlu0 %v5121_v37 }
 0x834   : > { %v5140_v59 = vpop.xlane.xlu1 %5139 }
 0x835   : > { %5614 = vrcp.f32 %v5140_v59 }
 0x838   : > { %v5161_v24 = vpop.xlane.xlu0 %5160 }
 0x839   : > { %5616 = vrcp.f32 %v5161_v24 }
 0x83c   : > { %v5123_v61 = vpop.xlane.xlu0 %5122 }
 0x83d   : > { %5618 = vrcp.f32 %v5123_v61 }
 0x842   : > { %v5615_v29 = vpop.eup %5614 }
 0x843   : > { %v5142_v57 = vmul.f32 %v5615_v29, %v5609_v16 }
 0x845   : > { %5144 = vrot.lane.b32.xlu0 %v5142_v57, %s5722_s23  ;;  %s5656_s23 = scalar_lea.vmem %s5184_s15, 16 }
 0x846   : > { %v5617_v14 = vpop.eup %5616  ;;  %p5657_p11 = scmp.ne.s32.totalorder %s5184_s15, %s5656_s23 }
 0x847   : > { %v5163_v38 = vmul.f32 %v5617_v14, %v5611_v6 }
 0x848   : > { %p5658_p12 = pnand %p5657_p11, %p5833_p5 }
 0x849   : > { %5165 = vrot.lane.b32.xlu0 %v5163_v38, %s5723_s20  ;;  %s5724_s20 = smov [#allocation3]  }
 0x84a   : > { %v5619_v36 = vpop.eup %5618  ;;  %p5659_p13 = pneg %p5658_p12  ;;  %s5660_s29 = sshll.u32 %s5724_s20, 4  ;;  %s5661_s29 = int_to_ptr.vmem [resolvable:$false] %s5660_s29 }
 0x84b   : > { %v5125_v3 = vmul.f32 %v5619_v36, %v5613_v18  ;;  %s5662_s1 = scalar_lea.vmem %s5661_s29, 32  ;;  %p5663_p0 = scmp.lt.s32.totalorder %s5184_s15, %s5661_s29 }
 0x84c   : > { %p5664_p1 = scmp.lt.s32.totalorder %s5662_s1, %s5656_s23 }
 0x84e   : > { %p5665_p2 = por %p5664_p1, %p5663_p0 }
 0x850   : > { %p5666_p3 = pnand %p5665_p2, %p5659_p13 }
 0x8b7   : > { %v5145_v9 = vpop.permute.xlu0 %5144 }
 0x8b8   : > { %v5147_v62 = vadd.f32 %v5145_v9, %v5125_v3 }
 0x8bb   : > { %v5166_v45 = vpop.permute.xlu0 %5165 }
 0x8bc   : > { %v5168_v10 = vadd.f32 %v5166_v45, %v5147_v62 }
 0x8be   : > { %5169 = vst.msk [vmem:[%s433_s0] sm:$0x1] %vm5114_vm11, %v5168_v10 }
 0x8bf   : > { %5669 = shalt.err (!%p5666_p3)
}
 0x8c0   : > { %s5670_s3 = scalar_lea.hbm %s5181_s21, 16  ;;  %s5674_s0 = scalar_lea.hbm %s9775_s13, 32 }
 0x8c1   : > { %p5671_p4 = scmp.ne.s32.totalorder %s5181_s21, %s5670_s3  ;;  %p5675_p9 = scmp.lt.s32.totalorder %s5181_s21, %s9775_s13 }
 0x8c2   : > { %p5676_p10 = scmp.lt.s32.totalorder %s5674_s0, %s5670_s3 }
 0x8c3   : > { %p5672_p7 = pnand %p5671_p4, %p5833_p5 }
 0x8c4   : > { %p5677_p11 = por %p5676_p10, %p5675_p9 }
 0x8c5   : > { %p5673_p8 = pneg %p5672_p7 }
 0x8c7   : > { %p5678_p12 = pnand %p5677_p11, %p5673_p8 }
 0x8c9   : > { %5681 = shalt.err (!%p5678_p12)
}
 0x8ca   : > { %5511 = dma.vmem_to_hbm [thread:$0]  (%p5833_p5), %s5184_s15, 16, %s5181_s21, %s5171_s22  }
 0x8cb PF: > { %p5517_p13 = scmp.ge.s32.totalorder %s5716_s28, 2  ;;  %s5195_s1 = sand.u32 1, %s5704_s25  }
 0x8cc   : > { %s5196_s23 = scalar_lea.sflag [#allocation4], %s5195_s1 }
 0x8cd   : > { %p5514_p0 = pnand %p5517_p13, %p5837_p6 }
 0x8cf   : > { %p5515_p1 = pneg %p5514_p0 }
 0x8d1   : > { %5699 = dma.done.wait (%p5515_p1), %s5196_s23, 16  }
 0x8d2   : > { %5701 = vsyncadd (%p5515_p1), %s5196_s23, 4294967280  ;;  %p23_p2 = scmp.ge.s32.totalorder %s5820_s14, 4   ;;  %s10403_s25 = smov %s5708_s26 }
 0x8d3   : > { %s10404_s26 = smov %s5712_s27  ;;  %s10405_s27 = smov %s5831_s17 }
 0x8d4   : > { %s10406_s28 = smov %s5820_s14  ;;  %25 = sbr.rel (!%p23_p2) target bundleno = 8 (0x8), region = 108 }
 0x8d9   :  { %5200 = vsyncpa [#allocation4], 1 }
 0x8da   :  { %5202 = vsyncpa [#allocation4 + $0x1], 1 }

</bundles_post_ra>
